<compile_context>
chip_gen: v5e
topology: v5e:2x2
jax: 0.10.0
libtpu: 0.0.40
codegen_flags: <defaults>
</compile_context>

<pallas_src>
import functools

import jax
import jax.numpy as jnp
from jax.experimental import pallas as pl
from jax.experimental.pallas import tpu as pltpu


# ---------------------------------------------------------------------------
# Fused kernel: q_sample + denoiser (VPU FMA) + pred_x0_from_xt + L1 sums + TV.
# Grid = (B, D // TILE_D).  Accumulates per-batch sums across the D tiles
# directly into the resident output block.
# ---------------------------------------------------------------------------
def _make_fused_kernel(Cch, TILE_D, HW, W, num_k):
    base = 2 * Cch * Cch        # offset of the bias block inside packed scalars
    multi_tile = num_k > 1      # compile-time: need cross-tile D carry?

    def kernel(t_ref, p_ref, x_ref, n_ref, sums_ref, *scratch):
        carry_ref = scratch[0] if multi_tile else None
        b = pl.program_id(0)
        k = pl.program_id(1)

        tt = t_ref[b]                        # scalar t for this batch element
        st = jnp.sqrt(tt)
        std_scale = p_ref[base + 4 * Cch]

        @pl.when(k == 0)
        def _():
            sums_ref[...] = jnp.zeros_like(sums_ref)

        x = x_ref[0]                         # (C, TILE_D, HW)  x_start slab
        n = n_ref[0]                         # (C, TILE_D, HW)  noise slab

        # q_sample with drift C = -x_start:
        #   x_noisy = x_start*(1 - t) + sqrt(t)*noise   (per input channel)
        xn = [x[c] * (1.0 - tt) + st * n[c] for c in range(Cch)]

        # lane-index mask for W-direction diffs (exclude h-row boundaries);
        # hoisted out of the channel loop.
        col = jax.lax.broadcasted_iota(jnp.int32, (TILE_D, HW - 1), 1)
        w_mask = (col % W) != (W - 1)

        l_c = jnp.float32(0.0)
        l_n = jnp.float32(0.0)
        l_vlb = jnp.float32(0.0)
        tv = jnp.float32(0.0)

        for o in range(Cch):
            # synthetic model(x_noisy, t, cond): 1x1x1 conv as exact-f32
            # broadcast-FMA on the VPU (C=4 -> MXU would be ~3% utilized).
            cp = p_ref[o * Cch] * xn[0]
            np_ = p_ref[Cch * Cch + o * Cch] * xn[0]
            for c in range(1, Cch):
                cp = cp + p_ref[o * Cch + c] * xn[c]
                np_ = np_ + p_ref[Cch * Cch + o * Cch + c] * xn[c]
            cp = cp + (p_ref[base + o] + tt * p_ref[base + Cch + o])
            np_ = np_ + (p_ref[base + 2 * Cch + o] + tt * p_ref[base + 3 * Cch + o])

            # pred_x0_from_xt: x0 = xt - C*t - sqrt(t)*noise
            xr = xn[o] - tt * cp - st * np_

            # fused per-tile L1 partial sums (C_target = -x_start)
            l_c = l_c + jnp.sum(jnp.abs(cp + x[o]))
            l_n = l_n + jnp.sum(jnp.abs(np_ - n[o]))
            l_vlb = l_vlb + jnp.sum(jnp.abs(xr - x[o]))

            # total variation on v = x_rec * std_scale, fused while x_rec is
            # still in VMEM (flat layout: hw = h*W + w on the lane axis).
            v = xr * std_scale                                # (TILE_D, HW)
            d_w = jnp.abs(v[:, 1:] - v[:, :-1])               # W-direction
            tv = tv + jnp.sum(jnp.where(w_mask, d_w, 0.0))
            tv = tv + jnp.sum(jnp.abs(v[:, W:] - v[:, :-W]))  # H-direction
            tv = tv + jnp.sum(jnp.abs(v[1:, :] - v[:-1, :]))  # D (within tile)
            if multi_tile:
                # D-direction across the tile boundary via carried last plane.
                prev = carry_ref[o]                           # (1, HW)
                tv = tv + jnp.where(
                    k > 0, jnp.sum(jnp.abs(v[0:1, :] - prev)), jnp.float32(0.0))
                carry_ref[o] = v[TILE_D - 1:TILE_D, :]

        # accumulate the four scalar sums into the resident output block
        row = jax.lax.broadcasted_iota(jnp.int32, (8, 128), 0)
        step = (jnp.where(row == 0, l_c, 0.0)
                + jnp.where(row == 1, l_n, 0.0)
                + jnp.where(row == 2, l_vlb, 0.0)
                + jnp.where(row == 3, tv, 0.0))
        sums_ref[0] = sums_ref[0] + step

    return kernel


def _choose_tile_d(D, Cch, HW, max_block_bytes=2 * 1024 * 1024):
    # Largest divisor of D that is a multiple of 8 (or D itself) whose slab
    # fits a ~2 MiB per-input budget (double-buffered x 2 inputs stays well
    # under the v7x/v6e scoped-VMEM limit) -> fewest grid steps, biggest DMAs.
    for td in range(D, 0, -1):
        if D % td:
            continue
        if td != D and td % 8 != 0:
            continue
        if Cch * td * HW * 4 <= max_block_bytes:
            return td
    return D


# ---------------------------------------------------------------------------
# Wrapper: DDPM.forward / p_losses (training loss path).
# ---------------------------------------------------------------------------
def ddpm_forward_pallas(x_start, noise, t, params, cfg):
    B, Cch, D, H, W = x_start.shape
    HW = H * W
    TILE_D = _choose_tile_d(D, Cch, HW)
    assert D % TILE_D == 0
    num_k = D // TILE_D

    x_flat = x_start.reshape(B, Cch, D, HW)
    n_flat = noise.reshape(B, Cch, D, HW)

    # part_fea = part_mlp(part_embeddings.weight)  (tiny 5x64 MLP -> glue)
    emb = params["part_emb"]
    h = jax.nn.relu(emb @ params["mlp_w1"] + params["mlp_b1"])
    part_fea = h @ params["mlp_w2"] + params["mlp_b2"]          # (num_parts, F)
    cond_vec = part_fea.mean(axis=0)                            # (F,)

    b1 = params["b1"] + params["wc1"] @ cond_vec                # (C,)
    b2 = params["b2"] + params["wc2"] @ cond_vec                # (C,)

    # packed scalar params for SMEM: [w1, w2, b1, tb1, b2, tb2, std_scale]
    scal = jnp.concatenate([
        params["w1"].reshape(-1).astype(jnp.float32),
        params["w2"].reshape(-1).astype(jnp.float32),
        b1.astype(jnp.float32),
        params["tb1"].astype(jnp.float32),
        b2.astype(jnp.float32),
        params["tb2"].astype(jnp.float32),
        jnp.asarray([cfg["std_scale"]], jnp.float32),
    ])

    kernel = _make_fused_kernel(Cch, TILE_D, HW, W, num_k)
    scratch_shapes = (
        [pltpu.VMEM((Cch, 1, HW), jnp.float32)] if num_k > 1 else []
    )

    sums = pl.pallas_call(
        kernel,
        out_shape=jax.ShapeDtypeStruct((B, 8, 128), jnp.float32),
        grid_spec=pltpu.PrefetchScalarGridSpec(
            num_scalar_prefetch=0,
            grid=(B, num_k),
            in_specs=[
                pl.BlockSpec(memory_space=pltpu.MemorySpace.SMEM),        # t
                pl.BlockSpec(memory_space=pltpu.MemorySpace.SMEM),        # scalars
                pl.BlockSpec((1, Cch, TILE_D, HW), lambda b, k: (b, 0, k, 0)),
                pl.BlockSpec((1, Cch, TILE_D, HW), lambda b, k: (b, 0, k, 0)),
            ],
            out_specs=pl.BlockSpec((1, 8, 128), lambda b, k: (b, 0, 0)),
            scratch_shapes=scratch_shapes,
        ),
        compiler_params=pltpu.CompilerParams(
            dimension_semantics=("parallel", "arbitrary"),
            vmem_limit_bytes=32 * 1024 * 1024,
        ),
    )(t.astype(jnp.float32), scal, x_flat, n_flat)

    # -------- glue: combine per-batch sums into the scalar losses ----------
    N = Cch * D * H * W
    l_c = sums[:, 0, 0] / N
    l_n = sums[:, 1, 0] / N
    l_vlb = sums[:, 2, 0] / N
    tv_total = jnp.sum(sums[:, 3, 0])

    eps = cfg["eps"]
    if cfg["weighting_loss"]:
        sw1 = 1.0 / jnp.sqrt(t)
        sw2 = 1.0 / jnp.sqrt(1.0 - t + eps)
    else:
        sw1 = 1.0
        sw2 = 1.0
    loss_simple = jnp.mean(sw1 * l_c + sw2 * l_n)

    rec_weight = (1.0 - t.reshape(-1, 1)) ** 2
    # reproduces the PyTorch broadcast: (B,) * (B,1) -> (B,B), then mean()
    loss_vlb = jnp.mean(l_vlb * rec_weight)

    loss = loss_simple + loss_vlb
    loss_dict = {"train/loss_simple": loss_simple, "train/loss_vlb": loss_vlb}
    if cfg["weight_tv"] > 0:
        loss_tv = tv_total / W * cfg["weight_tv"]
        loss = loss + loss_tv
        loss_dict["loss_tv"] = loss_tv
    loss_dict["train/loss"] = loss
    return loss, loss_dict


# ---------------------------------------------------------------------------
# Pure-JAX reference (mirrors the PyTorch code) for a correctness check.
# ---------------------------------------------------------------------------
def ddpm_forward_reference(x_start, noise, t, params, cfg):
    B, Cch, D, H, W = x_start.shape
    eps = cfg["eps"]
    hp = jax.lax.Precision.HIGHEST

    emb = params["part_emb"]
    h = jax.nn.relu(emb @ params["mlp_w1"] + params["mlp_b1"])
    part_fea = h @ params["mlp_w2"] + params["mlp_b2"]
    cond_vec = part_fea.mean(axis=0)
    b1 = params["b1"] + params["wc1"] @ cond_vec
    b2 = params["b2"] + params["wc2"] @ cond_vec

    time = t.reshape(B, 1, 1, 1, 1)
    Cdrift = -x_start
    x_noisy = x_start + Cdrift * time + jnp.sqrt(time) * noise
    c_pred = (
        jnp.einsum("oc,bcdhw->bodhw", params["w1"], x_noisy, precision=hp)
        + b1[None, :, None, None, None]
        + time * params["tb1"][None, :, None, None, None]
    )
    n_pred = (
        jnp.einsum("oc,bcdhw->bodhw", params["w2"], x_noisy, precision=hp)
        + b2[None, :, None, None, None]
        + time * params["tb2"][None, :, None, None, None]
    )
    x_rec = x_noisy - c_pred * time - jnp.sqrt(time) * n_pred

    if cfg["weighting_loss"]:
        sw1 = 1.0 / jnp.sqrt(t)
        sw2 = 1.0 / jnp.sqrt(1.0 - t + eps)
    else:
        sw1 = sw2 = 1.0
    lc = jnp.abs(c_pred - Cdrift).mean(axis=(1, 2, 3, 4))
    ln = jnp.abs(n_pred - noise).mean(axis=(1, 2, 3, 4))
    loss_simple = jnp.mean(sw1 * lc + sw2 * ln)
    rec_weight = (1.0 - t.reshape(B, 1)) ** 2
    loss_vlb = jnp.mean(jnp.abs(x_rec - x_start).mean(axis=(1, 2, 3, 4)) * rec_weight)
    loss = loss_simple + loss_vlb
    ld = {"train/loss_simple": loss_simple, "train/loss_vlb": loss_vlb}
    if cfg["weight_tv"] > 0:
        v = x_rec * cfg["std_scale"]
        tv = (
            jnp.abs(jnp.diff(v, axis=-3)).sum()
            + jnp.abs(jnp.diff(v, axis=-2)).sum()
            + jnp.abs(jnp.diff(v, axis=-1)).sum()
        ) / v.shape[-1]
        loss_tv = tv * cfg["weight_tv"]
        loss = loss + loss_tv
        ld["loss_tv"] = loss_tv
    ld["train/loss"] = loss
    return loss, ld


if __name__ == "__main__":
    B, Cch, D, H, W = 2, 4, 16, 16, 16
    num_parts, fea_dim = 5, 64
    cfg = dict(std_scale=2.0, eps=1e-4, weighting_loss=True, weight_tv=0.01)

    key = jax.random.PRNGKey(0)
    ks = jax.random.split(key, 16)
    f32 = jnp.float32
    params = {
        "part_emb": jax.random.normal(ks[0], (num_parts, fea_dim), f32) * 0.5,
        "mlp_w1": jax.random.normal(ks[1], (fea_dim, fea_dim), f32) / jnp.sqrt(fea_dim),
        "mlp_b1": jnp.zeros((fea_dim,), f32),
        "mlp_w2": jax.random.normal(ks[2], (fea_dim, fea_dim), f32) / jnp.sqrt(fea_dim),
        "mlp_b2": jnp.zeros((fea_dim,), f32),
        "w1": jax.random.normal(ks[3], (Cch, Cch), f32) * 0.3,
        "w2": jax.random.normal(ks[4], (Cch, Cch), f32) * 0.3,
        "b1": jax.random.normal(ks[5], (Cch,), f32) * 0.1,
        "b2": jax.random.normal(ks[6], (Cch,), f32) * 0.1,
        "tb1": jax.random.normal(ks[7], (Cch,), f32) * 0.1,
        "tb2": jax.random.normal(ks[8], (Cch,), f32) * 0.1,
        "wc1": jax.random.normal(ks[9], (Cch, fea_dim), f32) * 0.05,
        "wc2": jax.random.normal(ks[10], (Cch, fea_dim), f32) * 0.05,
    }

    x_start = jax.random.normal(ks[11], (B, Cch, D, H, W), f32)
    noise = jax.random.normal(ks[12], (B, Cch, D, H, W), f32)
    # DDPM.forward:  t = rand(B) * (1 - eps) + eps
    t = jax.random.uniform(ks[13], (B,), f32) * (1.0 - cfg["eps"]) + cfg["eps"]

    fwd = jax.jit(functools.partial(ddpm_forward_pallas, params=params, cfg=cfg))
    loss, loss_dict = fwd(x_start, noise, t)
    loss = jax.block_until_ready(loss)

    loss_ref, _ = ddpm_forward_reference(x_start, noise, t, params, cfg)
    loss_ref = jax.block_until_ready(loss_ref)

    assert abs(float(loss) - float(loss_ref)) <= 5e-3 * (1.0 + abs(float(loss_ref))), (
        float(loss),
        float(loss_ref),
    )
    print("KERNEL_OK")
</pallas_src>

<mosaic_0001>
module attributes {stable_mosaic.version = 11 : i64} {
  func.func @kernel(%arg0: i32, %arg1: i32, %arg2: memref<2xf32, #tpu.memory_space<smem>>, %arg3: memref<49xf32, #tpu.memory_space<smem>>, %arg4: memref<1x4x16x256xf32, #tpu.memory_space<vmem>>, %arg5: memref<1x4x16x256xf32, #tpu.memory_space<vmem>>, %arg6: memref<1x8x128xf32, #tpu.memory_space<vmem>>) attributes {dimension_semantics = [#tpu.dimension_semantics<parallel>, #tpu.dimension_semantics<arbitrary>], iteration_bounds = array<i64: 2, 1>, scalar_prefetch = 0 : i64, scratch_operands = 0 : i64, tpu.core_type = #tpu.core_type<tc>, window_params = [{transform_indices = @transform_0, window_bounds = array<i64: 2>}, {transform_indices = @transform_1, window_bounds = array<i64: 49>}, {transform_indices = @transform_2, window_bounds = array<i64: 1, 4, 16, 256>}, {transform_indices = @transform_3, window_bounds = array<i64: 1, 4, 16, 256>}, {transform_indices = @transform_4, window_bounds = array<i64: 1, 8, 128>}]} {
    %0 = arith.index_cast %arg0 : i32 to index
    %1 = memref.load %arg2[%0] : memref<2xf32, #tpu.memory_space<smem>>
    %2 = math.sqrt %1 : f32
    %c48 = arith.constant 48 : index
    %3 = memref.load %arg3[%c48] : memref<49xf32, #tpu.memory_space<smem>>
    %c0_i32 = arith.constant 0 : i32
    %4 = arith.cmpi eq, %arg1, %c0_i32 : i32
    %5 = arith.extui %4 : i1 to i32
    %c0_i32_0 = arith.constant 0 : i32
    %6 = arith.cmpi ne, %5, %c0_i32_0 : i32
    scf.if %6 {
      %cst_60 = arith.constant 0.000000e+00 : f32
      %524 = vector.broadcast %cst_60 : f32 to vector<1x8x128xf32>
      %c0_61 = arith.constant 0 : index
      %c0_62 = arith.constant 0 : index
      %c0_63 = arith.constant 0 : index
      %525 = vector.load %arg6[%c0_61, %c0_62, %c0_63] : memref<1x8x128xf32, #tpu.memory_space<vmem>>, vector<1x8x128xf32>
      tpu.vector_store %arg6[%c0_61, %c0_62, %c0_63], %524 {strides = array<i32>} : memref<1x8x128xf32, #tpu.memory_space<vmem>>, vector<1x8x128xf32>,
    } else {
    }
    %c0 = arith.constant 0 : index
    %c0_1 = arith.constant 0 : index
    %c0_2 = arith.constant 0 : index
    %c0_3 = arith.constant 0 : index
    %7 = vector.load %arg4[%c0, %c0_1, %c0_2, %c0_3] : memref<1x4x16x256xf32, #tpu.memory_space<vmem>>, vector<1x4x16x256xf32>
    %8 = vector.shape_cast %7 : vector<1x4x16x256xf32> to vector<4x16x256xf32>
    %c0_4 = arith.constant 0 : index
    %c0_5 = arith.constant 0 : index
    %c0_6 = arith.constant 0 : index
    %c0_7 = arith.constant 0 : index
    %9 = vector.load %arg5[%c0_4, %c0_5, %c0_6, %c0_7] : memref<1x4x16x256xf32, #tpu.memory_space<vmem>>, vector<1x4x16x256xf32>
    %10 = vector.shape_cast %9 : vector<1x4x16x256xf32> to vector<4x16x256xf32>
    %11 = vector.extract_strided_slice %8 {offsets = [0, 0, 0], sizes = [1, 16, 256], strides = [1, 1, 1]} : vector<4x16x256xf32> to vector<1x16x256xf32>
    %12 = vector.shape_cast %11 : vector<1x16x256xf32> to vector<16x256xf32>
    %cst = arith.constant 1.000000e+00 : f32
    %13 = arith.subf %cst, %1 : f32
    %14 = vector.broadcast %13 : f32 to vector<16x256xf32>
    %15 = arith.mulf %12, %14 : vector<16x256xf32>
    %16 = vector.extract_strided_slice %10 {offsets = [0, 0, 0], sizes = [1, 16, 256], strides = [1, 1, 1]} : vector<4x16x256xf32> to vector<1x16x256xf32>
    %17 = vector.shape_cast %16 : vector<1x16x256xf32> to vector<16x256xf32>
    %18 = vector.broadcast %2 : f32 to vector<16x256xf32>
    %19 = arith.mulf %18, %17 : vector<16x256xf32>
    %20 = arith.addf %15, %19 : vector<16x256xf32>
    %21 = vector.extract_strided_slice %8 {offsets = [1, 0, 0], sizes = [1, 16, 256], strides = [1, 1, 1]} : vector<4x16x256xf32> to vector<1x16x256xf32>
    %22 = vector.shape_cast %21 : vector<1x16x256xf32> to vector<16x256xf32>
    %cst_8 = arith.constant 1.000000e+00 : f32
    %23 = arith.subf %cst_8, %1 : f32
    %24 = vector.broadcast %23 : f32 to vector<16x256xf32>
    %25 = arith.mulf %22, %24 : vector<16x256xf32>
    %26 = vector.extract_strided_slice %10 {offsets = [1, 0, 0], sizes = [1, 16, 256], strides = [1, 1, 1]} : vector<4x16x256xf32> to vector<1x16x256xf32>
    %27 = vector.shape_cast %26 : vector<1x16x256xf32> to vector<16x256xf32>
    %28 = vector.broadcast %2 : f32 to vector<16x256xf32>
    %29 = arith.mulf %28, %27 : vector<16x256xf32>
    %30 = arith.addf %25, %29 : vector<16x256xf32>
    %31 = vector.extract_strided_slice %8 {offsets = [2, 0, 0], sizes = [1, 16, 256], strides = [1, 1, 1]} : vector<4x16x256xf32> to vector<1x16x256xf32>
    %32 = vector.shape_cast %31 : vector<1x16x256xf32> to vector<16x256xf32>
    %cst_9 = arith.constant 1.000000e+00 : f32
    %33 = arith.subf %cst_9, %1 : f32
    %34 = vector.broadcast %33 : f32 to vector<16x256xf32>
    %35 = arith.mulf %32, %34 : vector<16x256xf32>
    %36 = vector.extract_strided_slice %10 {offsets = [2, 0, 0], sizes = [1, 16, 256], strides = [1, 1, 1]} : vector<4x16x256xf32> to vector<1x16x256xf32>
    %37 = vector.shape_cast %36 : vector<1x16x256xf32> to vector<16x256xf32>
    %38 = vector.broadcast %2 : f32 to vector<16x256xf32>
    %39 = arith.mulf %38, %37 : vector<16x256xf32>
    %40 = arith.addf %35, %39 : vector<16x256xf32>
    %41 = vector.extract_strided_slice %8 {offsets = [3, 0, 0], sizes = [1, 16, 256], strides = [1, 1, 1]} : vector<4x16x256xf32> to vector<1x16x256xf32>
    %42 = vector.shape_cast %41 : vector<1x16x256xf32> to vector<16x256xf32>
    %cst_10 = arith.constant 1.000000e+00 : f32
    %43 = arith.subf %cst_10, %1 : f32
    %44 = vector.broadcast %43 : f32 to vector<16x256xf32>
    %45 = arith.mulf %42, %44 : vector<16x256xf32>
    %46 = vector.extract_strided_slice %10 {offsets = [3, 0, 0], sizes = [1, 16, 256], strides = [1, 1, 1]} : vector<4x16x256xf32> to vector<1x16x256xf32>
    %47 = vector.shape_cast %46 : vector<1x16x256xf32> to vector<16x256xf32>
    %48 = vector.broadcast %2 : f32 to vector<16x256xf32>
    %49 = arith.mulf %48, %47 : vector<16x256xf32>
    %50 = arith.addf %45, %49 : vector<16x256xf32>
    %51 = tpu.iota {dimensions = array<i32: 1>} : vector<16x255xi32>
    %c16_i32 = arith.constant 16 : i32
    %c0_i32_11 = arith.constant 0 : i32
    %52 = arith.cmpi eq, %c16_i32, %c0_i32_11 : i32
    %c1_i32 = arith.constant 1 : i32
    %53 = arith.select %52, %c1_i32, %c16_i32 : i32
    %54 = vector.broadcast %53 : i32 to vector<16x255xi32>
    %55 = arith.remsi %51, %54 : vector<16x255xi32>
    %c0_i32_12 = arith.constant 0 : i32
    %56 = vector.broadcast %c0_i32_12 : i32 to vector<16x255xi32>
    %57 = arith.cmpi ne, %55, %56 : vector<16x255xi32>
    %c0_i32_13 = arith.constant 0 : i32
    %58 = vector.broadcast %c0_i32_13 : i32 to vector<16x255xi32>
    %59 = arith.cmpi slt, %55, %58 : vector<16x255xi32>
    %c0_i32_14 = arith.constant 0 : i32
    %60 = arith.cmpi slt, %53, %c0_i32_14 : i32
    %61 = vector.broadcast %60 : i1 to vector<16x255xi1>
    %62 = vector.broadcast %61 : vector<16x255xi1> to vector<16x255xi1>
    %63 = arith.xori %59, %62 : vector<16x255xi1>
    %64 = arith.andi %63, %57 : vector<16x255xi1>
    %65 = vector.broadcast %53 : i32 to vector<16x255xi32>
    %66 = arith.addi %55, %65 : vector<16x255xi32>
    %67 = arith.select %64, %66, %55 : vector<16x255xi1>, vector<16x255xi32>
    %c15_i32 = arith.constant 15 : i32
    %68 = vector.broadcast %c15_i32 : i32 to vector<16x255xi32>
    %69 = arith.cmpi ne, %67, %68 : vector<16x255xi32>
    %c0_15 = arith.constant 0 : index
    %70 = memref.load %arg3[%c0_15] : memref<49xf32, #tpu.memory_space<smem>>
    %71 = vector.broadcast %70 : f32 to vector<16x256xf32>
    %72 = arith.mulf %71, %20 : vector<16x256xf32>
    %c16 = arith.constant 16 : index
    %73 = memref.load %arg3[%c16] : memref<49xf32, #tpu.memory_space<smem>>
    %74 = vector.broadcast %73 : f32 to vector<16x256xf32>
    %75 = arith.mulf %74, %20 : vector<16x256xf32>
    %c1 = arith.constant 1 : index
    %76 = memref.load %arg3[%c1] : memref<49xf32, #tpu.memory_space<smem>>
    %77 = vector.broadcast %76 : f32 to vector<16x256xf32>
    %78 = arith.mulf %77, %30 : vector<16x256xf32>
    %79 = arith.addf %72, %78 : vector<16x256xf32>
    %c17 = arith.constant 17 : index
    %80 = memref.load %arg3[%c17] : memref<49xf32, #tpu.memory_space<smem>>
    %81 = vector.broadcast %80 : f32 to vector<16x256xf32>
    %82 = arith.mulf %81, %30 : vector<16x256xf32>
    %83 = arith.addf %75, %82 : vector<16x256xf32>
    %c2 = arith.constant 2 : index
    %84 = memref.load %arg3[%c2] : memref<49xf32, #tpu.memory_space<smem>>
    %85 = vector.broadcast %84 : f32 to vector<16x256xf32>
    %86 = arith.mulf %85, %40 : vector<16x256xf32>
    %87 = arith.addf %79, %86 : vector<16x256xf32>
    %c18 = arith.constant 18 : index
    %88 = memref.load %arg3[%c18] : memref<49xf32, #tpu.memory_space<smem>>
    %89 = vector.broadcast %88 : f32 to vector<16x256xf32>
    %90 = arith.mulf %89, %40 : vector<16x256xf32>
    %91 = arith.addf %83, %90 : vector<16x256xf32>
    %c3 = arith.constant 3 : index
    %92 = memref.load %arg3[%c3] : memref<49xf32, #tpu.memory_space<smem>>
    %93 = vector.broadcast %92 : f32 to vector<16x256xf32>
    %94 = arith.mulf %93, %50 : vector<16x256xf32>
    %95 = arith.addf %87, %94 : vector<16x256xf32>
    %c19 = arith.constant 19 : index
    %96 = memref.load %arg3[%c19] : memref<49xf32, #tpu.memory_space<smem>>
    %97 = vector.broadcast %96 : f32 to vector<16x256xf32>
    %98 = arith.mulf %97, %50 : vector<16x256xf32>
    %99 = arith.addf %91, %98 : vector<16x256xf32>
    %c32 = arith.constant 32 : index
    %100 = memref.load %arg3[%c32] : memref<49xf32, #tpu.memory_space<smem>>
    %c36 = arith.constant 36 : index
    %101 = memref.load %arg3[%c36] : memref<49xf32, #tpu.memory_space<smem>>
    %102 = arith.mulf %1, %101 : f32
    %103 = arith.addf %100, %102 : f32
    %104 = vector.broadcast %103 : f32 to vector<16x256xf32>
    %105 = arith.addf %95, %104 : vector<16x256xf32>
    %c40 = arith.constant 40 : index
    %106 = memref.load %arg3[%c40] : memref<49xf32, #tpu.memory_space<smem>>
    %c44 = arith.constant 44 : index
    %107 = memref.load %arg3[%c44] : memref<49xf32, #tpu.memory_space<smem>>
    %108 = arith.mulf %1, %107 : f32
    %109 = arith.addf %106, %108 : f32
    %110 = vector.broadcast %109 : f32 to vector<16x256xf32>
    %111 = arith.addf %99, %110 : vector<16x256xf32>
    %112 = vector.broadcast %1 : f32 to vector<16x256xf32>
    %113 = arith.mulf %112, %105 : vector<16x256xf32>
    %114 = arith.subf %20, %113 : vector<16x256xf32>
    %115 = vector.broadcast %2 : f32 to vector<16x256xf32>
    %116 = arith.mulf %115, %111 : vector<16x256xf32>
    %117 = arith.subf %114, %116 : vector<16x256xf32>
    %118 = vector.extract_strided_slice %8 {offsets = [0, 0, 0], sizes = [1, 16, 256], strides = [1, 1, 1]} : vector<4x16x256xf32> to vector<1x16x256xf32>
    %119 = vector.shape_cast %118 : vector<1x16x256xf32> to vector<16x256xf32>
    %120 = arith.addf %105, %119 : vector<16x256xf32>
    %121 = math.absf %120 : vector<16x256xf32>
    %122 = vector.shape_cast %121 : vector<16x256xf32> to vector<1x16x256xf32>
    %cst_16 = arith.constant dense<0.000000e+00> : vector<1xf32>
    %123 = vector.multi_reduction <add>, %122, %cst_16 [1, 2] : vector<1x16x256xf32> to vector<1xf32>
    %124 = vector.shape_cast %123 : vector<1xf32> to vector<1x1x1xf32>
    %125 = vector.extract %124[0, 0, 0] : f32 from vector<1x1x1xf32>
    %cst_17 = arith.constant 0.000000e+00 : f32
    %126 = arith.addf %cst_17, %125 : f32
    %127 = vector.extract_strided_slice %10 {offsets = [0, 0, 0], sizes = [1, 16, 256], strides = [1, 1, 1]} : vector<4x16x256xf32> to vector<1x16x256xf32>
    %128 = vector.shape_cast %127 : vector<1x16x256xf32> to vector<16x256xf32>
    %129 = arith.subf %111, %128 : vector<16x256xf32>
    %130 = math.absf %129 : vector<16x256xf32>
    %131 = vector.shape_cast %130 : vector<16x256xf32> to vector<1x16x256xf32>
    %cst_18 = arith.constant dense<0.000000e+00> : vector<1xf32>
    %132 = vector.multi_reduction <add>, %131, %cst_18 [1, 2] : vector<1x16x256xf32> to vector<1xf32>
    %133 = vector.shape_cast %132 : vector<1xf32> to vector<1x1x1xf32>
    %134 = vector.extract %133[0, 0, 0] : f32 from vector<1x1x1xf32>
    %cst_19 = arith.constant 0.000000e+00 : f32
    %135 = arith.addf %cst_19, %134 : f32
    %136 = vector.extract_strided_slice %8 {offsets = [0, 0, 0], sizes = [1, 16, 256], strides = [1, 1, 1]} : vector<4x16x256xf32> to vector<1x16x256xf32>
    %137 = vector.shape_cast %136 : vector<1x16x256xf32> to vector<16x256xf32>
    %138 = arith.subf %117, %137 : vector<16x256xf32>
    %139 = math.absf %138 : vector<16x256xf32>
    %140 = vector.shape_cast %139 : vector<16x256xf32> to vector<1x16x256xf32>
    %cst_20 = arith.constant dense<0.000000e+00> : vector<1xf32>
    %141 = vector.multi_reduction <add>, %140, %cst_20 [1, 2] : vector<1x16x256xf32> to vector<1xf32>
    %142 = vector.shape_cast %141 : vector<1xf32> to vector<1x1x1xf32>
    %143 = vector.extract %142[0, 0, 0] : f32 from vector<1x1x1xf32>
    %cst_21 = arith.constant 0.000000e+00 : f32
    %144 = arith.addf %cst_21, %143 : f32
    %145 = vector.broadcast %3 : f32 to vector<16x256xf32>
    %146 = arith.mulf %117, %145 : vector<16x256xf32>
    %147 = vector.extract_strided_slice %146 {offsets = [0, 1], sizes = [16, 255], strides = [1, 1]} : vector<16x256xf32> to vector<16x255xf32>
    %148 = vector.extract_strided_slice %146 {offsets = [0, 0], sizes = [16, 255], strides = [1, 1]} : vector<16x256xf32> to vector<16x255xf32>
    %149 = arith.subf %147, %148 : vector<16x255xf32>
    %150 = math.absf %149 : vector<16x255xf32>
    %cst_22 = arith.constant 0.000000e+00 : f32
    %151 = vector.broadcast %cst_22 : f32 to vector<16x255xf32>
    %152 = arith.select %69, %150, %151 : vector<16x255xi1>, vector<16x255xf32>
    %153 = vector.shape_cast %152 : vector<16x255xf32> to vector<1x16x255xf32>
    %cst_23 = arith.constant dense<0.000000e+00> : vector<1xf32>
    %154 = vector.multi_reduction <add>, %153, %cst_23 [1, 2] : vector<1x16x255xf32> to vector<1xf32>
    %155 = vector.shape_cast %154 : vector<1xf32> to vector<1x1x1xf32>
    %156 = vector.extract %155[0, 0, 0] : f32 from vector<1x1x1xf32>
    %cst_24 = arith.constant 0.000000e+00 : f32
    %157 = arith.addf %cst_24, %156 : f32
    %158 = vector.extract_strided_slice %146 {offsets = [0, 16], sizes = [16, 240], strides = [1, 1]} : vector<16x256xf32> to vector<16x240xf32>
    %159 = vector.extract_strided_slice %146 {offsets = [0, 0], sizes = [16, 240], strides = [1, 1]} : vector<16x256xf32> to vector<16x240xf32>
    %160 = arith.subf %158, %159 : vector<16x240xf32>
    %161 = math.absf %160 : vector<16x240xf32>
    %162 = vector.shape_cast %161 : vector<16x240xf32> to vector<1x16x240xf32>
    %cst_25 = arith.constant dense<0.000000e+00> : vector<1xf32>
    %163 = vector.multi_reduction <add>, %162, %cst_25 [1, 2] : vector<1x16x240xf32> to vector<1xf32>
    %164 = vector.shape_cast %163 : vector<1xf32> to vector<1x1x1xf32>
    %165 = vector.extract %164[0, 0, 0] : f32 from vector<1x1x1xf32>
    %166 = arith.addf %157, %165 : f32
    %167 = vector.extract_strided_slice %146 {offsets = [1, 0], sizes = [15, 256], strides = [1, 1]} : vector<16x256xf32> to vector<15x256xf32>
    %168 = vector.extract_strided_slice %146 {offsets = [0, 0], sizes = [15, 256], strides = [1, 1]} : vector<16x256xf32> to vector<15x256xf32>
    %169 = arith.subf %167, %168 : vector<15x256xf32>
    %170 = math.absf %169 : vector<15x256xf32>
    %171 = vector.shape_cast %170 : vector<15x256xf32> to vector<1x15x256xf32>
    %cst_26 = arith.constant dense<0.000000e+00> : vector<1xf32>
    %172 = vector.multi_reduction <add>, %171, %cst_26 [1, 2] : vector<1x15x256xf32> to vector<1xf32>
    %173 = vector.shape_cast %172 : vector<1xf32> to vector<1x1x1xf32>
    %174 = vector.extract %173[0, 0, 0] : f32 from vector<1x1x1xf32>
    %175 = arith.addf %166, %174 : f32
    %c4 = arith.constant 4 : index
    %176 = memref.load %arg3[%c4] : memref<49xf32, #tpu.memory_space<smem>>
    %177 = vector.broadcast %176 : f32 to vector<16x256xf32>
    %178 = arith.mulf %177, %20 : vector<16x256xf32>
    %c20 = arith.constant 20 : index
    %179 = memref.load %arg3[%c20] : memref<49xf32, #tpu.memory_space<smem>>
    %180 = vector.broadcast %179 : f32 to vector<16x256xf32>
    %181 = arith.mulf %180, %20 : vector<16x256xf32>
    %c5 = arith.constant 5 : index
    %182 = memref.load %arg3[%c5] : memref<49xf32, #tpu.memory_space<smem>>
    %183 = vector.broadcast %182 : f32 to vector<16x256xf32>
    %184 = arith.mulf %183, %30 : vector<16x256xf32>
    %185 = arith.addf %178, %184 : vector<16x256xf32>
    %c21 = arith.constant 21 : index
    %186 = memref.load %arg3[%c21] : memref<49xf32, #tpu.memory_space<smem>>
    %187 = vector.broadcast %186 : f32 to vector<16x256xf32>
    %188 = arith.mulf %187, %30 : vector<16x256xf32>
    %189 = arith.addf %181, %188 : vector<16x256xf32>
    %c6 = arith.constant 6 : index
    %190 = memref.load %arg3[%c6] : memref<49xf32, #tpu.memory_space<smem>>
    %191 = vector.broadcast %190 : f32 to vector<16x256xf32>
    %192 = arith.mulf %191, %40 : vector<16x256xf32>
    %193 = arith.addf %185, %192 : vector<16x256xf32>
    %c22 = arith.constant 22 : index
    %194 = memref.load %arg3[%c22] : memref<49xf32, #tpu.memory_space<smem>>
    %195 = vector.broadcast %194 : f32 to vector<16x256xf32>
    %196 = arith.mulf %195, %40 : vector<16x256xf32>
    %197 = arith.addf %189, %196 : vector<16x256xf32>
    %c7 = arith.constant 7 : index
    %198 = memref.load %arg3[%c7] : memref<49xf32, #tpu.memory_space<smem>>
    %199 = vector.broadcast %198 : f32 to vector<16x256xf32>
    %200 = arith.mulf %199, %50 : vector<16x256xf32>
    %201 = arith.addf %193, %200 : vector<16x256xf32>
    %c23 = arith.constant 23 : index
    %202 = memref.load %arg3[%c23] : memref<49xf32, #tpu.memory_space<smem>>
    %203 = vector.broadcast %202 : f32 to vector<16x256xf32>
    %204 = arith.mulf %203, %50 : vector<16x256xf32>
    %205 = arith.addf %197, %204 : vector<16x256xf32>
    %c33 = arith.constant 33 : index
    %206 = memref.load %arg3[%c33] : memref<49xf32, #tpu.memory_space<smem>>
    %c37 = arith.constant 37 : index
    %207 = memref.load %arg3[%c37] : memref<49xf32, #tpu.memory_space<smem>>
    %208 = arith.mulf %1, %207 : f32
    %209 = arith.addf %206, %208 : f32
    %210 = vector.broadcast %209 : f32 to vector<16x256xf32>
    %211 = arith.addf %201, %210 : vector<16x256xf32>
    %c41 = arith.constant 41 : index
    %212 = memref.load %arg3[%c41] : memref<49xf32, #tpu.memory_space<smem>>
    %c45 = arith.constant 45 : index
    %213 = memref.load %arg3[%c45] : memref<49xf32, #tpu.memory_space<smem>>
    %214 = arith.mulf %1, %213 : f32
    %215 = arith.addf %212, %214 : f32
    %216 = vector.broadcast %215 : f32 to vector<16x256xf32>
    %217 = arith.addf %205, %216 : vector<16x256xf32>
    %218 = vector.broadcast %1 : f32 to vector<16x256xf32>
    %219 = arith.mulf %218, %211 : vector<16x256xf32>
    %220 = arith.subf %30, %219 : vector<16x256xf32>
    %221 = vector.broadcast %2 : f32 to vector<16x256xf32>
    %222 = arith.mulf %221, %217 : vector<16x256xf32>
    %223 = arith.subf %220, %222 : vector<16x256xf32>
    %224 = vector.extract_strided_slice %8 {offsets = [1, 0, 0], sizes = [1, 16, 256], strides = [1, 1, 1]} : vector<4x16x256xf32> to vector<1x16x256xf32>
    %225 = vector.shape_cast %224 : vector<1x16x256xf32> to vector<16x256xf32>
    %226 = arith.addf %211, %225 : vector<16x256xf32>
    %227 = math.absf %226 : vector<16x256xf32>
    %228 = vector.shape_cast %227 : vector<16x256xf32> to vector<1x16x256xf32>
    %cst_27 = arith.constant dense<0.000000e+00> : vector<1xf32>
    %229 = vector.multi_reduction <add>, %228, %cst_27 [1, 2] : vector<1x16x256xf32> to vector<1xf32>
    %230 = vector.shape_cast %229 : vector<1xf32> to vector<1x1x1xf32>
    %231 = vector.extract %230[0, 0, 0] : f32 from vector<1x1x1xf32>
    %232 = arith.addf %126, %231 : f32
    %233 = vector.extract_strided_slice %10 {offsets = [1, 0, 0], sizes = [1, 16, 256], strides = [1, 1, 1]} : vector<4x16x256xf32> to vector<1x16x256xf32>
    %234 = vector.shape_cast %233 : vector<1x16x256xf32> to vector<16x256xf32>
    %235 = arith.subf %217, %234 : vector<16x256xf32>
    %236 = math.absf %235 : vector<16x256xf32>
    %237 = vector.shape_cast %236 : vector<16x256xf32> to vector<1x16x256xf32>
    %cst_28 = arith.constant dense<0.000000e+00> : vector<1xf32>
    %238 = vector.multi_reduction <add>, %237, %cst_28 [1, 2] : vector<1x16x256xf32> to vector<1xf32>
    %239 = vector.shape_cast %238 : vector<1xf32> to vector<1x1x1xf32>
    %240 = vector.extract %239[0, 0, 0] : f32 from vector<1x1x1xf32>
    %241 = arith.addf %135, %240 : f32
    %242 = vector.extract_strided_slice %8 {offsets = [1, 0, 0], sizes = [1, 16, 256], strides = [1, 1, 1]} : vector<4x16x256xf32> to vector<1x16x256xf32>
    %243 = vector.shape_cast %242 : vector<1x16x256xf32> to vector<16x256xf32>
    %244 = arith.subf %223, %243 : vector<16x256xf32>
    %245 = math.absf %244 : vector<16x256xf32>
    %246 = vector.shape_cast %245 : vector<16x256xf32> to vector<1x16x256xf32>
    %cst_29 = arith.constant dense<0.000000e+00> : vector<1xf32>
    %247 = vector.multi_reduction <add>, %246, %cst_29 [1, 2] : vector<1x16x256xf32> to vector<1xf32>
    %248 = vector.shape_cast %247 : vector<1xf32> to vector<1x1x1xf32>
    %249 = vector.extract %248[0, 0, 0] : f32 from vector<1x1x1xf32>
    %250 = arith.addf %144, %249 : f32
    %251 = vector.broadcast %3 : f32 to vector<16x256xf32>
    %252 = arith.mulf %223, %251 : vector<16x256xf32>
    %253 = vector.extract_strided_slice %252 {offsets = [0, 1], sizes = [16, 255], strides = [1, 1]} : vector<16x256xf32> to vector<16x255xf32>
    %254 = vector.extract_strided_slice %252 {offsets = [0, 0], sizes = [16, 255], strides = [1, 1]} : vector<16x256xf32> to vector<16x255xf32>
    %255 = arith.subf %253, %254 : vector<16x255xf32>
    %256 = math.absf %255 : vector<16x255xf32>
    %cst_30 = arith.constant 0.000000e+00 : f32
    %257 = vector.broadcast %cst_30 : f32 to vector<16x255xf32>
    %258 = arith.select %69, %256, %257 : vector<16x255xi1>, vector<16x255xf32>
    %259 = vector.shape_cast %258 : vector<16x255xf32> to vector<1x16x255xf32>
    %cst_31 = arith.constant dense<0.000000e+00> : vector<1xf32>
    %260 = vector.multi_reduction <add>, %259, %cst_31 [1, 2] : vector<1x16x255xf32> to vector<1xf32>
    %261 = vector.shape_cast %260 : vector<1xf32> to vector<1x1x1xf32>
    %262 = vector.extract %261[0, 0, 0] : f32 from vector<1x1x1xf32>
    %263 = arith.addf %175, %262 : f32
    %264 = vector.extract_strided_slice %252 {offsets = [0, 16], sizes = [16, 240], strides = [1, 1]} : vector<16x256xf32> to vector<16x240xf32>
    %265 = vector.extract_strided_slice %252 {offsets = [0, 0], sizes = [16, 240], strides = [1, 1]} : vector<16x256xf32> to vector<16x240xf32>
    %266 = arith.subf %264, %265 : vector<16x240xf32>
    %267 = math.absf %266 : vector<16x240xf32>
    %268 = vector.shape_cast %267 : vector<16x240xf32> to vector<1x16x240xf32>
    %cst_32 = arith.constant dense<0.000000e+00> : vector<1xf32>
    %269 = vector.multi_reduction <add>, %268, %cst_32 [1, 2] : vector<1x16x240xf32> to vector<1xf32>
    %270 = vector.shape_cast %269 : vector<1xf32> to vector<1x1x1xf32>
    %271 = vector.extract %270[0, 0, 0] : f32 from vector<1x1x1xf32>
    %272 = arith.addf %263, %271 : f32
    %273 = vector.extract_strided_slice %252 {offsets = [1, 0], sizes = [15, 256], strides = [1, 1]} : vector<16x256xf32> to vector<15x256xf32>
    %274 = vector.extract_strided_slice %252 {offsets = [0, 0], sizes = [15, 256], strides = [1, 1]} : vector<16x256xf32> to vector<15x256xf32>
    %275 = arith.subf %273, %274 : vector<15x256xf32>
    %276 = math.absf %275 : vector<15x256xf32>
    %277 = vector.shape_cast %276 : vector<15x256xf32> to vector<1x15x256xf32>
    %cst_33 = arith.constant dense<0.000000e+00> : vector<1xf32>
    %278 = vector.multi_reduction <add>, %277, %cst_33 [1, 2] : vector<1x15x256xf32> to vector<1xf32>
    %279 = vector.shape_cast %278 : vector<1xf32> to vector<1x1x1xf32>
    %280 = vector.extract %279[0, 0, 0] : f32 from vector<1x1x1xf32>
    %281 = arith.addf %272, %280 : f32
    %c8 = arith.constant 8 : index
    %282 = memref.load %arg3[%c8] : memref<49xf32, #tpu.memory_space<smem>>
    %283 = vector.broadcast %282 : f32 to vector<16x256xf32>
    %284 = arith.mulf %283, %20 : vector<16x256xf32>
    %c24 = arith.constant 24 : index
    %285 = memref.load %arg3[%c24] : memref<49xf32, #tpu.memory_space<smem>>
    %286 = vector.broadcast %285 : f32 to vector<16x256xf32>
    %287 = arith.mulf %286, %20 : vector<16x256xf32>
    %c9 = arith.constant 9 : index
    %288 = memref.load %arg3[%c9] : memref<49xf32, #tpu.memory_space<smem>>
    %289 = vector.broadcast %288 : f32 to vector<16x256xf32>
    %290 = arith.mulf %289, %30 : vector<16x256xf32>
    %291 = arith.addf %284, %290 : vector<16x256xf32>
    %c25 = arith.constant 25 : index
    %292 = memref.load %arg3[%c25] : memref<49xf32, #tpu.memory_space<smem>>
    %293 = vector.broadcast %292 : f32 to vector<16x256xf32>
    %294 = arith.mulf %293, %30 : vector<16x256xf32>
    %295 = arith.addf %287, %294 : vector<16x256xf32>
    %c10 = arith.constant 10 : index
    %296 = memref.load %arg3[%c10] : memref<49xf32, #tpu.memory_space<smem>>
    %297 = vector.broadcast %296 : f32 to vector<16x256xf32>
    %298 = arith.mulf %297, %40 : vector<16x256xf32>
    %299 = arith.addf %291, %298 : vector<16x256xf32>
    %c26 = arith.constant 26 : index
    %300 = memref.load %arg3[%c26] : memref<49xf32, #tpu.memory_space<smem>>
    %301 = vector.broadcast %300 : f32 to vector<16x256xf32>
    %302 = arith.mulf %301, %40 : vector<16x256xf32>
    %303 = arith.addf %295, %302 : vector<16x256xf32>
    %c11 = arith.constant 11 : index
    %304 = memref.load %arg3[%c11] : memref<49xf32, #tpu.memory_space<smem>>
    %305 = vector.broadcast %304 : f32 to vector<16x256xf32>
    %306 = arith.mulf %305, %50 : vector<16x256xf32>
    %307 = arith.addf %299, %306 : vector<16x256xf32>
    %c27 = arith.constant 27 : index
    %308 = memref.load %arg3[%c27] : memref<49xf32, #tpu.memory_space<smem>>
    %309 = vector.broadcast %308 : f32 to vector<16x256xf32>
    %310 = arith.mulf %309, %50 : vector<16x256xf32>
    %311 = arith.addf %303, %310 : vector<16x256xf32>
    %c34 = arith.constant 34 : index
    %312 = memref.load %arg3[%c34] : memref<49xf32, #tpu.memory_space<smem>>
    %c38 = arith.constant 38 : index
    %313 = memref.load %arg3[%c38] : memref<49xf32, #tpu.memory_space<smem>>
    %314 = arith.mulf %1, %313 : f32
    %315 = arith.addf %312, %314 : f32
    %316 = vector.broadcast %315 : f32 to vector<16x256xf32>
    %317 = arith.addf %307, %316 : vector<16x256xf32>
    %c42 = arith.constant 42 : index
    %318 = memref.load %arg3[%c42] : memref<49xf32, #tpu.memory_space<smem>>
    %c46 = arith.constant 46 : index
    %319 = memref.load %arg3[%c46] : memref<49xf32, #tpu.memory_space<smem>>
    %320 = arith.mulf %1, %319 : f32
    %321 = arith.addf %318, %320 : f32
    %322 = vector.broadcast %321 : f32 to vector<16x256xf32>
    %323 = arith.addf %311, %322 : vector<16x256xf32>
    %324 = vector.broadcast %1 : f32 to vector<16x256xf32>
    %325 = arith.mulf %324, %317 : vector<16x256xf32>
    %326 = arith.subf %40, %325 : vector<16x256xf32>
    %327 = vector.broadcast %2 : f32 to vector<16x256xf32>
    %328 = arith.mulf %327, %323 : vector<16x256xf32>
    %329 = arith.subf %326, %328 : vector<16x256xf32>
    %330 = vector.extract_strided_slice %8 {offsets = [2, 0, 0], sizes = [1, 16, 256], strides = [1, 1, 1]} : vector<4x16x256xf32> to vector<1x16x256xf32>
    %331 = vector.shape_cast %330 : vector<1x16x256xf32> to vector<16x256xf32>
    %332 = arith.addf %317, %331 : vector<16x256xf32>
    %333 = math.absf %332 : vector<16x256xf32>
    %334 = vector.shape_cast %333 : vector<16x256xf32> to vector<1x16x256xf32>
    %cst_34 = arith.constant dense<0.000000e+00> : vector<1xf32>
    %335 = vector.multi_reduction <add>, %334, %cst_34 [1, 2] : vector<1x16x256xf32> to vector<1xf32>
    %336 = vector.shape_cast %335 : vector<1xf32> to vector<1x1x1xf32>
    %337 = vector.extract %336[0, 0, 0] : f32 from vector<1x1x1xf32>
    %338 = arith.addf %232, %337 : f32
    %339 = vector.extract_strided_slice %10 {offsets = [2, 0, 0], sizes = [1, 16, 256], strides = [1, 1, 1]} : vector<4x16x256xf32> to vector<1x16x256xf32>
    %340 = vector.shape_cast %339 : vector<1x16x256xf32> to vector<16x256xf32>
    %341 = arith.subf %323, %340 : vector<16x256xf32>
    %342 = math.absf %341 : vector<16x256xf32>
    %343 = vector.shape_cast %342 : vector<16x256xf32> to vector<1x16x256xf32>
    %cst_35 = arith.constant dense<0.000000e+00> : vector<1xf32>
    %344 = vector.multi_reduction <add>, %343, %cst_35 [1, 2] : vector<1x16x256xf32> to vector<1xf32>
    %345 = vector.shape_cast %344 : vector<1xf32> to vector<1x1x1xf32>
    %346 = vector.extract %345[0, 0, 0] : f32 from vector<1x1x1xf32>
    %347 = arith.addf %241, %346 : f32
    %348 = vector.extract_strided_slice %8 {offsets = [2, 0, 0], sizes = [1, 16, 256], strides = [1, 1, 1]} : vector<4x16x256xf32> to vector<1x16x256xf32>
    %349 = vector.shape_cast %348 : vector<1x16x256xf32> to vector<16x256xf32>
    %350 = arith.subf %329, %349 : vector<16x256xf32>
    %351 = math.absf %350 : vector<16x256xf32>
    %352 = vector.shape_cast %351 : vector<16x256xf32> to vector<1x16x256xf32>
    %cst_36 = arith.constant dense<0.000000e+00> : vector<1xf32>
    %353 = vector.multi_reduction <add>, %352, %cst_36 [1, 2] : vector<1x16x256xf32> to vector<1xf32>
    %354 = vector.shape_cast %353 : vector<1xf32> to vector<1x1x1xf32>
    %355 = vector.extract %354[0, 0, 0] : f32 from vector<1x1x1xf32>
    %356 = arith.addf %250, %355 : f32
    %357 = vector.broadcast %3 : f32 to vector<16x256xf32>
    %358 = arith.mulf %329, %357 : vector<16x256xf32>
    %359 = vector.extract_strided_slice %358 {offsets = [0, 1], sizes = [16, 255], strides = [1, 1]} : vector<16x256xf32> to vector<16x255xf32>
    %360 = vector.extract_strided_slice %358 {offsets = [0, 0], sizes = [16, 255], strides = [1, 1]} : vector<16x256xf32> to vector<16x255xf32>
    %361 = arith.subf %359, %360 : vector<16x255xf32>
    %362 = math.absf %361 : vector<16x255xf32>
    %cst_37 = arith.constant 0.000000e+00 : f32
    %363 = vector.broadcast %cst_37 : f32 to vector<16x255xf32>
    %364 = arith.select %69, %362, %363 : vector<16x255xi1>, vector<16x255xf32>
    %365 = vector.shape_cast %364 : vector<16x255xf32> to vector<1x16x255xf32>
    %cst_38 = arith.constant dense<0.000000e+00> : vector<1xf32>
    %366 = vector.multi_reduction <add>, %365, %cst_38 [1, 2] : vector<1x16x255xf32> to vector<1xf32>
    %367 = vector.shape_cast %366 : vector<1xf32> to vector<1x1x1xf32>
    %368 = vector.extract %367[0, 0, 0] : f32 from vector<1x1x1xf32>
    %369 = arith.addf %281, %368 : f32
    %370 = vector.extract_strided_slice %358 {offsets = [0, 16], sizes = [16, 240], strides = [1, 1]} : vector<16x256xf32> to vector<16x240xf32>
    %371 = vector.extract_strided_slice %358 {offsets = [0, 0], sizes = [16, 240], strides = [1, 1]} : vector<16x256xf32> to vector<16x240xf32>
    %372 = arith.subf %370, %371 : vector<16x240xf32>
    %373 = math.absf %372 : vector<16x240xf32>
    %374 = vector.shape_cast %373 : vector<16x240xf32> to vector<1x16x240xf32>
    %cst_39 = arith.constant dense<0.000000e+00> : vector<1xf32>
    %375 = vector.multi_reduction <add>, %374, %cst_39 [1, 2] : vector<1x16x240xf32> to vector<1xf32>
    %376 = vector.shape_cast %375 : vector<1xf32> to vector<1x1x1xf32>
    %377 = vector.extract %376[0, 0, 0] : f32 from vector<1x1x1xf32>
    %378 = arith.addf %369, %377 : f32
    %379 = vector.extract_strided_slice %358 {offsets = [1, 0], sizes = [15, 256], strides = [1, 1]} : vector<16x256xf32> to vector<15x256xf32>
    %380 = vector.extract_strided_slice %358 {offsets = [0, 0], sizes = [15, 256], strides = [1, 1]} : vector<16x256xf32> to vector<15x256xf32>
    %381 = arith.subf %379, %380 : vector<15x256xf32>
    %382 = math.absf %381 : vector<15x256xf32>
    %383 = vector.shape_cast %382 : vector<15x256xf32> to vector<1x15x256xf32>
    %cst_40 = arith.constant dense<0.000000e+00> : vector<1xf32>
    %384 = vector.multi_reduction <add>, %383, %cst_40 [1, 2] : vector<1x15x256xf32> to vector<1xf32>
    %385 = vector.shape_cast %384 : vector<1xf32> to vector<1x1x1xf32>
    %386 = vector.extract %385[0, 0, 0] : f32 from vector<1x1x1xf32>
    %387 = arith.addf %378, %386 : f32
    %c12 = arith.constant 12 : index
    %388 = memref.load %arg3[%c12] : memref<49xf32, #tpu.memory_space<smem>>
    %389 = vector.broadcast %388 : f32 to vector<16x256xf32>
    %390 = arith.mulf %389, %20 : vector<16x256xf32>
    %c28 = arith.constant 28 : index
    %391 = memref.load %arg3[%c28] : memref<49xf32, #tpu.memory_space<smem>>
    %392 = vector.broadcast %391 : f32 to vector<16x256xf32>
    %393 = arith.mulf %392, %20 : vector<16x256xf32>
    %c13 = arith.constant 13 : index
    %394 = memref.load %arg3[%c13] : memref<49xf32, #tpu.memory_space<smem>>
    %395 = vector.broadcast %394 : f32 to vector<16x256xf32>
    %396 = arith.mulf %395, %30 : vector<16x256xf32>
    %397 = arith.addf %390, %396 : vector<16x256xf32>
    %c29 = arith.constant 29 : index
    %398 = memref.load %arg3[%c29] : memref<49xf32, #tpu.memory_space<smem>>
    %399 = vector.broadcast %398 : f32 to vector<16x256xf32>
    %400 = arith.mulf %399, %30 : vector<16x256xf32>
    %401 = arith.addf %393, %400 : vector<16x256xf32>
    %c14 = arith.constant 14 : index
    %402 = memref.load %arg3[%c14] : memref<49xf32, #tpu.memory_space<smem>>
    %403 = vector.broadcast %402 : f32 to vector<16x256xf32>
    %404 = arith.mulf %403, %40 : vector<16x256xf32>
    %405 = arith.addf %397, %404 : vector<16x256xf32>
    %c30 = arith.constant 30 : index
    %406 = memref.load %arg3[%c30] : memref<49xf32, #tpu.memory_space<smem>>
    %407 = vector.broadcast %406 : f32 to vector<16x256xf32>
    %408 = arith.mulf %407, %40 : vector<16x256xf32>
    %409 = arith.addf %401, %408 : vector<16x256xf32>
    %c15 = arith.constant 15 : index
    %410 = memref.load %arg3[%c15] : memref<49xf32, #tpu.memory_space<smem>>
    %411 = vector.broadcast %410 : f32 to vector<16x256xf32>
    %412 = arith.mulf %411, %50 : vector<16x256xf32>
    %413 = arith.addf %405, %412 : vector<16x256xf32>
    %c31 = arith.constant 31 : index
    %414 = memref.load %arg3[%c31] : memref<49xf32, #tpu.memory_space<smem>>
    %415 = vector.broadcast %414 : f32 to vector<16x256xf32>
    %416 = arith.mulf %415, %50 : vector<16x256xf32>
    %417 = arith.addf %409, %416 : vector<16x256xf32>
    %c35 = arith.constant 35 : index
    %418 = memref.load %arg3[%c35] : memref<49xf32, #tpu.memory_space<smem>>
    %c39 = arith.constant 39 : index
    %419 = memref.load %arg3[%c39] : memref<49xf32, #tpu.memory_space<smem>>
    %420 = arith.mulf %1, %419 : f32
    %421 = arith.addf %418, %420 : f32
    %422 = vector.broadcast %421 : f32 to vector<16x256xf32>
    %423 = arith.addf %413, %422 : vector<16x256xf32>
    %c43 = arith.constant 43 : index
    %424 = memref.load %arg3[%c43] : memref<49xf32, #tpu.memory_space<smem>>
    %c47 = arith.constant 47 : index
    %425 = memref.load %arg3[%c47] : memref<49xf32, #tpu.memory_space<smem>>
    %426 = arith.mulf %1, %425 : f32
    %427 = arith.addf %424, %426 : f32
    %428 = vector.broadcast %427 : f32 to vector<16x256xf32>
    %429 = arith.addf %417, %428 : vector<16x256xf32>
    %430 = vector.broadcast %1 : f32 to vector<16x256xf32>
    %431 = arith.mulf %430, %423 : vector<16x256xf32>
    %432 = arith.subf %50, %431 : vector<16x256xf32>
    %433 = vector.broadcast %2 : f32 to vector<16x256xf32>
    %434 = arith.mulf %433, %429 : vector<16x256xf32>
    %435 = arith.subf %432, %434 : vector<16x256xf32>
    %436 = vector.extract_strided_slice %8 {offsets = [3, 0, 0], sizes = [1, 16, 256], strides = [1, 1, 1]} : vector<4x16x256xf32> to vector<1x16x256xf32>
    %437 = vector.shape_cast %436 : vector<1x16x256xf32> to vector<16x256xf32>
    %438 = arith.addf %423, %437 : vector<16x256xf32>
    %439 = math.absf %438 : vector<16x256xf32>
    %440 = vector.shape_cast %439 : vector<16x256xf32> to vector<1x16x256xf32>
    %cst_41 = arith.constant dense<0.000000e+00> : vector<1xf32>
    %441 = vector.multi_reduction <add>, %440, %cst_41 [1, 2] : vector<1x16x256xf32> to vector<1xf32>
    %442 = vector.shape_cast %441 : vector<1xf32> to vector<1x1x1xf32>
    %443 = vector.extract %442[0, 0, 0] : f32 from vector<1x1x1xf32>
    %444 = arith.addf %338, %443 : f32
    %445 = vector.extract_strided_slice %10 {offsets = [3, 0, 0], sizes = [1, 16, 256], strides = [1, 1, 1]} : vector<4x16x256xf32> to vector<1x16x256xf32>
    %446 = vector.shape_cast %445 : vector<1x16x256xf32> to vector<16x256xf32>
    %447 = arith.subf %429, %446 : vector<16x256xf32>
    %448 = math.absf %447 : vector<16x256xf32>
    %449 = vector.shape_cast %448 : vector<16x256xf32> to vector<1x16x256xf32>
    %cst_42 = arith.constant dense<0.000000e+00> : vector<1xf32>
    %450 = vector.multi_reduction <add>, %449, %cst_42 [1, 2] : vector<1x16x256xf32> to vector<1xf32>
    %451 = vector.shape_cast %450 : vector<1xf32> to vector<1x1x1xf32>
    %452 = vector.extract %451[0, 0, 0] : f32 from vector<1x1x1xf32>
    %453 = arith.addf %347, %452 : f32
    %454 = vector.extract_strided_slice %8 {offsets = [3, 0, 0], sizes = [1, 16, 256], strides = [1, 1, 1]} : vector<4x16x256xf32> to vector<1x16x256xf32>
    %455 = vector.shape_cast %454 : vector<1x16x256xf32> to vector<16x256xf32>
    %456 = arith.subf %435, %455 : vector<16x256xf32>
    %457 = math.absf %456 : vector<16x256xf32>
    %458 = vector.shape_cast %457 : vector<16x256xf32> to vector<1x16x256xf32>
    %cst_43 = arith.constant dense<0.000000e+00> : vector<1xf32>
    %459 = vector.multi_reduction <add>, %458, %cst_43 [1, 2] : vector<1x16x256xf32> to vector<1xf32>
    %460 = vector.shape_cast %459 : vector<1xf32> to vector<1x1x1xf32>
    %461 = vector.extract %460[0, 0, 0] : f32 from vector<1x1x1xf32>
    %462 = arith.addf %356, %461 : f32
    %463 = vector.broadcast %3 : f32 to vector<16x256xf32>
    %464 = arith.mulf %435, %463 : vector<16x256xf32>
    %465 = vector.extract_strided_slice %464 {offsets = [0, 1], sizes = [16, 255], strides = [1, 1]} : vector<16x256xf32> to vector<16x255xf32>
    %466 = vector.extract_strided_slice %464 {offsets = [0, 0], sizes = [16, 255], strides = [1, 1]} : vector<16x256xf32> to vector<16x255xf32>
    %467 = arith.subf %465, %466 : vector<16x255xf32>
    %468 = math.absf %467 : vector<16x255xf32>
    %cst_44 = arith.constant 0.000000e+00 : f32
    %469 = vector.broadcast %cst_44 : f32 to vector<16x255xf32>
    %470 = arith.select %69, %468, %469 : vector<16x255xi1>, vector<16x255xf32>
    %471 = vector.shape_cast %470 : vector<16x255xf32> to vector<1x16x255xf32>
    %cst_45 = arith.constant dense<0.000000e+00> : vector<1xf32>
    %472 = vector.multi_reduction <add>, %471, %cst_45 [1, 2] : vector<1x16x255xf32> to vector<1xf32>
    %473 = vector.shape_cast %472 : vector<1xf32> to vector<1x1x1xf32>
    %474 = vector.extract %473[0, 0, 0] : f32 from vector<1x1x1xf32>
    %475 = arith.addf %387, %474 : f32
    %476 = vector.extract_strided_slice %464 {offsets = [0, 16], sizes = [16, 240], strides = [1, 1]} : vector<16x256xf32> to vector<16x240xf32>
    %477 = vector.extract_strided_slice %464 {offsets = [0, 0], sizes = [16, 240], strides = [1, 1]} : vector<16x256xf32> to vector<16x240xf32>
    %478 = arith.subf %476, %477 : vector<16x240xf32>
    %479 = math.absf %478 : vector<16x240xf32>
    %480 = vector.shape_cast %479 : vector<16x240xf32> to vector<1x16x240xf32>
    %cst_46 = arith.constant dense<0.000000e+00> : vector<1xf32>
    %481 = vector.multi_reduction <add>, %480, %cst_46 [1, 2] : vector<1x16x240xf32> to vector<1xf32>
    %482 = vector.shape_cast %481 : vector<1xf32> to vector<1x1x1xf32>
    %483 = vector.extract %482[0, 0, 0] : f32 from vector<1x1x1xf32>
    %484 = arith.addf %475, %483 : f32
    %485 = vector.extract_strided_slice %464 {offsets = [1, 0], sizes = [15, 256], strides = [1, 1]} : vector<16x256xf32> to vector<15x256xf32>
    %486 = vector.extract_strided_slice %464 {offsets = [0, 0], sizes = [15, 256], strides = [1, 1]} : vector<16x256xf32> to vector<15x256xf32>
    %487 = arith.subf %485, %486 : vector<15x256xf32>
    %488 = math.absf %487 : vector<15x256xf32>
    %489 = vector.shape_cast %488 : vector<15x256xf32> to vector<1x15x256xf32>
    %cst_47 = arith.constant dense<0.000000e+00> : vector<1xf32>
    %490 = vector.multi_reduction <add>, %489, %cst_47 [1, 2] : vector<1x15x256xf32> to vector<1xf32>
    %491 = vector.shape_cast %490 : vector<1xf32> to vector<1x1x1xf32>
    %492 = vector.extract %491[0, 0, 0] : f32 from vector<1x1x1xf32>
    %493 = arith.addf %484, %492 : f32
    %494 = tpu.iota {dimensions = array<i32: 0>} : vector<8x128xi32>
    %c0_i32_48 = arith.constant 0 : i32
    %495 = vector.broadcast %c0_i32_48 : i32 to vector<8x128xi32>
    %496 = arith.cmpi eq, %494, %495 : vector<8x128xi32>
    %cst_49 = arith.constant 0.000000e+00 : f32
    %497 = vector.broadcast %444 : f32 to vector<8x128xf32>
    %498 = vector.broadcast %cst_49 : f32 to vector<8x128xf32>
    %499 = arith.select %496, %497, %498 : vector<8x128xi1>, vector<8x128xf32>
    %c1_i32_50 = arith.constant 1 : i32
    %500 = vector.broadcast %c1_i32_50 : i32 to vector<8x128xi32>
    %501 = arith.cmpi eq, %494, %500 : vector<8x128xi32>
    %cst_51 = arith.constant 0.000000e+00 : f32
    %502 = vector.broadcast %453 : f32 to vector<8x128xf32>
    %503 = vector.broadcast %cst_51 : f32 to vector<8x128xf32>
    %504 = arith.select %501, %502, %503 : vector<8x128xi1>, vector<8x128xf32>
    %505 = arith.addf %499, %504 : vector<8x128xf32>
    %c2_i32 = arith.constant 2 : i32
    %506 = vector.broadcast %c2_i32 : i32 to vector<8x128xi32>
    %507 = arith.cmpi eq, %494, %506 : vector<8x128xi32>
    %cst_52 = arith.constant 0.000000e+00 : f32
    %508 = vector.broadcast %462 : f32 to vector<8x128xf32>
    %509 = vector.broadcast %cst_52 : f32 to vector<8x128xf32>
    %510 = arith.select %507, %508, %509 : vector<8x128xi1>, vector<8x128xf32>
    %511 = arith.addf %505, %510 : vector<8x128xf32>
    %c3_i32 = arith.constant 3 : i32
    %512 = vector.broadcast %c3_i32 : i32 to vector<8x128xi32>
    %513 = arith.cmpi eq, %494, %512 : vector<8x128xi32>
    %cst_53 = arith.constant 0.000000e+00 : f32
    %514 = vector.broadcast %493 : f32 to vector<8x128xf32>
    %515 = vector.broadcast %cst_53 : f32 to vector<8x128xf32>
    %516 = arith.select %513, %514, %515 : vector<8x128xi1>, vector<8x128xf32>
    %517 = arith.addf %511, %516 : vector<8x128xf32>
    %c0_54 = arith.constant 0 : index
    %c0_55 = arith.constant 0 : index
    %c0_56 = arith.constant 0 : index
    %518 = vector.load %arg6[%c0_54, %c0_55, %c0_56] : memref<1x8x128xf32, #tpu.memory_space<vmem>>, vector<1x8x128xf32>
    %519 = vector.shape_cast %518 : vector<1x8x128xf32> to vector<8x128xf32>
    %520 = arith.addf %519, %517 : vector<8x128xf32>
    %c0_57 = arith.constant 0 : index
    %c0_58 = arith.constant 0 : index
    %c0_59 = arith.constant 0 : index
    %521 = vector.load %arg6[%c0_57, %c0_58, %c0_59] : memref<1x8x128xf32, #tpu.memory_space<vmem>>, vector<1x8x128xf32>
    %522 = vector.shape_cast %521 : vector<1x8x128xf32> to vector<8x128xf32>
    %523 = vector.shape_cast %520 : vector<8x128xf32> to vector<1x8x128xf32>
    tpu.vector_store %arg6[%c0_57, %c0_58, %c0_59], %523 {strides = array<i32>} : memref<1x8x128xf32, #tpu.memory_space<vmem>>, vector<1x8x128xf32>,
    return
  }
  func.func @transform_0(%arg0: i32, %arg1: i32) -> i32 {
    %c0_i32 = arith.constant 0 : i32
    %c0_i32_0 = arith.constant 0 : i32
    return %c0_i32 : i32
  }
  func.func @transform_1(%arg0: i32, %arg1: i32) -> i32 {
    %c0_i32 = arith.constant 0 : i32
    %c0_i32_0 = arith.constant 0 : i32
    return %c0_i32 : i32
  }
  func.func @transform_2(%arg0: i32, %arg1: i32) -> (i32, i32, i32, i32) {
    %c0_i32 = arith.constant 0 : i32
    %c0_i32_0 = arith.constant 0 : i32
    %c0_i32_1 = arith.constant 0 : i32
    return %arg0, %c0_i32, %arg1, %c0_i32_0 : i32, i32, i32, i32
  }
  func.func @transform_3(%arg0: i32, %arg1: i32) -> (i32, i32, i32, i32) {
    %c0_i32 = arith.constant 0 : i32
    %c0_i32_0 = arith.constant 0 : i32
    %c0_i32_1 = arith.constant 0 : i32
    return %arg0, %c0_i32, %arg1, %c0_i32_0 : i32, i32, i32, i32
  }
  func.func @transform_4(%arg0: i32, %arg1: i32) -> (i32, i32, i32) {
    %c0_i32 = arith.constant 0 : i32
    %c0_i32_0 = arith.constant 0 : i32
    %c0_i32_1 = arith.constant 0 : i32
    return %arg0, %c0_i32, %c0_i32_0 : i32, i32, i32
  }
}

</mosaic_0001>

<bundles_post_ra>
// kernel: ddpm_forward_pallas.1
= control target key start
LH: loop header
LB: loop body
LE: loop exit
PB: predicated region body
PF: predicated region fallthrough
CT: control target
= control target key end

     0   :  { %s3664_s0 = inlined_call_operand.vmem [shape: f32[2], index: 0, kind: input, shape index: {}]   ;;  %s3665_s1 = inlined_call_operand.vmem [shape: f32[49], index: 1, kind: input, shape index: {}]   ;;  %s3666_s2 = inlined_call_operand.vmem [shape: f32[2,4,16,256], index: 2, kind: input, shape index: {}]   ;;  %s3667_s3 = inlined_call_operand.vmem [shape: f32[2,4,16,256], index: 3, kind: input, shape index: {}]   ;;  %s3668_s4 = inlined_call_operand.vmem [shape: f32[2,8,128], index: 4, kind: output, shape index: {}]  }
   0x1   :  { %3769 = sst [smem:[#allocation65_spill]] %s3664_s0 }
   0x2   :  { %3770 = sst [smem:[#allocation66_spill]] %s3665_s1 }
   0x3   :  { %3771 = sst [smem:[#allocation67_spill]] %s3666_s2 }
   0x4   :  { %3772 = sst [smem:[#allocation68_spill]] %s3667_s3 }
   0x5   :  { %9 = vsyncpa [#allocation3], 0 }
   0x6   :  { %10 = vsyncpa [#allocation5], 0  ;;  %s2194_s15 = smov 0   ;;  %s2196_s16 = smov 0  }
   0x7   :  { %s2198_s17 = smov 0  }
   0x8 LB: > { %3773 = sst [smem:[#allocation8_spill]] %s2157_s16  ;;  %s1920_s18 = sadd.s32 4294967295, %s2161_s17   ;;  %s2161_s17 = sphi %s2198_s17, %s16_s17   ;;  %s2157_s16 = sphi %s2196_s16, %s3898_s16   ;;  %s2153_s15 = sphi %s2194_s15, %s3897_s15  }
   0x9   : > { %3774 = sst [smem:[#allocation9_spill]] %s2161_s17  ;;  %s28_s19 = sadd.s32 1, %s2157_s16 }
   0xa   : > { %p30_p0 = scmp.ge.s32.totalorder %s28_s19, 2  ;;  %p1922_p1 = scmp.ge.s32.totalorder %s2161_s17, 1 }
   0xb   : > { %p157_p2 = scmp.lt.s32.totalorder %s2161_s17, 3  ;;  %p2215_p4 = scmp.eq.s32.totalorder %s1920_s18, 0 }
   0xc   : > { %s3900_s19 = smov (%p30_p0, %s28_s19), 0  ;;  %s3777_s0 = sld [smem:[#allocation65_spill]] }
   0xd   : > { %3775 = sst [smem:[#allocation10_spill]] %s3900_s19  ;;  %p158_p3 = pnand %p1922_p1, %p157_p2 }
   0xe   : > { %s3778_s1 = sld [smem:[#allocation66_spill]]  ;;  %s2163_s27 = smov [#allocation2]  }
   0xf   : > { %p2044_p5 = pneg %p158_p3  ;;  %s2164_s28 = smov [#allocation4]  }
  0x11   : > { %p2045_p6 = pnand %p2215_p4, %p2044_p5  ;;  %220 = sbr.rel (%p158_p3) target bundleno = 737 (0x2e1), region = 36 }
  0x12   : > { %s169_s23 = sshll.u32 %s3777_s0, 4  ;;  %s170_s23 = int_to_ptr.vmem [resolvable:$true] %s169_s23 }
  0x13   : > { %2047 = dma.vmem_to_smem (!%p2045_p6), %s170_s23, 16, %s2163_s27, [#allocation3]  }
  0x14   : > { %s179_s26 = sshll.u32 %s3778_s1, 4  ;;  %s180_s26 = int_to_ptr.vmem [resolvable:$true] %s179_s26 }
  0x15   : > { %2050 = dma.vmem_to_smem (!%p2045_p6), %s180_s26, 16, %s2164_s28, [#allocation5]  }
  0x16   : > { %2144 = dma.done.wait (%p2215_p4), [#allocation3], 16  }
  0x17   : > { %2146 = vsyncadd (%p2215_p4), [#allocation3], 4294967280 }
  0x18   : > { %2148 = dma.done.wait (%p2215_p4), [#allocation5], 16  }
  0x19   : > { %2150 = vsyncadd (%p2215_p4), [#allocation5], 4294967280 }
  0x1a   : > { %232 = sfence }
  0x1b   : > { %s2236_s29 = sld [smem:[#allocation2 + %s2153_s15]]  ;;  %p268_p7 = scmp.lt.s32.totalorder %s2153_s15, 1  ;;  %vm723_vm2 = vcmask 1040384   ;;  %vm746_vm3 = vcmask 1046528   ;;  %vm613_vm4 = vcmask 7168   ;;  %vm674_vm5 = vcmask 130048  }
  0x1c   : > { %s2249_s30 = sld [smem:[#allocation4 + $0x30]]  ;;  %vm701_vm6 = vcmask 916480   ;;  %vm640_vm7 = vcmask 1039360  }
  0x1d   : > { %s3902_s15 = smov (!%p268_p7, %s2153_s15), 1  ;;  %s426_s5 = sld [smem:[#allocation4]] }
  0x1e   : > { %s2254_s6 = sld [smem:[#allocation4 + $0x10]]  ;;  %s1984_s21 = sshll.u32 %s3902_s15, 7 }
  0x1f   : > { %s2257_s8 = sld [smem:[#allocation4 + $0x1]] }
  0x20   : > { %s2259_s9 = sld [smem:[#allocation4 + $0x11]] }
  0x21   : > { %v2239_v0 = vstv %s2236_s29  ;;  %s346_s7 = ssub.f32 1.0, %s2236_s29 }
  0x22   : > { %2086 = vrsqrt.f32 %v2239_v0  ;;  %vm302_vm0 = vcmp.eq.f32.partialorder %v2239_v0, inf  ;;  %v305_v7 = vand.u32 2147483648, %v2239_v0  ;;  %vm304_vm1 = vcmp.eq.f32.partialorder %v2239_v0, 0.0  ;;  %s2261_s10 = sld [smem:[#allocation4 + $0x2]] }
  0x23   : > { %s1943_s11 = sld [smem:[#allocation4 + $0x24]]  ;;  %v347_v15 = vstv %s346_s7  ;;  %v2307_v17 = vstv %s426_s5  ;;  %v2401_v58 = vstv %s2249_s30 }
  0x24   : > { %s2263_s12 = sld [smem:[#allocation4 + $0x12]]  ;;  %v2317_v21 = vstv %s2254_s6 }
  0x25   : > { %s2265_s13 = sld [smem:[#allocation4 + $0x3]]  ;;  %v2320_v22 = vstv %s2257_s8 }
  0x26   : > { %s1942_s14 = sld [smem:[#allocation4 + $0x20]]  ;;  %v2323_v23 = vstv %s2259_s9 }
  0x27   : > { %s2267_s18 = sld [smem:[#allocation4 + $0x2c]] }
  0x28   : > { %v2087_v1 = vpop.eup %2086  ;;  %s2269_s20 = sld [smem:[#allocation4 + $0x13]]  ;;  %v2326_v24 = vstv %s2261_s10 }
  0x29   : > { %v296_v2 = vmul.f32 %v2087_v1, %v2239_v0  ;;  %s2272_s22 = sld [smem:[#allocation4 + $0x28]]  ;;  %s500_s24 = smul.f32 %s1943_s11, %s2236_s29 }
  0x2a   : > { %s2274_s23 = sld [smem:[#allocation4 + $0x4]]  ;;  %v2338_v27 = vstv %s2263_s12  ;;  %s2165_s12 = smov 1  }
  0x2b   : > { %v297_v3 = vmul.f32 %v2087_v1, %v296_v2  ;;  %s2277_s25 = sld [smem:[#allocation4 + $0x14]]  ;;  %v2349_v33 = vstv %s2265_s13 }
  0x2c   : > { %s3779_s2 = sld [smem:[#allocation67_spill]] }
  0x2d   : > { %v298_v4 = vmul.f32 0.5, %v297_v3  ;;  %s2284_s0 = sld [smem:[#allocation4 + $0x5]]  ;;  %s509_s27 = smul.f32 %s2267_s18, %s2236_s29 }
  0x2e   : > { %s2286_s1 = sld [smem:[#allocation4 + $0x15]]  ;;  %v2360_v38 = vstv %s2269_s20 }
  0x2f   : > { %v299_v5 = vsub.f32 1.5, %v298_v4  ;;  %s2288_s11 = sld [smem:[#allocation4 + $0x6]] }
  0x30   : > { %s2296_s26 = sadd.f32 %s1942_s14, %s500_s24  ;;  %v2410_v63 = vstv %s2274_s23 }
  0x31   : > { %v300_v6 = vmul.f32 %v2087_v1, %v299_v5  ;;  %s2314_s14 = sld [smem:[#allocation4 + $0x7]]  ;;  %v2413_v1 = vstv %s2277_s25 }
  0x32   : > { %s2282_s28 = scalar_lea.vmem %s3779_s2, %s1984_s21  ;;  %s2305_s2 = sld [smem:[#allocation4 + $0x16]]  ;;  %v2373_v47 = vstv %s2296_s26 }
  0x33   : > { %v301_v8 = vmul.f32 %v300_v6, %v2239_v0  ;;  %v2291_v11 = vld [vmem:[%s2282_s28 + $0x18] sm:$0xff]  ;;  %v2303_v16 = vld [vmem:[%s2282_s28 + $0x8] sm:$0xff]  ;;  %s2328_s5 = sld [smem:[#allocation4 + $0x17]]  ;;  %v2342_v28 = vld [vmem:[%s2282_s28] sm:$0xff]  ;;  %v2416_v2 = vstv %s2284_s0 }
  0x34   : > { %3780 = vst [vmem:[#allocation11_spill] sm:$0xff] %v2291_v11  ;;  %v2294_v12 = vld [vmem:[%s2282_s28 + $0x38] sm:$0xff]  ;;  %v2310_v18 = vld [vmem:[%s2282_s28 + $0x28] sm:$0xff]  ;;  %s3784_s3 = sld [smem:[#allocation68_spill]]  ;;  %v351_v25 = vmul.f32 %v347_v15, %v2291_v11  ;;  %v2345_v29 = vld [vmem:[%s2282_s28 + $0x20] sm:$0xff]  ;;  %v349_v34 = vmul.f32 %v347_v15, %v2303_v16  ;;  %v2376_v48 = vmul.f32 %v347_v15, %v2342_v28  ;;  %v2419_v3 = vstv %s2286_s1 }
  0x35   : > { %v303_v9 = vsel %vm302_vm0, %v2239_v0, %v301_v8  ;;  %3781 = vst [vmem:[#allocation12_spill] sm:$0xff] %v2294_v12  ;;  %v325_v13 = vld [vmem:[%s2282_s28 + $0x58] sm:$0xff]  ;;  %v323_v19 = vld [vmem:[%s2282_s28 + $0x48] sm:$0xff]  ;;  %v364_v26 = vmul.f32 %v347_v15, %v2294_v12  ;;  %s510_s6 = sadd.f32 %s2272_s22, %s509_s27  ;;  %v322_v30 = vld [vmem:[%s2282_s28 + $0x40] sm:$0xff]  ;;  %v362_v39 = vmul.f32 %v347_v15, %v2310_v18  ;;  %v2379_v49 = vmul.f32 %v347_v15, %v2345_v29 }
  0x36   : > { %v306_v10 = vsel %vm304_vm1, %v305_v7, %v303_v9  ;;  %v329_v14 = vld [vmem:[%s2282_s28 + $0x78] sm:$0xff]  ;;  %3782 = vst [vmem:[#allocation13_spill] sm:$0xff] %v2303_v16  ;;  %v327_v20 = vld [vmem:[%s2282_s28 + $0x68] sm:$0xff]  ;;  %v376_v31 = vmul.f32 %v347_v15, %v325_v13  ;;  %v326_v35 = vld [vmem:[%s2282_s28 + $0x60] sm:$0xff]  ;;  %v374_v40 = vmul.f32 %v347_v15, %v323_v19  ;;  %v2381_v50 = vmul.f32 %v347_v15, %v322_v30  ;;  %s2530_s0 = sld [smem:[#allocation4 + $0x25]] }
  0x37   : > { %1986 = vpush %v306_v10  ;;  %v388_v32 = vmul.f32 %v347_v15, %v329_v14  ;;  %v2354_v36 = vld [vmem:[%s2282_s28 + $0x10] sm:$0xff]  ;;  %v386_v41 = vmul.f32 %v347_v15, %v327_v20  ;;  %v2384_v52 = vstv %s510_s6  ;;  %v2392_v55 = vmul.f32 %v347_v15, %v326_v35  ;;  %s2536_s1 = sld [smem:[#allocation4 + $0x2d]] }
  0x38   : > { %3783 = vst [vmem:[#allocation14_spill] sm:$0xff] %v2310_v18  ;;  %v2357_v37 = vld [vmem:[%s2282_s28 + $0x30] sm:$0xff]  ;;  %v2395_v56 = vmul.f32 %v347_v15, %v2354_v36  ;;  %v2422_v4 = vstv %s2288_s11  ;;  %v2427_v6 = vstv %s2305_s2  ;;  %v2430_v7 = vstv %s2314_s14  ;;  %s2571_s2 = sld [smem:[#allocation4 + $0x21]] }
  0x39   : > { %3785 = vst [vmem:[#allocation15_spill] sm:$0xff] %v2342_v28  ;;  %v324_v42 = vld [vmem:[%s2282_s28 + $0x50] sm:$0xff]  ;;  %v2398_v57 = vmul.f32 %v347_v15, %v2357_v37  ;;  %v2433_v8 = vstv %s2328_s5  ;;  %s2581_s30 = sld [smem:[#allocation4 + $0x29]] }
  0x3a   : > { %s2333_s24 = scalar_lea.vmem %s3784_s3, %s1984_s21  ;;  %3786 = vst [vmem:[#allocation16_spill] sm:$0xff] %v2345_v29  ;;  %v328_v43 = vld [vmem:[%s2282_s28 + $0x70] sm:$0xff]  ;;  %v2405_v61 = vmul.f32 %v347_v15, %v324_v42  ;;  %s2667_s21 = sld [smem:[#allocation4 + $0x8]] }
  0x3b   : > { %3787 = vst [vmem:[#allocation17_spill] sm:$0xff] %v2354_v36  ;;  %v2366_v44 = vld [vmem:[%s2333_s24 + $0x18] sm:$0xff]  ;;  %v2387_v53 = vld [vmem:[%s2333_s24 + $0x8] sm:$0xff]  ;;  %v2407_v62 = vmul.f32 %v347_v15, %v328_v43  ;;  %s2675_s22 = sld [smem:[#allocation4 + $0x18]] }
  0x3c   : > { %3788 = vst [vmem:[#allocation18_spill] sm:$0xff] %v2357_v37  ;;  %v2369_v45 = vld [vmem:[%s2333_s24 + $0x38] sm:$0xff]  ;;  %v2390_v54 = vld [vmem:[%s2333_s24 + $0x28] sm:$0xff]  ;;  %s846_s9 = smul.f32 %s2530_s0, %s2236_s29  ;;  %s2684_s23 = sld [smem:[#allocation4 + $0x9]] }
  0x3d   : > { %3789 = vst [vmem:[#allocation19_spill] sm:$0xff] %v2366_v44  ;;  %v341_v46 = vld [vmem:[%s2333_s24 + $0x58] sm:$0xff]  ;;  %v339_v59 = vld [vmem:[%s2333_s24 + $0x48] sm:$0xff]  ;;  %s855_s10 = smul.f32 %s2536_s1, %s2236_s29  ;;  %s2695_s25 = sld [smem:[#allocation4 + $0x19]] }
  0x3e   : > { %3790 = vst [vmem:[#allocation20_spill] sm:$0xff] %v2369_v45  ;;  %v345_v51 = vld [vmem:[%s2333_s24 + $0x78] sm:$0xff]  ;;  %v343_v60 = vld [vmem:[%s2333_s24 + $0x68] sm:$0xff]  ;;  %s847_s13 = sadd.f32 %s2571_s2, %s846_s9 }
  0x3f   : > { %3791 = vst [vmem:[#allocation21_spill] sm:$0xff] %v2387_v53  ;;  %s856_s20 = sadd.f32 %s2581_s30, %s855_s10 }
  0x40   : > { %3792 = vst [vmem:[#allocation22_spill] sm:$0xff] %v2390_v54  ;;  %s2703_s11 = sld [smem:[#allocation4 + $0xa]] }
  0x41   : > { %s2711_s26 = sld [smem:[#allocation4 + $0x1a]] }
  0x42   : > { %s2720_s27 = sld [smem:[#allocation4 + $0x26]] }
  0x43   : > { %s2728_s14 = sld [smem:[#allocation4 + $0xb]] }
  0x44   : > { %s2736_s5 = sld [smem:[#allocation4 + $0x1b]] }
  0x45   : > { %s2744_s7 = sld [smem:[#allocation4 + $0x22]] }
  0x46   : > { %s2753_s18 = sld [smem:[#allocation4 + $0x2e]] }
  0x47   : > { %s2760_s6 = sld [smem:[#allocation4 + $0x2a]] }
  0x48   : > { %s2776_s0 = sld [smem:[#allocation4 + $0xc]]  ;;  %s1184_s2 = smul.f32 %s2720_s27, %s2236_s29 }
  0x49   : > { %s2782_s1 = sld [smem:[#allocation4 + $0x1c]] }
  0x4a   : > { %s2796_s30 = sld [smem:[#allocation4 + $0xd]] }
  0x4b   : > { %s2801_s9 = sld [smem:[#allocation4 + $0x1d]] }
  0x4c   : > { %s2813_s10 = sld [smem:[#allocation4 + $0xe]] }
  0x4d   : > { %s2845_s27 = sld [smem:[#allocation4 + $0x2f]] }
  0x68   : > { %s1987_s8 = spop %1986 }
  0x69   : > { %v2424_v5 = vstv %s1987_s8  ;;  %s2166_s8 = smov 16  }
  0x6a   : > { %v356_v9 = vmul.f32 %v2424_v5, %v2366_v44  ;;  %v368_v10 = vmul.f32 %v2424_v5, %v2369_v45  ;;  %v380_v13 = vmul.f32 %v2424_v5, %v341_v46  ;;  %v392_v14 = vmul.f32 %v2424_v5, %v345_v51 }
  0x6b   : > { %v354_v15 = vmul.f32 %v2424_v5, %v2387_v53  ;;  %v366_v19 = vmul.f32 %v2424_v5, %v2390_v54  ;;  %v378_v20 = vmul.f32 %v2424_v5, %v339_v59  ;;  %v390_v30 = vmul.f32 %v2424_v5, %v343_v60 }
  0x6c   : > { %v2447_v35 = vadd.f32 %v356_v9, %v351_v25  ;;  %v2449_v42 = vadd.f32 %v368_v10, %v364_v26  ;;  %v2451_v43 = vadd.f32 %v380_v13, %v376_v31  ;;  %v2453_v45 = vadd.f32 %v392_v14, %v388_v32  ;;  %v2484_v13 = vld [vmem:[%s2333_s24] sm:$0xff] }
  0x6d   : > { %v2455_v46 = vadd.f32 %v354_v15, %v349_v34  ;;  %v2457_v51 = vadd.f32 %v366_v19, %v362_v39  ;;  %v2459_v12 = vadd.f32 %v378_v20, %v374_v40  ;;  %v2461_v54 = vadd.f32 %v390_v30, %v386_v41  ;;  %v2487_v14 = vld [vmem:[%s2333_s24 + $0x20] sm:$0xff] }
  0x6e   : > { %3793 = vst [vmem:[#allocation23_spill] sm:$0xff] %v2447_v35  ;;  %v431_v25 = vmul.f32 %v2307_v17, %v2447_v35  ;;  %v437_v26 = vmul.f32 %v2317_v21, %v2447_v35  ;;  %v443_v31 = vmul.f32 %v2320_v22, %v2449_v42  ;;  %v453_v32 = vmul.f32 %v2323_v23, %v2449_v42 }
  0x6f   : > { %3794 = vst [vmem:[#allocation24_spill] sm:$0xff] %v2449_v42  ;;  %v463_v34 = vmul.f32 %v2326_v24, %v2451_v43  ;;  %v473_v39 = vmul.f32 %v2338_v27, %v2451_v43  ;;  %v483_v40 = vmul.f32 %v2349_v33, %v2453_v45  ;;  %v493_v41 = vmul.f32 %v2360_v38, %v2453_v45 }
  0x70   : > { %3795 = vst [vmem:[#allocation25_spill] sm:$0xff] %v2451_v43  ;;  %v447_v59 = vadd.f32 %v443_v31, %v431_v25  ;;  %v457_v60 = vadd.f32 %v453_v32, %v437_v26  ;;  %v429_v9 = vmul.f32 %v2307_v17, %v2455_v46  ;;  %v435_v10 = vmul.f32 %v2317_v21, %v2455_v46  ;;  %v2498_v25 = vld [vmem:[%s2333_s24 + $0x40] sm:$0xff] }
  0x71   : > { %3796 = vst [vmem:[#allocation26_spill] sm:$0xff] %v2453_v45  ;;  %v441_v15 = vmul.f32 %v2320_v22, %v2457_v51  ;;  %v451_v19 = vmul.f32 %v2323_v23, %v2457_v51  ;;  %v461_v20 = vmul.f32 %v2326_v24, %v2459_v12  ;;  %v471_v30 = vmul.f32 %v2338_v27, %v2459_v12  ;;  %v342_v26 = vld [vmem:[%s2333_s24 + $0x60] sm:$0xff] }
  0x72   : > { %3797 = vst [vmem:[#allocation27_spill] sm:$0xff] %v2487_v14  ;;  %v467_v31 = vadd.f32 %v463_v34, %v447_v59  ;;  %v477_v32 = vadd.f32 %v473_v39, %v457_v60  ;;  %v481_v37 = vmul.f32 %v2349_v33, %v2461_v54  ;;  %v491_v18 = vmul.f32 %v2360_v38, %v2461_v54 }
  0x73   : > { %3798 = vst [vmem:[#allocation28_spill] sm:$0xff] %v2498_v25  ;;  %v445_v29 = vadd.f32 %v441_v15, %v429_v9  ;;  %v455_v44 = vadd.f32 %v451_v19, %v435_v10  ;;  %v353_v53 = vmul.f32 %v2424_v5, %v2484_v13  ;;  %v365_v11 = vmul.f32 %v2424_v5, %v2487_v14 }
  0x74   : > { %v487_v36 = vadd.f32 %v483_v40, %v467_v31  ;;  %v497_v16 = vadd.f32 %v493_v41, %v477_v32  ;;  %v377_v34 = vmul.f32 %v2424_v5, %v2498_v25  ;;  %v389_v39 = vmul.f32 %v2424_v5, %v342_v26 }
  0x75   : > { %v465_v59 = vadd.f32 %v461_v20, %v445_v29  ;;  %v475_v60 = vadd.f32 %v471_v30, %v455_v44  ;;  %v2513_v28 = vadd.f32 %v353_v53, %v2376_v48  ;;  %v2516_v9 = vadd.f32 %v365_v11, %v2379_v49  ;;  %v2547_v49 = vld [vmem:[%s2333_s24 + $0x10] sm:$0xff] }
  0x76   : > { %v2519_v10 = vadd.f32 %v2373_v47, %v487_v36  ;;  %v2522_v40 = vadd.f32 %v2384_v52, %v497_v16  ;;  %v2525_v41 = vadd.f32 %v377_v34, %v2381_v50  ;;  %v2528_v15 = vadd.f32 %v389_v39, %v2392_v55  ;;  %v2560_v20 = vld [vmem:[%s2333_s24 + $0x30] sm:$0xff] }
  0x77   : > { %3799 = vst [vmem:[#allocation29_spill] sm:$0xff] %v2513_v28  ;;  %v485_v29 = vadd.f32 %v481_v37, %v465_v59  ;;  %v495_v44 = vadd.f32 %v491_v18, %v475_v60  ;;  %v428_v11 = vmul.f32 %v2307_v17, %v2513_v28  ;;  %v434_v36 = vmul.f32 %v2317_v21, %v2513_v28  ;;  %v2566_v34 = vld [vmem:[%s2333_s24 + $0x50] sm:$0xff] }
  0x78   : > { %3800 = vst [vmem:[#allocation30_spill] sm:$0xff] %v2516_v9  ;;  %v520_v16 = vmul.f32 %v2519_v10, %v2239_v0  ;;  %v528_v48 = vmul.f32 %v2522_v40, %v2424_v5  ;;  %v440_v37 = vmul.f32 %v2320_v22, %v2516_v9  ;;  %v450_v18 = vmul.f32 %v2323_v23, %v2516_v9  ;;  %v2569_v39 = vld [vmem:[%s2333_s24 + $0x70] sm:$0xff] }
  0x79   : > { %3801 = vst [vmem:[#allocation31_spill] sm:$0xff] %v2522_v40  ;;  %v2550_v50 = vadd.f32 %v2373_v47, %v485_v29  ;;  %v2553_v53 = vadd.f32 %v2384_v52, %v495_v44  ;;  %v460_v55 = vmul.f32 %v2326_v24, %v2525_v41  ;;  %v470_v19 = vmul.f32 %v2338_v27, %v2525_v41 }
  0x7a   : > { %3802 = vst [vmem:[#allocation32_spill] sm:$0xff] %v2525_v41  ;;  %v524_v30 = vsub.f32 %v2447_v35, %v520_v16  ;;  %v444_v26 = vadd.f32 %v440_v37, %v428_v11  ;;  %v454_v31 = vadd.f32 %v450_v18, %v434_v36  ;;  %v480_v32 = vmul.f32 %v2349_v33, %v2528_v15 }
  0x7b   : > { %3803 = vst [vmem:[#allocation33_spill] sm:$0xff] %v2528_v15  ;;  %v518_v59 = vmul.f32 %v2550_v50, %v2239_v0  ;;  %v526_v60 = vmul.f32 %v2553_v53, %v2424_v5  ;;  %v490_v29 = vmul.f32 %v2360_v38, %v2528_v15  ;;  %v355_v44 = vmul.f32 %v2424_v5, %v2547_v49 }
  0x7c   : > { %3804 = vst [vmem:[#allocation34_spill] sm:$0xff] %v2566_v34  ;;  %v2583_v11 = vsub.f32 %v524_v30, %v528_v48  ;;  %v464_v36 = vadd.f32 %v460_v55, %v444_v26  ;;  %v474_v16 = vadd.f32 %v470_v19, %v454_v31  ;;  %v367_v37 = vmul.f32 %v2424_v5, %v2560_v20 }
  0x7d   : > { %3805 = vst [vmem:[#allocation35_spill] sm:$0xff] %v2569_v39  ;;  %v522_v18 = vsub.f32 %v2455_v46, %v518_v59  ;;  %v2589_v25 = vadd.f32 %v355_v44, %v2395_v56  ;;  %v379_v14 = vmul.f32 %v2424_v5, %v2566_v34  ;;  %v391_v40 = vmul.f32 %v2424_v5, %v2569_v39 }
  0x7e   : > { %v2597_v48 = vmul.f32 %v2401_v58, %v2583_v11  ;;  %v484_v55 = vadd.f32 %v480_v32, %v464_v36  ;;  %v494_v19 = vadd.f32 %v490_v29, %v474_v16  ;;  %v2600_v30 = vadd.f32 %v367_v37, %v2398_v57 }
  0x7f   : > { %3806 = vst [vmem:[#allocation36_spill] sm:$0xff] %v2589_v25  ;;  %v2604_v26 = vsub.f32 %v522_v18, %v526_v60  ;;  %v2607_v56 = vadd.f32 %v379_v14, %v2405_v61  ;;  %v2610_v31 = vadd.f32 %v391_v40, %v2407_v62  ;;  %v430_v59 = vmul.f32 %v2307_v17, %v2589_v25 }
  0x80   : > { %3807 = vst [vmem:[#allocation37_spill] sm:$0xff] %v2600_v30  ;;  %611 = vrot.lane.b32.xlu0 %v2597_v48, %s2165_s12  ;;  %v2619_v57 = vadd.f32 %v2373_v47, %v484_v55  ;;  %v2622_v32 = vadd.f32 %v2384_v52, %v494_v19  ;;  %v436_v61 = vmul.f32 %v2317_v21, %v2589_v25 }
  0x81   : > { %3808 = vst [vmem:[#allocation38_spill] sm:$0xff] %v2607_v56  ;;  %v442_v62 = vmul.f32 %v2320_v22, %v2600_v30  ;;  %v2630_v17 = vmul.f32 %v2401_v58, %v2604_v26  ;;  %v452_v14 = vmul.f32 %v2323_v23, %v2600_v30  ;;  %v462_v40 = vmul.f32 %v2326_v24, %v2607_v56 }
  0x82   : > { %v472_v60 = vmul.f32 %v2338_v27, %v2607_v56  ;;  %v517_v21 = vmul.f32 %v2619_v57, %v2239_v0  ;;  %v525_v29 = vmul.f32 %v2622_v32, %v2424_v5  ;;  %v482_v44 = vmul.f32 %v2349_v33, %v2610_v31 }
  0x83   : > { %3809 = vst [vmem:[#allocation39_spill] sm:$0xff] %v2630_v17  ;;  %v446_v22 = vadd.f32 %v442_v62, %v430_v59  ;;  %607 = vrot.lane.b32.xlu2 %v2630_v17, %s2165_s12  ;;  %v456_v23 = vadd.f32 %v452_v14, %v436_v61  ;;  %v492_v24 = vmul.f32 %v2360_v38, %v2610_v31 }
  0x84   : > { %v774_v27 = vmul.f32 %v2410_v63, %v2513_v28  ;;  %v780_v36 = vmul.f32 %v2413_v1, %v2513_v28  ;;  %v521_v16 = vsub.f32 %v2513_v28, %v517_v21  ;;  %v786_v33 = vmul.f32 %v2416_v2, %v2516_v9 }
  0x85   : > { %v466_v37 = vadd.f32 %v462_v40, %v446_v22  ;;  %v796_v18 = vmul.f32 %v2419_v3, %v2516_v9  ;;  %v476_v55 = vadd.f32 %v472_v60, %v456_v23  ;;  %v806_v38 = vmul.f32 %v2422_v4, %v2525_v41 }
  0x86   : > { %v816_v19 = vmul.f32 %v2427_v6, %v2525_v41  ;;  %v826_v59 = vmul.f32 %v2430_v7, %v2528_v15  ;;  %v2665_v61 = vsub.f32 %v521_v16, %v525_v29  ;;  %v790_v14 = vadd.f32 %v786_v33, %v774_v27 }
  0x87   : > { %v486_v62 = vadd.f32 %v482_v44, %v466_v37  ;;  %v800_v40 = vadd.f32 %v796_v18, %v780_v36  ;;  %v496_v21 = vadd.f32 %v492_v24, %v476_v55  ;;  %v836_v60 = vmul.f32 %v2433_v8, %v2528_v15 }
  0x88   : > { %v2671_v22 = vstv %s847_s13  ;;  %v2673_v23 = vstv %s856_s20  ;;  %v2679_v39 = vmul.f32 %v2401_v58, %v2665_v61  ;;  %v810_v44 = vadd.f32 %v806_v38, %v790_v14  ;;  %s2823_s13 = sld [smem:[#allocation4 + $0x27]] }
  0x89   : > { %v2682_v29 = vadd.f32 %v2373_v47, %v486_v62  ;;  %v820_v27 = vadd.f32 %v816_v19, %v800_v40  ;;  %v2687_v24 = vadd.f32 %v2384_v52, %v496_v21  ;;  %v777_v36 = vmul.f32 %v2410_v63, %v2447_v35  ;;  %s2833_s20 = sadd.f32 %s2744_s7, %s1184_s2 }
  0x8a   : > { %v783_v16 = vmul.f32 %v2413_v1, %v2447_v35  ;;  %v789_v37 = vmul.f32 %v2416_v2, %v2449_v42  ;;  %605 = vrot.lane.b32.xlu1 %v2679_v39, %s2165_s12  ;;  %v830_v33 = vadd.f32 %v826_v59, %v810_v44  ;;  %v799_v18 = vmul.f32 %v2419_v3, %v2449_v42  ;;  %s2866_s7 = sld [smem:[#allocation4 + $0x23]] }
  0x8b   : > { %v519_v47 = vmul.f32 %v2682_v29, %v2239_v0  ;;  %v840_v52 = vadd.f32 %v836_v60, %v820_v27  ;;  %v527_v55 = vmul.f32 %v2687_v24, %v2424_v5  ;;  %v809_v19 = vmul.f32 %v2422_v4, %v2451_v43 }
  0x8c   : > { %v793_v38 = vadd.f32 %v789_v37, %v777_v36  ;;  %v819_v62 = vmul.f32 %v2427_v6, %v2451_v43  ;;  %v2715_v14 = vadd.f32 %v2671_v22, %v830_v33  ;;  %v803_v21 = vadd.f32 %v799_v18, %v783_v16 }
  0x8d   : > { %v523_v59 = vsub.f32 %v2589_v25, %v519_v47  ;;  %v2718_v40 = vadd.f32 %v2673_v23, %v840_v52  ;;  %v829_v44 = vmul.f32 %v2430_v7, %v2453_v45  ;;  %v839_v27 = vmul.f32 %v2433_v8, %v2453_v45 }
  0x8e   : > { %v813_v60 = vadd.f32 %v809_v19, %v793_v38  ;;  %v776_v36 = vmul.f32 %v2410_v63, %v2589_v25  ;;  %v862_v47 = vmul.f32 %v2715_v14, %v2239_v0  ;;  %v823_v33 = vadd.f32 %v819_v62, %v803_v21 }
  0x8f   : > { %v2730_v37 = vsub.f32 %v523_v59, %v527_v55  ;;  %v870_v16 = vmul.f32 %v2718_v40, %v2424_v5  ;;  %v782_v18 = vmul.f32 %v2413_v1, %v2589_v25  ;;  %v788_v38 = vmul.f32 %v2416_v2, %v2600_v30 }
  0x90   : > { %v833_v52 = vadd.f32 %v829_v44, %v813_v60  ;;  %v798_v55 = vmul.f32 %v2419_v3, %v2600_v30  ;;  %v866_v62 = vsub.f32 %v2516_v9, %v862_v47  ;;  %v843_v59 = vadd.f32 %v839_v27, %v823_v33 }
  0x91   : > { %v2748_v19 = vmul.f32 %v2401_v58, %v2730_v37  ;;  %v808_v21 = vmul.f32 %v2422_v4, %v2607_v56  ;;  %v792_v44 = vadd.f32 %v788_v38, %v776_v36  ;;  %v818_v15 = vmul.f32 %v2427_v6, %v2607_v56 }
  0x92   : > { %v2756_v60 = vadd.f32 %v2671_v22, %v833_v52  ;;  %v802_v34 = vadd.f32 %v798_v55, %v782_v18  ;;  %v2764_v47 = vsub.f32 %v866_v62, %v870_v16  ;;  %668 = vrot.lane.b32.xlu1 %v2630_v17, %s2166_s8  ;;  %v2769_v27 = vadd.f32 %v2673_v23, %v843_v59 }
  0x93   : > { %609 = vrot.lane.b32.xlu2 %v2748_v19, %s2165_s12  ;;  %v828_v36 = vmul.f32 %v2430_v7, %v2610_v31  ;;  %v2774_v33 = vstv %s2667_s21  ;;  %v812_v52 = vadd.f32 %v808_v21, %v792_v44  ;;  %v838_v38 = vmul.f32 %v2433_v8, %v2610_v31  ;;  %s1193_s21 = smul.f32 %s2753_s18, %s2236_s29 }
  0x94   : > { %3810 = vst [vmem:[#allocation40_spill] sm:$0xff] %v2774_v33  ;;  %v865_v16 = vmul.f32 %v2756_v60, %v2239_v0  ;;  %v822_v18 = vadd.f32 %v818_v15, %v802_v34  ;;  %v2786_v55 = vmul.f32 %v2764_v47, %v2401_v58  ;;  %v873_v62 = vmul.f32 %v2769_v27, %v2424_v5 }
  0x95   : > { %v775_v59 = vmul.f32 %v2410_v63, %v2455_v46  ;;  %v781_v41 = vmul.f32 %v2413_v1, %v2455_v46  ;;  %v832_v34 = vadd.f32 %v828_v36, %v812_v52  ;;  %v787_v44 = vmul.f32 %v2416_v2, %v2457_v51 }
  0x96   : > { %3811 = vst [vmem:[#allocation41_spill] sm:$0xff] %v2786_v55  ;;  %v869_v15 = vsub.f32 %v2449_v42, %v865_v16  ;;  %v842_v21 = vadd.f32 %v838_v38, %v822_v18  ;;  %949 = vrot.lane.b32.xlu0 %v2786_v55, %s2165_s12  ;;  %v797_v63 = vmul.f32 %v2419_v3, %v2457_v51  ;;  %v2830_v38 = vstv %s2675_s22  ;;  %s2859_s22 = sld [smem:[#allocation4 + $0x1e]] }
  0x97   : > { %v807_v1 = vmul.f32 %v2422_v4, %v2459_v12  ;;  %v817_v36 = vmul.f32 %v2427_v6, %v2459_v12  ;;  %v827_v2 = vmul.f32 %v2430_v7, %v2461_v54  ;;  %v2818_v52 = vadd.f32 %v2671_v22, %v832_v34  ;;  %3812 = vst [vmem:[#allocation42_spill] sm:$0xff] %v2830_v38 }
  0x98   : > { %v2815_v16 = vsub.f32 %v869_v15, %v873_v62  ;;  %v2821_v18 = vadd.f32 %v2673_v23, %v842_v21  ;;  %v791_v3 = vadd.f32 %v787_v44, %v775_v59  ;;  %v801_v4 = vadd.f32 %v797_v63, %v781_v41 }
  0x99   : > { %v837_v6 = vmul.f32 %v2433_v8, %v2461_v54  ;;  %v1115_v7 = vmul.f32 %v2774_v33, %v2447_v35  ;;  %v864_v59 = vmul.f32 %v2818_v52, %v2239_v0  ;;  %v1121_v34 = vmul.f32 %v2830_v38, %v2447_v35 }
  0x9a   : > { %v2839_v62 = vmul.f32 %v2815_v16, %v2401_v58  ;;  %v872_v41 = vmul.f32 %v2821_v18, %v2424_v5  ;;  %v811_v8 = vadd.f32 %v807_v1, %v791_v3  ;;  %672 = vrot.lane.b32.xlu1 %v2597_v48, %s2166_s8  ;;  %v821_v15 = vadd.f32 %v817_v36, %v801_v4 }
  0x9b   : > { %666 = vrot.lane.b32.xlu2 %v2679_v39, %s2166_s8  ;;  %v2854_v21 = vstv %s2684_s23  ;;  %v2857_v44 = vstv %s2695_s25  ;;  %v868_v63 = vsub.f32 %v2600_v30, %v864_v59  ;;  %v2869_v4 = vstv %s2703_s11  ;;  %s1194_s23 = sadd.f32 %s2760_s6, %s1193_s21  ;;  %s2168_s6 = smov 112  }
  0x9c   : > { %3813 = vst [vmem:[#allocation43_spill] sm:$0xff] %v2839_v62  ;;  %v831_v1 = vadd.f32 %v827_v2, %v811_v8  ;;  %v1127_v3 = vmul.f32 %v2854_v21, %v2449_v42  ;;  %v1137_v9 = vmul.f32 %v2857_v44, %v2449_v42  ;;  %v841_v36 = vadd.f32 %v837_v6, %v821_v15  ;;  %s2883_s25 = sld [smem:[#allocation4 + $0x2b]] }
  0x9d   : > { %3814 = vst [vmem:[#allocation44_spill] sm:$0xff] %v2854_v21  ;;  %v2872_v35 = vstv %s2711_s26  ;;  %v2875_v28 = vstv %s2728_s14  ;;  %v2878_v59 = vsub.f32 %v868_v63, %v872_v41  ;;  %v1147_v15 = vmul.f32 %v2869_v4, %v2451_v43  ;;  %s2896_s11 = sld [smem:[#allocation4 + $0xf]]  ;;  %s1522_s14 = smul.f32 %s2823_s13, %s2236_s29 }
  0x9e   : > { %3815 = vst [vmem:[#allocation45_spill] sm:$0xff] %v2857_v44  ;;  %v2881_v2 = vadd.f32 %v2671_v22, %v831_v1  ;;  %v1131_v8 = vadd.f32 %v1127_v3, %v1115_v7  ;;  %v1141_v42 = vadd.f32 %v1137_v9, %v1121_v34  ;;  %955 = vrot.lane.b32.xlu0 %v2839_v62, %s2165_s12  ;;  %v2905_v7 = vstv %s2736_s5  ;;  %s2910_s26 = sld [smem:[#allocation4 + $0x1f]]  ;;  %s1531_s5 = smul.f32 %s2845_s27, %s2236_s29 }
  0x9f   : > { %3816 = vst [vmem:[#allocation46_spill] sm:$0xff] %v2869_v4  ;;  %v2888_v6 = vadd.f32 %v2673_v23, %v841_v36  ;;  %v1157_v41 = vmul.f32 %v2872_v35, %v2451_v43  ;;  %v1167_v22 = vmul.f32 %v2875_v28, %v2453_v45  ;;  %v2900_v9 = vmul.f32 %v2878_v59, %v2401_v58  ;;  %s1523_s29 = sadd.f32 %s2866_s7, %s1522_s14 }
  0xa0   : > { %3817 = vst [vmem:[#allocation47_spill] sm:$0xff] %v2872_v35  ;;  %v863_v23 = vmul.f32 %v2881_v2, %v2239_v0  ;;  %v2908_v34 = vstv %s2833_s20  ;;  %v1151_v1 = vadd.f32 %v1147_v15, %v1131_v8  ;;  %v1177_v36 = vmul.f32 %v2905_v7, %v2453_v45 }
  0xa1   : > { %3818 = vst [vmem:[#allocation48_spill] sm:$0xff] %v2875_v28  ;;  %v871_v63 = vmul.f32 %v2888_v6, %v2424_v5  ;;  %v1161_v3 = vadd.f32 %v1157_v41, %v1141_v42  ;;  %v2919_v28 = vstv %s1194_s23  ;;  %v2922_v35 = vstv %s2776_s0 }
  0xa2   : > { %3819 = vst [vmem:[#allocation49_spill] sm:$0xff] %v2900_v9  ;;  %v867_v62 = vsub.f32 %v2457_v51, %v863_v23  ;;  %v2925_v4 = vstv %s2782_s1  ;;  %953 = vrot.lane.b32.xlu1 %v2900_v9, %s2165_s12  ;;  %v1171_v42 = vadd.f32 %v1167_v22, %v1151_v1  ;;  %v1452_v15 = vmul.f32 %v2922_v35, %v2589_v25  ;;  %s1532_s18 = sadd.f32 %s2883_s25, %s1531_s5 }
  0xa3   : > { %3820 = vst [vmem:[#allocation50_spill] sm:$0xff] %v2905_v7  ;;  %670 = vrot.lane.b32.xlu2 %v2748_v19, %s2166_s8  ;;  %v1181_v8 = vadd.f32 %v1177_v36, %v1161_v3  ;;  %v2936_v41 = vstv %s2796_s30  ;;  %v1458_v45 = vmul.f32 %v2925_v4, %v2589_v25  ;;  %v2945_v44 = vstv %s2801_s9 }
  0xa4   : > { %3821 = vst [vmem:[#allocation51_spill] sm:$0xff] %v2908_v34  ;;  %v2938_v23 = vsub.f32 %v867_v62, %v871_v63  ;;  %v1464_v7 = vmul.f32 %v2936_v41, %v2600_v30  ;;  %v2949_v22 = vadd.f32 %v2908_v34, %v1171_v42  ;;  %v1474_v62 = vmul.f32 %v2945_v44, %v2600_v30 }
  0xa5   : > { %3822 = vst [vmem:[#allocation52_spill] sm:$0xff] %v2919_v28  ;;  %v2952_v1 = vadd.f32 %v2919_v28, %v1181_v8  ;;  %v2957_v63 = vstv %s2813_s10  ;;  %v2966_v21 = vstv %s2859_s22  ;;  %v2981_v34 = vstv %s2910_s26 }
  0xa6   : > { %3823 = vst [vmem:[#allocation53_spill] sm:$0xff] %v2922_v35  ;;  %v2961_v3 = vmul.f32 %v2938_v23, %v2401_v58  ;;  %v1468_v36 = vadd.f32 %v1464_v7, %v1452_v15  ;;  %v1484_v25 = vmul.f32 %v2957_v63, %v2607_v56  ;;  %1008 = vrot.lane.b32.xlu0 %v2786_v55, %s2166_s8  ;;  %v2978_v15 = vstv %s2896_s11 }
  0xa7   : > { %3824 = vst [vmem:[#allocation54_spill] sm:$0xff] %v2925_v4  ;;  %v1203_v42 = vmul.f32 %v2949_v22, %v2239_v0  ;;  %v1211_v8 = vmul.f32 %v2952_v1, %v2424_v5  ;;  %v1478_v28 = vadd.f32 %v1474_v62, %v1458_v45  ;;  %v1494_v30 = vmul.f32 %v2966_v21, %v2607_v56 }
  0xa8   : > { %3825 = vst [vmem:[#allocation55_spill] sm:$0xff] %v2936_v41  ;;  %v1488_v7 = vadd.f32 %v1484_v25, %v1468_v36  ;;  %v2983_v38 = vstv %s1523_s29  ;;  %v2990_v45 = vstv %s1532_s18  ;;  %v1451_v25 = vmul.f32 %v2922_v35, %v2455_v46 }
  0xa9   : > { %3826 = vst [vmem:[#allocation56_spill] sm:$0xff] %v2949_v22  ;;  %v1207_v33 = vsub.f32 %v2451_v43, %v1203_v42  ;;  %v1498_v55 = vadd.f32 %v1494_v30, %v1478_v28  ;;  %v1504_v22 = vmul.f32 %v2978_v15, %v2610_v31  ;;  %v1457_v62 = vmul.f32 %v2925_v4, %v2455_v46 }
  0xaa   : > { %3827 = vst [vmem:[#allocation57_spill] sm:$0xff] %v2952_v1  ;;  %v1514_v1 = vmul.f32 %v2981_v34, %v2610_v31  ;;  %v1463_v36 = vmul.f32 %v2936_v41, %v2457_v51  ;;  %1010 = vrot.lane.b32.xlu1 %v2961_v3, %s2166_s8  ;;  %v1473_v35 = vmul.f32 %v2945_v44, %v2457_v51 }
  0xab   : > { %3828 = vst [vmem:[#allocation58_spill] sm:$0xff] %v2957_v63  ;;  %951 = vrot.lane.b32.xlu2 %v2961_v3, %s2165_s12  ;;  %v3002_v28 = vsub.f32 %v1207_v33, %v1211_v8  ;;  %v1508_v30 = vadd.f32 %v1504_v22, %v1488_v7  ;;  %v1483_v4 = vmul.f32 %v2957_v63, %v2459_v12  ;;  %v3835_v8 = vld [vmem:[#allocation15_spill] sm:$0xff] }
  0xac   : > { %3829 = vst [vmem:[#allocation59_spill] sm:$0xff] %v2961_v3  ;;  %v1518_v42 = vadd.f32 %v1514_v1, %v1498_v55  ;;  %v1467_v43 = vadd.f32 %v1463_v36, %v1451_v25  ;;  %v1493_v33 = vmul.f32 %v2966_v21, %v2459_v12  ;;  %v1477_v55 = vadd.f32 %v1473_v35, %v1457_v62  ;;  %v3837_v35 = vld [vmem:[#allocation17_spill] sm:$0xff] }
  0xad   : > { %3830 = vst [vmem:[#allocation60_spill] sm:$0xff] %v2966_v21  ;;  %v3010_v41 = vmul.f32 %v3002_v28, %v2401_v58  ;;  %v3013_v56 = vadd.f32 %v2983_v38, %v1508_v30  ;;  %v1503_v1 = vmul.f32 %v2978_v15, %v2461_v54  ;;  %v533_v7 = vadd.f32 %v2619_v57, %v3835_v8  ;;  %v3836_v30 = vld [vmem:[#allocation13_spill] sm:$0xff] }
  0xae   : > { %3831 = vst [vmem:[#allocation61_spill] sm:$0xff] %v2978_v15  ;;  %v3016_v3 = vadd.f32 %v2990_v45, %v1518_v42  ;;  %v1487_v22 = vadd.f32 %v1483_v4, %v1467_v43  ;;  %1012 = vrot.lane.b32.xlu0 %v2900_v9, %s2166_s8  ;;  %v1513_v36 = vmul.f32 %v2981_v34, %v2461_v54 }
  0xaf   : > { %3832 = vst [vmem:[#allocation62_spill] sm:$0xff] %v2981_v34  ;;  %v1540_v25 = vmul.f32 %v3013_v56, %v2239_v0  ;;  %v534_v42 = vadd.f32 %v2550_v50, %v3836_v30  ;;  %v535_v43 = vadd.f32 %v2682_v29, %v3837_v35  ;;  %v1497_v4 = vadd.f32 %v1493_v33, %v1477_v55 }
  0xb0   : > { %3833 = vst [vmem:[#allocation63_spill] sm:$0xff] %v3002_v28  ;;  %v1507_v62 = vadd.f32 %v1503_v1, %v1487_v22  ;;  %v3838_v28 = vld [vmem:[#allocation11_spill] sm:$0xff]  ;;  %v537_v15 = vand.u32 2147483647, %v533_v7  ;;  %v575_v34 = vsub.f32 %v2665_v61, %v3835_v8  ;;  %v576_v33 = vsub.f32 %v2604_v26, %v3836_v30 }
  0xb1   : > { %3834 = vst [vmem:[#allocation64_spill] sm:$0xff] %v3013_v56  ;;  %v536_v57 = vadd.f32 %v2519_v10, %v3838_v28  ;;  %v1544_v9 = vsub.f32 %v2610_v31, %v1540_v25  ;;  %v1548_v56 = vmul.f32 %v3016_v3, %v2424_v5  ;;  %v538_v21 = vand.u32 2147483647, %v534_v42 }
  0xb2   : > { %v1517_v50 = vadd.f32 %v1513_v36, %v1497_v4  ;;  %v3042_v63 = vadd.f32 %v2983_v38, %v1507_v62  ;;  %v539_v29 = vand.u32 2147483647, %v535_v43  ;;  %v577_v22 = vsub.f32 %v2730_v37, %v3837_v35  ;;  %v3839_v35 = vld [vmem:[#allocation21_spill] sm:$0xff]  ;;  %v3841_v43 = vld [vmem:[#allocation31_spill] sm:$0xff] }
  0xb3   : > { %1293 = vrot.lane.b32.xlu2 %v3010_v41, %s2165_s12  ;;  %v540_v10 = vand.u32 2147483647, %v536_v57  ;;  %v541_v55 = vadd.f32 %v538_v21, %v537_v15  ;;  %v578_v61 = vsub.f32 %v2583_v11, %v3838_v28  ;;  %v579_v7 = vand.u32 2147483647, %v575_v34 }
  0xb4   : > { %v3053_v1 = vadd.f32 %v2990_v45, %v1517_v50  ;;  %v1539_v8 = vmul.f32 %v3042_v63, %v2239_v0  ;;  %v580_v25 = vand.u32 2147483647, %v576_v33  ;;  %v3057_v26 = vsub.f32 %v1544_v9, %v1548_v56  ;;  %v3840_v9 = vld [vmem:[#allocation19_spill] sm:$0xff] }
  0xb5   : > { %v542_v36 = vadd.f32 %v541_v55, %v539_v29  ;;  %v581_v30 = vand.u32 2147483647, %v577_v22  ;;  %v582_v42 = vand.u32 2147483647, %v578_v61  ;;  %v554_v11 = vsub.f32 %v2622_v32, %v2484_v13  ;;  %v3842_v55 = vld [vmem:[#allocation16_spill] sm:$0xff] }
  0xb6   : > { %v1543_v21 = vsub.f32 %v2461_v54, %v1539_v8  ;;  %v1547_v37 = vmul.f32 %v3053_v1, %v2424_v5  ;;  %v583_v15 = vadd.f32 %v580_v25, %v579_v7  ;;  %v555_v34 = vsub.f32 %v2553_v53, %v3839_v35 }
  0xb7   : > { %v3064_v28 = vadd.f32 %v542_v36, %v540_v10  ;;  %v556_v56 = vsub.f32 %v2687_v24, %v2547_v49  ;;  %v557_v4 = vsub.f32 %v3841_v43, %v3840_v9  ;;  %v558_v50 = vand.u32 2147483647, %v554_v11 }
  0xb8   : > { %v3072_v62 = vsub.f32 %v1543_v21, %v1547_v37  ;;  %v584_v57 = vadd.f32 %v583_v15, %v581_v30  ;;  %v724_v29 = vrot.slane %v2679_v39, 7  ;;  %v3077_v13 = vmul.f32 %v3057_v26, %v2401_v58 }
  0xb9   : > { %v559_v32 = vand.u32 2147483647, %v555_v34  ;;  %v560_v33 = vand.u32 2147483647, %v556_v56  ;;  %v561_v10 = vand.u32 2147483647, %v557_v4  ;;  %v878_v22 = vadd.f32 %v2715_v14, %v3842_v55 }
  0xba   : > { %v3079_v53 = vadd.f32 %v584_v57, %v582_v42  ;;  %v725_v49 = vrot.slane %v2630_v17, 7  ;;  %v726_v24 = vrot.slane %v2748_v19, 7  ;;  %v3089_v61 = vmul.f32 %v3072_v62, %v2401_v58  ;;  %v3844_v42 = vld [vmem:[#allocation14_spill] sm:$0xff] }
  0xbb   : > { %1629 = vrot.lane.b32.xlu2 %v3077_v13, %s2165_s12  ;;  %v562_v8 = vadd.f32 %v559_v32, %v558_v50  ;;  %v728_v7 = vrot.slane %v2597_v48, 7  ;;  %v734_v25 = vsub.f32 %v2679_v39, %v724_v29  ;;  %v879_v21 = vadd.f32 %v2881_v2, %v3844_v42  ;;  %v3845_v14 = vld [vmem:[#allocation18_spill] sm:$0xff]  ;;  %v3846_v50 = vld [vmem:[#allocation12_spill] sm:$0xff] }
  0xbc   : > { %3843 = vst [vmem:[#allocation15_spill] sm:$0xff] %v3089_v61  ;;  %v727_v36 = vsel %vm723_vm2, %v724_v29, %v726_v24  ;;  %v735_v30 = vsub.f32 %v2630_v17, %v725_v49  ;;  %v880_v37 = vadd.f32 %v2818_v52, %v3845_v14  ;;  %v882_v43 = vand.u32 2147483647, %v878_v22 }
  0xbd   : > { %v563_v15 = vadd.f32 %v562_v8, %v560_v33  ;;  %v729_v11 = vsel %vm723_vm2, %v725_v49, %v728_v7  ;;  %v736_v35 = vsub.f32 %v2748_v19, %v727_v36  ;;  %v738_v34 = vand.u32 2147483647, %v734_v25  ;;  %v3847_v49 = vld [vmem:[#allocation27_spill] sm:$0xff]  ;;  %v3848_v36 = vld [vmem:[#allocation22_spill] sm:$0xff] }
  0xbe   : > { %v737_v56 = vsub.f32 %v2597_v48, %v729_v11  ;;  %v739_v9 = vand.u32 2147483647, %v735_v30  ;;  %v881_v2 = vadd.f32 %v2756_v60, %v3846_v50  ;;  %v883_v29 = vand.u32 2147483647, %v879_v21  ;;  %v3849_v11 = vld [vmem:[#allocation20_spill] sm:$0xff] }
  0xbf   : > { %v3102_v4 = vadd.f32 %v563_v15, %v561_v10  ;;  %v740_v57 = vand.u32 2147483647, %v736_v35  ;;  %v747_v52 = vrot.slane %v738_v34, 1  ;;  %v899_v24 = vsub.f32 %v2718_v40, %v3847_v49 }
  0xc0   : > { %v3106_v32 = vand.u32 2147483647, %v737_v56  ;;  %v750_v33 = vrot.slane %v739_v9, 1  ;;  %v884_v7 = vand.u32 2147483647, %v880_v37  ;;  %v886_v25 = vadd.f32 %v883_v29, %v882_v43 }
  0xc1   : > { %v748_v8 = vrot.slane %v740_v57, 1  ;;  %v900_v22 = vsub.f32 %v2888_v6, %v3848_v36  ;;  %v901_v30 = vsub.f32 %v2821_v18, %v2560_v20  ;;  %v903_v60 = vand.u32 2147483647, %v899_v24  ;;  %v3851_v24 = vld [vmem:[#allocation42_spill] sm:$0xff] }
  0xc2   : > { %v3762_v10 = vrot.slane %v3106_v32, 1  ;;  %v885_v21 = vand.u32 2147483647, %v881_v2  ;;  %v887_v15 = vadd.f32 %v886_v25, %v884_v7  ;;  %v902_v40 = vsub.f32 %v2769_v27, %v3849_v11  ;;  %v3850_v2 = vld [vmem:[#allocation40_spill] sm:$0xff] }
  0xc3   : > { %1686 = vrot.lane.b32.xlu2 %v3089_v61, %s2166_s8  ;;  %v904_v35 = vand.u32 2147483647, %v900_v22  ;;  %v749_v37 = vsel %vm746_vm3, %v747_v52, %v748_v8  ;;  %v3124_v34 = vsel %vm746_vm3, %v748_v8, 0.0  ;;  %v905_v18 = vand.u32 2147483647, %v901_v30 }
  0xc4   : > { %v752_v6 = vsel %vm746_vm3, %v750_v33, %v3762_v10  ;;  %v3126_v20 = vadd.f32 %v887_v15, %v885_v21  ;;  %v920_v9 = vsub.f32 %v2764_v47, %v3842_v55  ;;  %v921_v27 = vsub.f32 %v2938_v23, %v3844_v42  ;;  %v3852_v23 = vld [vmem:[#allocation44_spill] sm:$0xff] }
  0xc5   : > { %v907_v56 = vadd.f32 %v904_v35, %v903_v60  ;;  %v922_v43 = vsub.f32 %v2878_v59, %v3845_v14  ;;  %v923_v57 = vsub.f32 %v2815_v16, %v3846_v50  ;;  %v1113_v29 = vmul.f32 %v3850_v2, %v2455_v46  ;;  %v3853_v16 = vld [vmem:[#allocation45_spill] sm:$0xff]  ;;  %v3854_v50 = vld [vmem:[#allocation46_spill] sm:$0xff]  ;;  %v3855_v60 = vld [vmem:[#allocation47_spill] sm:$0xff] }
  0xc6   : > { %v906_v52 = vand.u32 2147483647, %v902_v40  ;;  %v924_v49 = vand.u32 2147483647, %v920_v9  ;;  %v1119_v8 = vmul.f32 %v3851_v24, %v2455_v46  ;;  %v757_v7 = vadd.f32 %v752_v6, %v749_v37  ;;  %v3856_v21 = vld [vmem:[#allocation48_spill] sm:$0xff]  ;;  %v3857_v40 = vld [vmem:[#allocation50_spill] sm:$0xff] }
  0xc7   : > { %v908_v33 = vadd.f32 %v907_v56, %v905_v18  ;;  %v925_v47 = vand.u32 2147483647, %v921_v27  ;;  %v926_v55 = vand.u32 2147483647, %v922_v43  ;;  %v1125_v42 = vmul.f32 %v3852_v23, %v2457_v51  ;;  %v3858_v37 = vld [vmem:[#allocation29_spill] sm:$0xff]  ;;  %v3859_v9 = vld [vmem:[#allocation30_spill] sm:$0xff] }
  0xc8   : > { %v927_v59 = vand.u32 2147483647, %v923_v57  ;;  %v1135_v14 = vmul.f32 %v3853_v16, %v2457_v51  ;;  %v1145_v36 = vmul.f32 %v3854_v50, %v2459_v12  ;;  %v1155_v46 = vmul.f32 %v3855_v60, %v2459_v12 }
  0xc9   : > { %v3142_v25 = vadd.f32 %v908_v33, %v906_v52  ;;  %v928_v22 = vadd.f32 %v925_v47, %v924_v49  ;;  %v1129_v30 = vadd.f32 %v1125_v42, %v1113_v29  ;;  %v1165_v15 = vmul.f32 %v3856_v21, %v2461_v54  ;;  %v3860_v29 = vld [vmem:[#allocation32_spill] sm:$0xff]  ;;  %v3861_v33 = vld [vmem:[#allocation33_spill] sm:$0xff] }
  0xca   : > { %v1139_v11 = vadd.f32 %v1135_v14, %v1119_v8  ;;  %v1175_v35 = vmul.f32 %v3857_v40, %v2461_v54  ;;  %v1112_v6 = vmul.f32 %v3850_v2, %v3858_v37  ;;  %v1118_v51 = vmul.f32 %v3851_v24, %v3858_v37 }
  0xcb   : > { %v929_v18 = vadd.f32 %v928_v22, %v926_v55  ;;  %v1149_v56 = vadd.f32 %v1145_v36, %v1129_v30  ;;  %v1124_v27 = vmul.f32 %v3852_v23, %v3859_v9  ;;  %v1134_v43 = vmul.f32 %v3853_v16, %v3859_v9  ;;  %v3862_v22 = vld [vmem:[#allocation36_spill] sm:$0xff] }
  0xcc   : > { %v1159_v57 = vadd.f32 %v1155_v46, %v1139_v11  ;;  %v1144_v52 = vmul.f32 %v3854_v50, %v3860_v29  ;;  %v1154_v54 = vmul.f32 %v3855_v60, %v3860_v29  ;;  %v1164_v49 = vmul.f32 %v3856_v21, %v3861_v33  ;;  %v3863_v11 = vld [vmem:[#allocation51_spill] sm:$0xff] }
  0xcd   : > { %v3168_v8 = vadd.f32 %v929_v18, %v927_v59  ;;  %v1169_v47 = vadd.f32 %v1165_v15, %v1149_v56  ;;  %v1128_v55 = vadd.f32 %v1124_v27, %v1112_v6  ;;  %v1138_v42 = vadd.f32 %v1134_v43, %v1118_v51  ;;  %v3864_v59 = vld [vmem:[#allocation37_spill] sm:$0xff]  ;;  %v3865_v6 = vld [vmem:[#allocation52_spill] sm:$0xff]  ;;  %v3866_v18 = vld [vmem:[#allocation38_spill] sm:$0xff] }
  0xce   : > { %v1179_v14 = vadd.f32 %v1175_v35, %v1159_v57  ;;  %v1174_v36 = vmul.f32 %v3857_v40, %v3861_v33  ;;  %v1114_v30 = vmul.f32 %v3850_v2, %v3862_v22  ;;  %v1120_v46 = vmul.f32 %v3851_v24, %v3862_v22 }
  0xcf   : > { %v3177_v10 = vadd.f32 %v3863_v11, %v1169_v47  ;;  %v1148_v17 = vadd.f32 %v1144_v52, %v1128_v55  ;;  %v1158_v61 = vadd.f32 %v1154_v54, %v1138_v42  ;;  %v1126_v15 = vmul.f32 %v3852_v23, %v3864_v59  ;;  %v3868_v42 = vld [vmem:[#allocation54_spill] sm:$0xff] }
  0xd0   : > { %v3182_v51 = vadd.f32 %v3865_v6, %v1179_v14  ;;  %v1136_v35 = vmul.f32 %v3853_v16, %v3864_v59  ;;  %v1146_v2 = vmul.f32 %v3854_v50, %v3866_v18  ;;  %v1156_v24 = vmul.f32 %v3855_v60, %v3866_v18  ;;  %v3869_v14 = vld [vmem:[#allocation55_spill] sm:$0xff]  ;;  %v3870_v59 = vld [vmem:[#allocation58_spill] sm:$0xff] }
  0xd1   : > { %v1201_v56 = vmul.f32 %v3177_v10, %v2239_v0  ;;  %v1168_v27 = vadd.f32 %v1164_v49, %v1148_v17  ;;  %v1178_v43 = vadd.f32 %v1174_v36, %v1158_v61  ;;  %v1130_v57 = vadd.f32 %v1126_v15, %v1114_v30  ;;  %v3867_v49 = vld [vmem:[#allocation53_spill] sm:$0xff] }
  0xd2   : > { %v1209_v23 = vmul.f32 %v3182_v51, %v2424_v5  ;;  %v1140_v52 = vadd.f32 %v1136_v35, %v1120_v46  ;;  %v1166_v54 = vmul.f32 %v3856_v21, %v2610_v31  ;;  %v1176_v16 = vmul.f32 %v3857_v40, %v2610_v31 }
  0xd3   : > { %v1205_v50 = vsub.f32 %v2459_v12, %v1201_v56  ;;  %v3200_v60 = vadd.f32 %v3863_v11, %v1168_v27  ;;  %v1196_v47 = vadd.f32 %v3865_v6, %v1178_v43  ;;  %v1150_v17 = vadd.f32 %v1146_v2, %v1130_v57  ;;  %v3872_v27 = vld [vmem:[#allocation60_spill] sm:$0xff] }
  0xd4   : > { %586 = vadd.xlane.f32.xlu1 %v3079_v53  ;;  %v1160_v61 = vadd.f32 %v1156_v24, %v1140_v52  ;;  %v1450_v55 = vmul.f32 %v3867_v49, %v3858_v37  ;;  %v1456_v21 = vmul.f32 %v3868_v42, %v3858_v37  ;;  %v1462_v31 = vmul.f32 %v3869_v14, %v3859_v9  ;;  %v3873_v52 = vld [vmem:[#allocation61_spill] sm:$0xff] }
  0xd5   : > { %v759_v12 = vadd.f32 %v3124_v34, %v757_v7  ;;  %v3211_v40 = vsub.f32 %v1205_v50, %v1209_v23  ;;  %v1200_v36 = vmul.f32 %v3200_v60, %v2239_v0  ;;  %v1170_v22 = vadd.f32 %v1166_v54, %v1150_v17  ;;  %v3875_v50 = vld [vmem:[#allocation23_spill] sm:$0xff] }
  0xd6   : > { %v1180_v30 = vadd.f32 %v1176_v16, %v1160_v61  ;;  %v1466_v53 = vadd.f32 %v1462_v31, %v1450_v55  ;;  %v1472_v46 = vmul.f32 %v2945_v44, %v3859_v9  ;;  %v1482_v15 = vmul.f32 %v3870_v59, %v3860_v29  ;;  %v3874_v16 = vld [vmem:[#allocation62_spill] sm:$0xff] }
  0xd7   : > { %v3871_v37 = vrot.slane %v3106_v32, 1  ;;  %v1204_v34 = vsub.f32 %v3860_v29, %v1200_v36  ;;  %v1208_v7 = vmul.f32 %v1196_v47, %v2424_v5  ;;  %v3225_v2 = vadd.f32 %v3863_v11, %v1170_v22  ;;  %v3877_v22 = vld [vmem:[#allocation25_spill] sm:$0xff] }
  0xd8   : > { %544 = vadd.xlane.f32.xlu0 %v3064_v28  ;;  %v1198_v24 = vadd.f32 %v3865_v6, %v1180_v30  ;;  %v1476_v56 = vadd.f32 %v1472_v46, %v1456_v21  ;;  %v1486_v9 = vadd.f32 %v1482_v15, %v1466_v53  ;;  %v1492_v43 = vmul.f32 %v3872_v27, %v3860_v29  ;;  %v3876_v21 = vld [vmem:[#allocation24_spill] sm:$0xff]  ;;  %v3878_v15 = vld [vmem:[#allocation26_spill] sm:$0xff] }
  0xd9   : > { %v760_v35 = vsel %vm746_vm3, %v3871_v37, 0.0  ;;  %v3231_v32 = vsub.f32 %v1204_v34, %v1208_v7  ;;  %v1202_v23 = vmul.f32 %v3225_v2, %v2239_v0  ;;  %v1502_v54 = vmul.f32 %v3873_v52, %v3861_v33 }
  0xda   : > { %v761_v57 = vadd.f32 %v760_v35, %v759_v12  ;;  %v1496_v11 = vadd.f32 %v1492_v43, %v1476_v56  ;;  %v1512_v28 = vmul.f32 %v3874_v16, %v3861_v33  ;;  %v1453_v6 = vmul.f32 %v3867_v49, %v3875_v50  ;;  %v3879_v35 = vld [vmem:[#allocation28_spill] sm:$0xff] }
  0xdb   : > { %v1459_v17 = vmul.f32 %v3868_v42, %v3875_v50  ;;  %v1206_v29 = vsub.f32 %v3866_v18, %v1202_v23  ;;  %v1210_v61 = vmul.f32 %v1198_v24, %v2424_v5  ;;  %v1506_v55 = vadd.f32 %v1502_v54, %v1486_v9  ;;  %v2088_v56 = vld [vmem:[%s2333_s24 + $0x48] sm:$0xff]  ;;  %v2089_v54 = vld [vmem:[%s2333_s24 + $0x58] sm:$0xff] }
  0xdc   : > { %v1465_v31 = vmul.f32 %v3869_v14, %v3876_v21  ;;  %762 = vadd.xlane.f32.xlu1 %v761_v57  ;;  %v1516_v12 = vadd.f32 %v1512_v28, %v1496_v11  ;;  %v1475_v36 = vmul.f32 %v2945_v44, %v3876_v21  ;;  %v1485_v49 = vmul.f32 %v3870_v59, %v3877_v22  ;;  %v3880_v57 = vld [vmem:[#allocation34_spill] sm:$0xff] }
  0xdd   : > { %v3251_v30 = vsub.f32 %v1206_v29, %v1210_v61  ;;  %v1525_v42 = vadd.f32 %v2983_v38, %v1506_v55  ;;  %v1495_v53 = vmul.f32 %v3872_v27, %v3877_v22  ;;  %v1505_v37 = vmul.f32 %v3873_v52, %v3878_v15  ;;  %v3881_v52 = vld [vmem:[#allocation57_spill] sm:$0xff]  ;;  %v2091_v22 = vld [vmem:[%s2333_s24 + $0x68] sm:$0xff] }
  0xde   : > { %v1469_v18 = vadd.f32 %v1465_v31, %v1453_v6  ;;  %v1534_v14 = vadd.f32 %v2990_v45, %v1516_v12  ;;  %v1479_v46 = vadd.f32 %v1475_v36, %v1459_v17  ;;  %v1237_v44 = vsub.f32 %v1196_v47, %v3879_v35  ;;  %v2090_v36 = vld [vmem:[%s2333_s24 + $0x60] sm:$0xff] }
  0xdf   : > { %v1538_v34 = vmul.f32 %v1525_v42, %v2239_v0  ;;  %v1515_v7 = vmul.f32 %v3874_v16, %v3878_v15  ;;  %v1238_v9 = vsub.f32 %v3182_v51, %v2088_v56  ;;  %v1239_v23 = vsub.f32 %v1198_v24, %v3880_v57  ;;  %v2093_v35 = vld [vmem:[%s2282_s28 + $0x60] sm:$0xff]  ;;  %v3883_v56 = vld [vmem:[#allocation64_spill] sm:$0xff] }
  0xe0   : > { %v1489_v59 = vadd.f32 %v1485_v49, %v1469_v18  ;;  %565 = vadd.xlane.f32.xlu0 %v3102_v4  ;;  %v1546_v27 = vmul.f32 %v1534_v14, %v2424_v5  ;;  %v1499_v43 = vadd.f32 %v1495_v53, %v1479_v46  ;;  %v1240_v11 = vsub.f32 %v3881_v52, %v2089_v54  ;;  %v2092_v53 = vld [vmem:[%s2333_s24 + $0x78] sm:$0xff]  ;;  %v2097_v54 = vld [vmem:[%s2282_s28 + $0x40] sm:$0xff]  ;;  %v2098_v52 = vld [vmem:[%s2282_s28 + $0x48] sm:$0xff]  ;;  %s2167_s24 = smov 127  }
  0xe1   : > { %v1542_v47 = vsub.f32 %v3861_v33, %v1538_v34  ;;  %v1241_v50 = vand.u32 2147483647, %v1237_v44  ;;  %v1242_v6 = vand.u32 2147483647, %v1238_v9  ;;  %v1243_v51 = vand.u32 2147483647, %v1239_v23 }
  0xe2   : > { %v1509_v28 = vadd.f32 %v1505_v37, %v1489_v59  ;;  %v1519_v16 = vadd.f32 %v1515_v7, %v1499_v43  ;;  %v1244_v55 = vand.u32 2147483647, %v1240_v11  ;;  %v2095_v7 = vld [vmem:[%s2282_s28 + $0x70] sm:$0xff]  ;;  %v2096_v43 = vld [vmem:[%s2282_s28 + $0x78] sm:$0xff]  ;;  %v1217_v11 = vadd.f32 %v2098_v52, %v3177_v10 }
  0xe3   : > { %v3271_v17 = vsub.f32 %v1542_v47, %v1546_v27  ;;  %v1245_v29 = vadd.f32 %v1242_v6, %v1241_v50  ;;  %v2099_v47 = vld [vmem:[%s2282_s28 + $0x50] sm:$0xff] }
  0xe4   : > { %v1528_v4 = vadd.f32 %v2983_v38, %v1509_v28  ;;  %v1537_v24 = vadd.f32 %v2990_v45, %v1519_v16  ;;  %v1575_v38 = vsub.f32 %v1534_v14, %v2090_v36  ;;  %v1576_v45 = vsub.f32 %v3053_v1, %v2091_v22  ;;  %v2094_v1 = vld [vmem:[%s2282_s28 + $0x68] sm:$0xff]  ;;  %v608_v28 = vpop.permute.xlu2 %607 }
  0xe5   : > { %v1246_v21 = vadd.f32 %v1245_v29, %v1243_v51  ;;  %v1554_v14 = vadd.f32 %v2093_v35, %v1525_v42  ;;  %v1555_v59 = vadd.f32 %v2094_v1, %v3042_v63  ;;  %v1216_v42 = vadd.f32 %v2097_v54, %v3200_v60 }
  0xe6   : > { %v1541_v61 = vmul.f32 %v1528_v4, %v2239_v0  ;;  %v1549_v31 = vmul.f32 %v1537_v24, %v2424_v5  ;;  %v3882_v0 = vld [vmem:[#allocation35_spill] sm:$0xff]  ;;  %v1578_v46 = vsub.f32 %v1537_v24, %v2092_v53  ;;  %v1579_v5 = vand.u32 2147483647, %v1575_v38 }
  0xe7   : > { %v3278_v12 = vadd.f32 %v1246_v21, %v1244_v55  ;;  %v1577_v18 = vsub.f32 %v3016_v3, %v3882_v0  ;;  %v1556_v3 = vadd.f32 %v2095_v7, %v3883_v56  ;;  %v1558_v9 = vand.u32 2147483647, %v1554_v14 }
  0xe8   : > { %v1545_v33 = vsub.f32 %v3878_v15, %v1541_v61  ;;  %889 = vadd.xlane.f32.xlu0 %v3126_v20  ;;  %v1580_v15 = vand.u32 2147483647, %v1576_v45  ;;  %v1582_v44 = vand.u32 2147483647, %v1578_v46  ;;  %v1557_v57 = vadd.f32 %v2096_v43, %v1528_v4  ;;  %v3884_v61 = vld [vmem:[#allocation43_spill] sm:$0xff] }
  0xe9   : > { %v1581_v37 = vand.u32 2147483647, %v1577_v18  ;;  %v1559_v23 = vand.u32 2147483647, %v1555_v59  ;;  %v1218_v63 = vadd.f32 %v2099_v47, %v3225_v2  ;;  %v1560_v50 = vand.u32 2147483647, %v1556_v3 }
  0xea   : > { %v3284_v49 = vsub.f32 %v1545_v33, %v1549_v31  ;;  %v1583_v20 = vadd.f32 %v1580_v15, %v1579_v5  ;;  %v1220_v16 = vand.u32 2147483647, %v1216_v42  ;;  %v1221_v51 = vand.u32 2147483647, %v1217_v11 }
  0xeb   : > { %v1562_v6 = vadd.f32 %v1559_v23, %v1558_v9  ;;  %v1561_v29 = vand.u32 2147483647, %v1557_v57  ;;  %v1259_v4 = vsub.f32 %v3211_v40, %v2098_v52  ;;  %v1222_v60 = vand.u32 2147483647, %v1218_v63  ;;  %v3886_v63 = vld [vmem:[#allocation39_spill] sm:$0xff] }
  0xec   : > { %v1584_v34 = vadd.f32 %v1583_v20, %v1581_v37  ;;  %v1224_v55 = vadd.f32 %v1221_v51, %v1220_v16  ;;  %v1260_v10 = vsub.f32 %v3251_v30, %v2099_v47  ;;  %v3318_v45 = vmul.f32 %v3211_v40, %v2401_v58  ;;  %v3885_v47 = vld [vmem:[#allocation15_spill] sm:$0xff] }
  0xed   : > { %v1563_v24 = vadd.f32 %v1562_v6, %v1560_v50  ;;  %v1263_v33 = vand.u32 2147483647, %v1259_v4  ;;  %v610_v0 = vpop.permute.xlu2 %609  ;;  %v1596_v53 = vsub.f32 %v3271_v17, %v2093_v35  ;;  %v1598_v37 = vsub.f32 %v3057_v26, %v2095_v7 }
  0xee   : > { %v3295_v27 = vadd.f32 %v1584_v34, %v1582_v44  ;;  %v3311_v31 = vadd.f32 %v1224_v55, %v1222_v60  ;;  %v1264_v36 = vand.u32 2147483647, %v1260_v10  ;;  %v1599_v40 = vsub.f32 %v3284_v49, %v2096_v43  ;;  %v3887_v60 = vld [vmem:[#allocation41_spill] sm:$0xff] }
  0xef   : > { %v3309_v21 = vadd.f32 %v1563_v24, %v1561_v29  ;;  %v1600_v20 = vand.u32 2147483647, %v1596_v53  ;;  %v622_v14 = vsub.f32 %v2748_v19, %v610_v0  ;;  %v3334_v44 = vmul.f32 %v3231_v32, %v2401_v58  ;;  %v3889_v53 = vld [vmem:[#allocation59_spill] sm:$0xff] }
  0xf0   : > { %910 = vadd.xlane.f32.xlu0 %v3142_v25  ;;  %v1258_v25 = vsub.f32 %v3231_v32, %v2097_v54  ;;  %v1602_v34 = vand.u32 2147483647, %v1598_v37  ;;  %v3344_v9 = vmul.f32 %v3251_v30, %v2401_v58  ;;  %v3363_v54 = vmul.f32 %v3284_v49, %v2401_v58 }
  0xf1   : > { %v626_v7 = vand.u32 2147483647, %v622_v14 }
  0xf2   : > { %v1262_v2 = vand.u32 2147483647, %v1258_v25  ;;  %v612_v23 = vpop.permute.xlu0 %611 }
  0xf4   : > { %v1266_v38 = vadd.f32 %v1263_v33, %v1262_v2 }
  0xf5   : > { %1014 = vrot.lane.b32.xlu1 %v3884_v61, %s2166_s8 }
  0xf6   : > { %v3314_v22 = vadd.f32 %v1266_v38, %v1264_v36 }
  0xf8   : > { %931 = vadd.xlane.f32.xlu0 %v3168_v8  ;;  %v1597_v8 = vsub.f32 %v3072_v62, %v2094_v1  ;;  %v1603_v62 = vand.u32 2147483647, %v1599_v40  ;;  %v667_v1 = vpop.permute.xlu2 %666 }
  0xf9   : > { %v681_v3 = vsub.f32 %v2679_v39, %v667_v1 }
  0xfa   : > { %v1601_v35 = vand.u32 2147483647, %v1597_v8 }
  0xfb   : > { %v685_v32 = vand.u32 2147483647, %v681_v3 }
  0xfc   : > { %v606_v18 = vpop.permute.xlu1 %605  ;;  %v1604_v59 = vadd.f32 %v1601_v35, %v1600_v20 }
  0xfd   : > { %v3322_v46 = vsel %vm613_vm4, %v606_v18, %v608_v28  ;;  %v620_v5 = vsub.f32 %v2679_v39, %v606_v18  ;;  %1289 = vrot.lane.b32.xlu1 %v3318_v45, %s2165_s12  ;;  %v3354_v39 = vmul.f32 %v3271_v17, %v2401_v58  ;;  %v615_v17 = vsel %vm613_vm4, %v610_v0, %v612_v23  ;;  %v3888_v0 = vld [vmem:[#allocation49_spill] sm:$0xff] }
  0xfe   : > { %v1605_v26 = vadd.f32 %v1604_v59, %v1602_v34  ;;  %v623_v58 = vsub.f32 %v2597_v48, %v615_v17 }
  0xff   : > { %v624_v15 = vand.u32 2147483647, %v620_v5 }
 0x100   : > { %v3338_v56 = vadd.f32 %v1605_v26, %v1603_v62  ;;  %v671_v43 = vpop.permute.xlu2 %670  ;;  %v627_v49 = vand.u32 2147483647, %v623_v58 }
 0x101   : > { %632 = vrot.lane.b32.xlu2 %v624_v15, %s2167_s24  ;;  %v683_v57 = vsub.f32 %v2748_v19, %v671_v43 }
 0x103   : > { %v687_v30 = vand.u32 2147483647, %v683_v57 }
 0x104   : > { %v669_v19 = vpop.permute.xlu1 %668 }
 0x105   : > { %1346 = vrot.lane.b32.xlu1 %v3334_v44, %s2166_s8  ;;  %v675_v52 = vsel %vm674_vm5, %v667_v1, %v669_v19 }
 0x106   : > { %v682_v28 = vsub.f32 %v3886_v63, %v675_v52 }
 0x108   : > { %v3372_v42 = vpop.permute.xlu0 %949  ;;  %v686_v6 = vand.u32 2147483647, %v682_v28 }
 0x109   : > { %636 = vrot.lane.b32.xlu2 %v626_v7, %s2167_s24  ;;  %v963_v55 = vsub.f32 %v3887_v60, %v3372_v42 }
 0x10b   : > { %v967_v33 = vand.u32 2147483647, %v963_v55 }
 0x10c   : > { %1287 = vrot.lane.b32.xlu0 %v3334_v44, %s2165_s12  ;;  %v673_v11 = vpop.permute.xlu1 %672 }
 0x10d   : > { %1350 = vrot.lane.b32.xlu1 %v3344_v9, %s2166_s8  ;;  %v676_v16 = vsel %vm674_vm5, %v671_v43, %v673_v11 }
 0x10e   : > { %v684_v25 = vsub.f32 %v2597_v48, %v676_v16 }
 0x110   : > { %v956_v50 = vpop.permute.xlu0 %955  ;;  %v688_v24 = vand.u32 2147483647, %v684_v25 }
 0x111   : > { %693 = vrot.lane.b32.xlu2 %v685_v32, %s2168_s6 }
 0x114   : > { %1291 = vrot.lane.b32.xlu0 %v3344_v9, %s2165_s12  ;;  %v954_v51 = vpop.permute.xlu1 %953 }
 0x115   : > { %1625 = vrot.lane.b32.xlu1 %v3354_v39, %s2165_s12  ;;  %v958_v4 = vsel %vm613_vm4, %v954_v51, %v956_v50  ;;  %v965_v18 = vsub.f32 %v3888_v0, %v954_v51 }
 0x116   : > { %v966_v10 = vsub.f32 %v3884_v61, %v958_v4 }
 0x117   : > { %v969_v15 = vand.u32 2147483647, %v965_v18 }
 0x118   : > { %v1009_v29 = vpop.permute.xlu0 %1008  ;;  %v970_v36 = vand.u32 2147483647, %v966_v10 }
 0x119   : > { %697 = vrot.lane.b32.xlu2 %v687_v30, %s2168_s6  ;;  %v1022_v14 = vsub.f32 %v3887_v60, %v1009_v29 }
 0x11b   : > { %v1026_v26 = vand.u32 2147483647, %v1022_v14 }
 0x11c   : > { %1348 = vrot.lane.b32.xlu0 %v3318_v45, %s2166_s8  ;;  %v1011_v2 = vpop.permute.xlu1 %1010 }
 0x11d   : > { %1631 = vrot.lane.b32.xlu1 %v3363_v54, %s2165_s12  ;;  %v1016_v48 = vsel %vm674_vm5, %v1009_v29, %v1011_v2 }
 0x11e   : > { %v1023_v5 = vsub.f32 %v3889_v53, %v1016_v48 }
 0x120   : > { %v1013_v38 = vpop.permute.xlu0 %1012  ;;  %v1027_v37 = vand.u32 2147483647, %v1023_v5 }
 0x121   : > { %v1024_v57 = vsub.f32 %v3888_v0, %v1013_v38 }
 0x123   : > { %v1028_v58 = vand.u32 2147483647, %v1024_v57 }
 0x124   : > { %1352 = vrot.lane.b32.xlu0 %v3010_v41, %s2166_s8 }
 0x125   : > { %1688 = vrot.lane.b32.xlu1 %v3077_v13, %s2166_s8 }
 0x12c   : > { %1627 = vrot.lane.b32.xlu0 %v3885_v47, %s2165_s12 }
 0x12d   : > { %638 = vrot.lane.b32.xlu1 %v627_v49, %s2167_s24 }
 0x134   : > { %1684 = vrot.lane.b32.xlu0 %v3354_v39, %s2166_s8 }
 0x135   : > { %695 = vrot.lane.b32.xlu1 %v686_v6, %s2168_s6 }
 0x13c   : > { %1690 = vrot.lane.b32.xlu0 %v3363_v54, %s2166_s8 }
 0x13d   : > { %699 = vrot.lane.b32.xlu1 %v688_v24, %s2168_s6 }
 0x144   : > { %975 = vrot.lane.b32.xlu0 %v967_v33, %s2167_s24 }
 0x145   : > { %981 = vrot.lane.b32.xlu1 %v970_v36, %s2167_s24 }
 0x147   : > { %v587_v8 = vpop.xlane.xlu1 %586 }
 0x148   : > { %v588_v40 = vrot.slane %v587_v8, 4 }
 0x14a   : > { %v589_v59 = vadd.f32 %v588_v40, %v587_v8 }
 0x14b   : > { %v545_v20 = vpop.xlane.xlu0 %544 }
 0x14c   : > { %v546_v35 = vrot.slane %v545_v20, 4  ;;  %979 = vrot.lane.b32.xlu0 %v969_v15, %s2167_s24  ;;  %v590_v7 = vrot.slane %v589_v59, 2  ;;  %v621_v15 = vsub.f32 %v3886_v63, %v3322_v46 }
 0x14d   : > { %1036 = vrot.lane.b32.xlu1 %v1027_v37, %s2168_s6  ;;  %v952_v37 = vpop.permute.xlu2 %951 }
 0x14e   : > { %v547_v34 = vadd.f32 %v546_v35, %v545_v20  ;;  %v591_v19 = vadd.f32 %v590_v7, %v589_v59  ;;  %v625_v14 = vand.u32 2147483647, %v621_v15  ;;  %v957_v59 = vsel %vm613_vm4, %v3372_v42, %v952_v37 }
 0x14f   : > { %v3405_v50 = vpop.xlane.xlu1 %762  ;;  %v964_v46 = vsub.f32 %v3889_v53, %v957_v59 }
 0x150   : > { %v548_v62 = vrot.slane %v547_v34, 2  ;;  %v592_v52 = vrot.slane %v591_v19, 1 }
 0x152   : > { %v549_v1 = vadd.f32 %v548_v62, %v547_v34  ;;  %v593_v6 = vadd.f32 %v592_v52, %v591_v19 }
 0x153   : > { %v566_v3 = vpop.xlane.xlu0 %565 }
 0x154   : > { %v567_v32 = vrot.slane %v566_v3, 4  ;;  %1034 = vrot.lane.b32.xlu0 %v1026_v26, %s2168_s6  ;;  %v550_v43 = vrot.slane %v549_v1, 1 }
 0x155   : > { %v1294_v7 = vpop.permute.xlu2 %1293 }
 0x156   : > { %v568_v30 = vadd.f32 %v567_v32, %v566_v3  ;;  %v551_v23 = vadd.f32 %v550_v43, %v549_v1  ;;  %v968_v32 = vand.u32 2147483647, %v964_v46 }
 0x158   : > { %v569_v17 = vrot.slane %v568_v30, 2  ;;  %1988 = vpush %v551_v23 }
 0x15a   : > { %v570_v49 = vadd.f32 %v569_v17, %v568_v30 }
 0x15b   : > { %v3407_v16 = vpop.xlane.xlu0 %889 }
 0x15c   : > { %1038 = vrot.lane.b32.xlu0 %v1028_v58, %s2168_s6  ;;  %v571_v11 = vrot.slane %v570_v49, 1 }
 0x15e   : > { %v572_v28 = vadd.f32 %v571_v11, %v570_v49  ;;  %v1630_v49 = vpop.permute.xlu2 %1629 }
 0x160   : > { %1990 = vpush %v572_v28 }
 0x161   : > { %1992 = vpush %v593_v6 }
 0x163   : > { %v3411_v4 = vpop.xlane.xlu0 %910 }
 0x167   : > { %v1015_v51 = vpop.permute.xlu1 %1014 }
 0x168   : > { %v1017_v25 = vsel %vm674_vm5, %v1013_v38, %v1015_v51 }
 0x169   : > { %v1025_v29 = vsub.f32 %v3884_v61, %v1017_v25  ;;  %v1641_v25 = vsub.f32 %v3077_v13, %v1630_v49 }
 0x16b   : > { %v1029_v24 = vand.u32 2147483647, %v1025_v29  ;;  %v3414_v10 = vpop.xlane.xlu0 %931 }
 0x16d   : > { %1040 = vrot.lane.b32.xlu1 %v1029_v24, %s2168_s6 }
 0x16f   : > { %v1290_v55 = vpop.permute.xlu1 %1289 }
 0x177   : > { %v1347_v2 = vpop.permute.xlu1 %1346 }
 0x178   : > { %v1360_v20 = vsub.f32 %v3334_v44, %v1347_v2 }
 0x17a   : > { %v1364_v62 = vand.u32 2147483647, %v1360_v20 }
 0x17e   : > { %v1288_v33 = vpop.permute.xlu0 %1287 }
 0x17f   : > { %v1295_v36 = vsel %vm613_vm4, %v1288_v33, %v1290_v55  ;;  %v1301_v48 = vsub.f32 %v3334_v44, %v1288_v33  ;;  %v1351_v8 = vpop.permute.xlu1 %1350 }
 0x180   : > { %v1302_v18 = vsub.f32 %v3318_v45, %v1295_v36  ;;  %v1362_v42 = vsub.f32 %v3344_v9, %v1351_v8 }
 0x181   : > { %v1305_v5 = vand.u32 2147483647, %v1301_v48  ;;  %v1687_v48 = vpop.permute.xlu2 %1686 }
 0x182   : > { %v1306_v38 = vand.u32 2147483647, %v1302_v18  ;;  %v1366_v58 = vand.u32 2147483647, %v1362_v42 }
 0x183   : > { %1313 = vrot.lane.b32.xlu2 %v1305_v5, %s2167_s24 }
 0x184   : > { %1315 = vrot.lane.b32.xlu1 %v1306_v38, %s2167_s24 }
 0x186   : > { %v1292_v40 = vpop.permute.xlu0 %1291 }
 0x187   : > { %v1303_v35 = vsub.f32 %v3344_v9, %v1292_v40  ;;  %v1626_v63 = vpop.permute.xlu1 %1625  ;;  %v1296_v52 = vsel %vm613_vm4, %v1292_v40, %v1294_v7  ;;  %v1065_v7 = vrot.slane %v3888_v0, 7 }
 0x188   : > { %v1639_v57 = vsub.f32 %v3354_v39, %v1626_v63  ;;  %v1304_v51 = vsub.f32 %v3010_v41, %v1296_v52 }
 0x189   : > { %v1307_v34 = vand.u32 2147483647, %v1303_v35 }
 0x18a   : > { %v1643_v11 = vand.u32 2147483647, %v1639_v57  ;;  %v1308_v55 = vand.u32 2147483647, %v1304_v51 }
 0x18b   : > { %634 = vrot.lane.b32.xlu2 %v625_v14, %s2167_s24  ;;  %1317 = vrot.lane.b32.xlu0 %v1307_v34, %s2167_s24 }
 0x18c   : > { %1372 = vrot.lane.b32.xlu1 %v1364_v62, %s2168_s6 }
 0x18e   : > { %v1349_v26 = vpop.permute.xlu0 %1348 }
 0x18f   : > { %v1354_v1 = vsel %vm674_vm5, %v1347_v2, %v1349_v26  ;;  %v1632_v19 = vpop.permute.xlu1 %1631  ;;  %v1645_v2 = vand.u32 2147483647, %v1641_v25  ;;  %v1063_v26 = vrot.slane %v3887_v60, 7 }
 0x190   : > { %v1361_v3 = vsub.f32 %v3318_v45, %v1354_v1  ;;  %v1634_v6 = vsel %vm613_vm4, %v1630_v49, %v1632_v19  ;;  %v1064_v1 = vrot.slane %v3889_v53, 7 }
 0x191   : > { %v1642_v29 = vsub.f32 %v3363_v54, %v1634_v6  ;;  %v1066_v57 = vsel %vm723_vm2, %v1063_v26, %v1065_v7  ;;  %v2100_v7 = vld [vmem:[%s2282_s28 + $0x58] sm:$0xff]  ;;  %s1989_s28 = spop %1988 }
 0x192   : > { %v1365_v43 = vand.u32 2147483647, %v1361_v3  ;;  %v1067_v3 = vrot.slane %v3884_v61, 7  ;;  %v1074_v19 = vsub.f32 %v3889_v53, %v1064_v1  ;;  %s1991_s12 = spop %1990 }
 0x193   : > { %977 = vrot.lane.b32.xlu2 %v968_v32, %s2167_s24  ;;  %v1646_v33 = vand.u32 2147483647, %v1642_v29  ;;  %v3468_v32 = vpop.permute.xlu2 %632  ;;  %s3644_s8 = spop %1992 }
 0x194   : > { %1374 = vrot.lane.b32.xlu0 %v1365_v43, %s2168_s6  ;;  %v1078_v52 = vand.u32 2147483647, %v1074_v19 }
 0x196   : > { %v1353_v30 = vpop.permute.xlu0 %1352 }
 0x197   : > { %v1355_v23 = vsel %vm674_vm5, %v1351_v8, %v1353_v30  ;;  %v1689_v36 = vpop.permute.xlu1 %1688  ;;  %v1068_v30 = vsel %vm723_vm2, %v1064_v1, %v1067_v3  ;;  %v3890_v3 = vld [vmem:[#allocation56_spill] sm:$0xff] }
 0x198   : > { %v1363_v17 = vsub.f32 %v3010_v41, %v1355_v23  ;;  %v1700_v18 = vsub.f32 %v3077_v13, %v1689_v36  ;;  %v1073_v23 = vsub.f32 %v3887_v60, %v1063_v26 }
 0x19a   : > { %v1367_v28 = vand.u32 2147483647, %v1363_v17  ;;  %v1704_v20 = vand.u32 2147483647, %v1700_v18  ;;  %v1075_v17 = vsub.f32 %v3888_v0, %v1066_v57  ;;  %v1077_v49 = vand.u32 2147483647, %v1073_v23 }
 0x19b   : > { %1376 = vrot.lane.b32.xlu2 %v1366_v58, %s2168_s6  ;;  %v1076_v58 = vsub.f32 %v3884_v61, %v1068_v30  ;;  %v3479_v6 = vpop.permute.xlu2 %636 }
 0x19c   : > { %1378 = vrot.lane.b32.xlu1 %v1367_v28, %s2168_s6  ;;  %1651 = vrot.lane.b32.xlu0 %v1643_v11, %s2167_s24  ;;  %v1079_v11 = vand.u32 2147483647, %v1075_v17  ;;  %v1085_v29 = vrot.slane %v1077_v49, 1 }
 0x19d   : > { %v1080_v28 = vand.u32 2147483647, %v1076_v58 }
 0x19e   : > { %v1628_v24 = vpop.permute.xlu0 %1627 }
 0x19f   : > { %v1633_v40 = vsel %vm613_vm4, %v1626_v63, %v1628_v24  ;;  %v3459_v34 = vpop.permute.xlu1 %638  ;;  %v1086_v24 = vrot.slane %v1079_v11, 1  ;;  %v1089_v60 = vrot.slane %v1080_v28, 1 }
 0x1a0   : > { %v1640_v14 = vsub.f32 %v3885_v47, %v1633_v40 }
 0x1a1   : > { %v1087_v53 = vsel %vm746_vm3, %v1085_v29, %v1086_v24 }
 0x1a2   : > { %v1644_v62 = vand.u32 2147483647, %v1640_v14 }
 0x1a3   : > { %1319 = vrot.lane.b32.xlu2 %v1308_v55, %s2167_s24  ;;  %v1088_v55 = vrot.slane %v1078_v52, 1 }
 0x1a4   : > { %1655 = vrot.lane.b32.xlu1 %v1645_v2, %s2167_s24  ;;  %1657 = vrot.lane.b32.xlu0 %v1646_v33, %s2167_s24  ;;  %v3487_v2 = vpop.permute.xlu2 %693 }
 0x1a5   : > { %v1090_v0 = vsel %vm746_vm3, %v1088_v55, %v1089_v60 }
 0x1a6   : > { %v1685_v5 = vpop.permute.xlu0 %1684  ;;  %v1095_v33 = vadd.f32 %v1090_v0, %v1087_v53 }
 0x1a7   : > { %v1692_v38 = vsel %vm674_vm5, %v1685_v5, %v1687_v48  ;;  %v1698_v8 = vsub.f32 %v3354_v39, %v1685_v5  ;;  %v3470_v43 = vpop.permute.xlu1 %695  ;;  %v1096_v48 = vsel %vm746_vm3, %v1086_v24, 0.0  ;;  %v1098_v5 = vsel %vm746_vm3, %v1089_v60, 0.0 }
 0x1a8   : > { %v1699_v15 = vsub.f32 %v3885_v47, %v1692_v38  ;;  %v1097_v18 = vadd.f32 %v1096_v48, %v1095_v33 }
 0x1a9   : > { %v1702_v37 = vand.u32 2147483647, %v1698_v8  ;;  %v1401_v8 = vrot.slane %v3334_v44, 7 }
 0x1aa   : > { %v1703_v35 = vand.u32 2147483647, %v1699_v15  ;;  %v1099_v38 = vadd.f32 %v1098_v5, %v1097_v18  ;;  %v1402_v15 = vrot.slane %v3318_v45, 7  ;;  %v3891_v18 = vld [vmem:[#allocation63_spill] sm:$0xff] }
 0x1ab   : > { %1710 = vrot.lane.b32.xlu2 %v1702_v37, %s2168_s6  ;;  %v1403_v37 = vrot.slane %v3344_v9, 7  ;;  %v1261_v5 = vsub.f32 %v3891_v18, %v2100_v7 }
 0x1ac   : > { %1712 = vrot.lane.b32.xlu1 %v1703_v35, %s2168_s6  ;;  %1714 = vrot.lane.b32.xlu0 %v1704_v20, %s2168_s6  ;;  %v1405_v20 = vrot.slane %v3010_v41, 7  ;;  %v3499_v40 = vpop.permute.xlu2 %697  ;;  %v397_v35 = vlaneseq  ;;  %v1412_v1 = vsub.f32 %v3318_v45, %v1402_v15 }
 0x1ae   : > { %v1691_v59 = vpop.permute.xlu0 %1690  ;;  %v398_v26 = vand.u32 127, %v397_v35 }
 0x1af   : > { %v1693_v46 = vsel %vm674_vm5, %v1689_v36, %v1691_v59  ;;  %v3483_v25 = vpop.permute.xlu1 %699 }
 0x1b0   : > { %v1701_v63 = vsub.f32 %v3363_v54, %v1693_v46  ;;  %v1406_v46 = vsel %vm723_vm2, %v1402_v15, %v1405_v20  ;;  %v399_v23 = vadd.s32 128, %v398_v26  ;;  %v404_v60 = vand.u32 15, %v398_v26 }
 0x1b2   : > { %v1705_v42 = vand.u32 2147483647, %v1701_v63  ;;  %v1411_v63 = vsub.f32 %v3334_v44, %v1401_v8  ;;  %v1416_v44 = vand.u32 2147483647, %v1412_v1  ;;  %v411_v29 = vand.u32 15, %v399_v23 }
 0x1b3   : > { %1653 = vrot.lane.b32.xlu2 %v1644_v62, %s2167_s24  ;;  %v1404_v62 = vsel %vm723_vm2, %v1401_v8, %v1403_v37  ;;  %vm3525_vm9 = vcmp.ne.s32.totalorder %v404_v60, 15 }
 0x1b4   : > { %v1413_v57 = vsub.f32 %v3344_v9, %v1404_v62  ;;  %v1415_v45 = vand.u32 2147483647, %v1411_v63  ;;  %v1426_v0 = vrot.slane %v1416_v44, 1  ;;  %vm3521_vm8 = vcmp.ne.s32.totalorder %v411_v29, 15 }
 0x1b5   : > { %v1265_v63 = vand.u32 2147483647, %v1261_v5  ;;  %v703_v44 = vsel %vm701_vm6, %v3499_v40, %v3483_v25 }
 0x1b6   : > { %v3481_v51 = vpop.permute.xlu0 %975  ;;  %v1417_v9 = vand.u32 2147483647, %v1413_v57 }
 0x1b7   : > { %v3491_v36 = vpop.permute.xlu1 %981  ;;  %v1268_v1 = vadd.f32 %v3314_v22, %v1265_v63 }
 0x1b8   : > { %v1424_v33 = vrot.slane %v1417_v9, 1  ;;  %v1743_v9 = vrot.slane %v3363_v54, 7 }
 0x1bb   : > { %1716 = vrot.lane.b32.xlu2 %v1705_v42, %s2168_s6  ;;  %v1219_v42 = vadd.f32 %v2100_v7, %v3890_v3 }
 0x1bd   : > { %v1223_v11 = vand.u32 2147483647, %v1219_v42 }
 0x1be   : > { %v3489_v61 = vpop.permute.xlu0 %979 }
 0x1bf   : > { %v1037_v59 = vpop.permute.xlu1 %1036  ;;  %v1226_v55 = vadd.f32 %v3311_v31, %v1223_v11  ;;  %v642_v31 = vsel %vm640_vm7, %v3479_v6, %v3459_v34  ;;  %v650_v6 = vsel %vm3521_vm8, %v3459_v34, 0.0  ;;  %v702_v34 = vsel %vm701_vm6, %v3487_v2, %v3470_v43 }
 0x1c0   : > { %v1048_v17 = vsel %vm701_vm6, %v1037_v59, 0.0  ;;  %v654_v42 = vsel %vm640_vm7, %v650_v6, 0.0 }
 0x1c6   : > { %v1035_v14 = vpop.permute.xlu0 %1034 }
 0x1c7   : > { %v1042_v30 = vsel %vm701_vm6, %v1035_v14, %v1037_v59 }
 0x1c8   : > { %v1049_v58 = vadd.f32 %v1048_v17, %v1042_v30  ;;  %v1434_v30 = vsel %vm746_vm3, %v1424_v33, 0.0  ;;  %v708_v17 = vsel %vm701_vm6, %v3470_v43, 0.0 }
 0x1c9   : > { %v709_v11 = vadd.f32 %v708_v17, %v702_v34 }
 0x1ce   : > { %v1039_v49 = vpop.permute.xlu0 %1038 }
 0x1d6   : > { %1248 = vadd.xlane.f32.xlu1 %v3278_v12  ;;  %1100 = vadd.xlane.f32.xlu0 %v1099_v38  ;;  %v1414_v12 = vsub.f32 %v3010_v41, %v1406_v46 }
 0x1d8   : > { %v1418_v28 = vand.u32 2147483647, %v1414_v12 }
 0x1da   : > { %v1427_v48 = vrot.slane %v1418_v28, 1 }
 0x1dc   : > { %v1428_v46 = vsel %vm746_vm3, %v1426_v0, %v1427_v48  ;;  %v1436_v22 = vsel %vm746_vm3, %v1427_v48, 0.0 }
 0x1dd   : > { %v3512_v19 = vpop.permute.xlu2 %1313 }
 0x1de   : > { %1586 = vadd.xlane.f32.xlu1 %v3295_v27  ;;  %1565 = vadd.xlane.f32.xlu0 %v3309_v21  ;;  %v1423_v27 = vrot.slane %v1415_v45, 1 }
 0x1df   : > { %v1041_v52 = vpop.permute.xlu1 %1040 }
 0x1e0   : > { %v1043_v41 = vsel %vm701_vm6, %v1039_v49, %v1041_v52  ;;  %v1051_v53 = vsel %vm701_vm6, %v1041_v52, 0.0  ;;  %v1425_v62 = vsel %vm746_vm3, %v1423_v27, %v1424_v33  ;;  %v1740_v49 = vrot.slane %v3885_v47, 7 }
 0x1e1   : > { %v1050_v24 = vadd.f32 %v1049_v58, %v1043_v41  ;;  %v1433_v3 = vadd.f32 %v1428_v46, %v1425_v62  ;;  %v1739_v58 = vrot.slane %v3354_v39, 7  ;;  %v1741_v52 = vrot.slane %v3077_v13, 7 }
 0x1e2   : > { %v710_v41 = vadd.f32 %v709_v11, %v703_v44  ;;  %v711_v27 = vsel %vm701_vm6, %v3483_v25, 0.0  ;;  %v984_v33 = vsel %vm640_vm7, %v3489_v61, %v3491_v36 }
 0x1e3   : > { %v1052_v21 = vadd.f32 %v1051_v53, %v1050_v24  ;;  %v1435_v23 = vadd.f32 %v1434_v30, %v1433_v3  ;;  %v1742_v60 = vsel %vm723_vm2, %v1739_v58, %v1741_v52  ;;  %v1744_v53 = vsel %vm723_vm2, %v1740_v49, %v1743_v9 }
 0x1e4   : > { %1227 = vadd.xlane.f32.xlu2 %v1226_v55  ;;  %v1749_v0 = vsub.f32 %v3354_v39, %v1739_v58  ;;  %v992_v39 = vsel %vm3521_vm8, %v3491_v36, 0.0 }
 0x1e5   : > { %v635_v8 = vpop.permute.xlu2 %634  ;;  %v1437_v45 = vadd.f32 %v1436_v22, %v1435_v23 }
 0x1e6   : > { %v641_v37 = vsel %vm640_vm7, %v3468_v32, %v635_v8  ;;  %v648_v20 = vsel %vm3521_vm8, %v635_v8, 0.0  ;;  %1053 = vadd.xlane.f32.xlu1 %v1052_v21  ;;  %v649_v32 = vsel %vm3525_vm9, %v642_v31, 0.0  ;;  %v1750_v21 = vsub.f32 %v3885_v47, %v1740_v49 }
 0x1e7   : > { %v647_v14 = vsel %vm3525_vm9, %v641_v37, 0.0  ;;  %v651_v59 = vsel %vm640_vm7, %v648_v20, 0.0  ;;  %v1751_v8 = vsub.f32 %v3077_v13, %v1742_v60  ;;  %v1752_v31 = vsub.f32 %v3363_v54, %v1744_v53 }
 0x1e8   : > { %v652_v26 = vadd.f32 %v651_v59, %v647_v14  ;;  %v991_v47 = vsel %vm3525_vm9, %v984_v33, 0.0  ;;  %v1753_v37 = vand.u32 2147483647, %v1749_v0  ;;  %v1754_v20 = vand.u32 2147483647, %v1750_v21 }
 0x1e9   : > { %v1755_v46 = vand.u32 2147483647, %v1751_v8  ;;  %v1756_v6 = vand.u32 2147483647, %v1752_v31 }
 0x1ea   : > { %v653_v7 = vadd.f32 %v652_v26, %v649_v32  ;;  %v996_v26 = vsel %vm640_vm7, %v992_v39, 0.0 }
 0x1eb   : > { %v1762_v3 = vrot.slane %v1755_v46, 1 }
 0x1ec   : > { %1269 = vadd.xlane.f32.xlu2 %v1268_v1  ;;  %v655_v57 = vadd.f32 %v654_v42, %v653_v7  ;;  %v1761_v7 = vrot.slane %v1753_v37, 1  ;;  %v1764_v42 = vrot.slane %v1754_v20, 1 }
 0x1ed   : > { %v978_v12 = vpop.permute.xlu2 %977  ;;  %v1772_v49 = vsel %vm746_vm3, %v1762_v3, 0.0 }
 0x1ee   : > { %656 = vadd.xlane.f32.xlu0 %v655_v57  ;;  %v983_v2 = vsel %vm640_vm7, %v3481_v51, %v978_v12  ;;  %v990_v43 = vsel %vm3521_vm8, %v978_v12, 0.0  ;;  %v1765_v57 = vrot.slane %v1756_v6, 1  ;;  %v1763_v34 = vsel %vm746_vm3, %v1761_v7, %v1762_v3 }
 0x1ef   : > { %v989_v40 = vsel %vm3525_vm9, %v983_v2, 0.0  ;;  %v993_v24 = vsel %vm640_vm7, %v990_v43, 0.0 }
 0x1f0   : > { %v994_v48 = vadd.f32 %v993_v24, %v989_v40  ;;  %v1766_v17 = vsel %vm746_vm3, %v1764_v42, %v1765_v57  ;;  %v912_v42 = vrot.slane %v3411_v4, 4 }
 0x1f1   : > { %v1771_v22 = vadd.f32 %v1766_v17, %v1763_v34 }
 0x1f2   : > { %v995_v62 = vadd.f32 %v994_v48, %v991_v47 }
 0x1f3   : > { %v1773_v43 = vadd.f32 %v1772_v49, %v1771_v22  ;;  %v913_v22 = vadd.f32 %v912_v42, %v3411_v4 }
 0x1f4   : > { %1438 = vadd.xlane.f32.xlu2 %v1437_v45  ;;  %v997_v32 = vadd.f32 %v996_v26, %v995_v62 }
 0x1f5   : > { %v1377_v28 = vpop.permute.xlu2 %1376 }
 0x1f6   : > { %v1316_v29 = vpop.permute.xlu1 %1315 }
 0x1f7   : > { %v1321_v55 = vsel %vm640_vm7, %v3512_v19, %v1316_v29  ;;  %v1328_v51 = vsel %vm3521_vm8, %v1316_v29, 0.0  ;;  %v712_v19 = vadd.f32 %v711_v27, %v710_v41 }
 0x1f8   : > { %v1327_v18 = vsel %vm3525_vm9, %v1321_v55, 0.0  ;;  %v1331_v5 = vsel %vm640_vm7, %v1328_v51, 0.0  ;;  %v1774_v55 = vsel %vm746_vm3, %v1765_v57, 0.0  ;;  %v933_v57 = vrot.slane %v3414_v10, 4 }
 0x1f9   : > { %v1332_v14 = vadd.f32 %v1331_v5, %v1327_v18 }
 0x1fc   : > { %713 = vadd.xlane.f32.xlu2 %v712_v19 }
 0x1fd   : > { %v1318_v25 = vpop.permute.xlu0 %1317  ;;  %v1320_v61 = vpop.permute.xlu2 %1319 }
 0x1fe   : > { %v1322_v59 = vsel %vm640_vm7, %v1318_v25, %v1320_v61  ;;  %v1330_v13 = vsel %vm3521_vm8, %v1320_v61, 0.0  ;;  %v1373_v30 = vpop.permute.xlu1 %1372 }
 0x1ff   : > { %v1329_v54 = vsel %vm3525_vm9, %v1322_v59, 0.0  ;;  %v1334_v63 = vsel %vm640_vm7, %v1330_v13, 0.0 }
 0x200   : > { %v1333_v36 = vadd.f32 %v1332_v14, %v1329_v54 }
 0x202   : > { %v1335_v1 = vadd.f32 %v1334_v63, %v1333_v36 }
 0x204   : > { %998 = vadd.xlane.f32.xlu2 %v997_v32  ;;  %1336 = vadd.xlane.f32.xlu0 %v1335_v1  ;;  %v764_v32 = vrot.slane %v3405_v50, 4  ;;  %v891_v1 = vrot.slane %v3407_v16, 4 }
 0x205   : > { %v1711_v12 = vpop.permute.xlu2 %1710 }
 0x206   : > { %v1375_v23 = vpop.permute.xlu0 %1374 }
 0x207   : > { %v1380_v45 = vsel %vm701_vm6, %v1373_v30, %v1375_v23  ;;  %v1386_v44 = vsel %vm701_vm6, %v1375_v23, 0.0  ;;  %v765_v30 = vadd.f32 %v764_v32, %v3405_v50  ;;  %v892_v23 = vadd.f32 %v891_v1, %v3407_v16 }
 0x208   : > { %v1387_v52 = vadd.f32 %v1386_v44, %v1380_v45  ;;  %v934_v45 = vadd.f32 %v933_v57, %v3414_v10 }
 0x209   : > { %v766_v44 = vrot.slane %v765_v30, 2 }
 0x20c   : > { %1607 = vadd.xlane.f32.xlu2 %v3338_v56  ;;  %v1775_v56 = vadd.f32 %v1774_v55, %v1773_v43  ;;  %v914_v43 = vrot.slane %v913_v22, 2 }
 0x20d   : > { %v1654_v58 = vpop.permute.xlu2 %1653 }
 0x20e   : > { %v1652_v11 = vpop.permute.xlu0 %1651  ;;  %v1379_v2 = vpop.permute.xlu1 %1378  ;;  %v1666_v29 = vsel %vm3521_vm8, %v1654_v58, 0.0  ;;  %v915_v10 = vadd.f32 %v914_v43, %v913_v22 }
 0x20f   : > { %v1381_v9 = vsel %vm701_vm6, %v1377_v28, %v1379_v2  ;;  %v1659_v40 = vsel %vm640_vm7, %v1652_v11, %v1654_v58  ;;  %v1389_v24 = vsel %vm701_vm6, %v1379_v2, 0.0  ;;  %v1669_v60 = vsel %vm640_vm7, %v1666_v29, 0.0 }
 0x210   : > { %v1388_v41 = vadd.f32 %v1387_v52, %v1381_v9  ;;  %v1665_v53 = vsel %vm3525_vm9, %v1659_v40, 0.0  ;;  %v893_v58 = vrot.slane %v892_v23, 2  ;;  %v935_v9 = vrot.slane %v934_v45, 2 }
 0x211   : > { %v1670_v0 = vadd.f32 %v1669_v60, %v1665_v53 }
 0x212   : > { %v1390_v51 = vadd.f32 %v1389_v24, %v1388_v41  ;;  %v767_v24 = vadd.f32 %v766_v44, %v765_v30  ;;  %v894_v55 = vadd.f32 %v893_v58, %v892_v23  ;;  %v936_v60 = vadd.f32 %v935_v9, %v934_v45 }
 0x214   : > { %1776 = vadd.xlane.f32.xlu2 %v1775_v56  ;;  %1391 = vadd.xlane.f32.xlu1 %v1390_v51 }
 0x215   : > { %v1717_v25 = vpop.permute.xlu2 %1716 }
 0x216   : > { %v1658_v28 = vpop.permute.xlu0 %1657  ;;  %v1656_v27 = vpop.permute.xlu1 %1655  ;;  %v1727_v20 = vsel %vm701_vm6, %v1717_v25, 0.0 }
 0x217   : > { %v1668_v21 = vsel %vm3521_vm8, %v1658_v28, 0.0  ;;  %v1660_v33 = vsel %vm640_vm7, %v1656_v27, %v1658_v28 }
 0x218   : > { %v1667_v48 = vsel %vm3525_vm9, %v1660_v33, 0.0  ;;  %v1672_v18 = vsel %vm640_vm7, %v1668_v21, 0.0 }
 0x219   : > { %v1671_v19 = vadd.f32 %v1670_v0, %v1667_v48  ;;  %v768_v48 = vrot.slane %v767_v24, 1 }
 0x21b   : > { %v1673_v5 = vadd.f32 %v1672_v18, %v1671_v19  ;;  %v895_v19 = vrot.slane %v894_v55, 1 }
 0x21d   : > { %1674 = vadd.xlane.f32.xlu0 %v1673_v5 }
 0x21e   : > { %v1715_v8 = vpop.permute.xlu0 %1714  ;;  %v1713_v31 = vpop.permute.xlu1 %1712 }
 0x21f   : > { %v1718_v39 = vsel %vm701_vm6, %v1711_v12, %v1713_v31  ;;  %v1724_v47 = vsel %vm701_vm6, %v1713_v31, 0.0  ;;  %v1719_v38 = vsel %vm701_vm6, %v1715_v8, %v1717_v25  ;;  %v937_v25 = vrot.slane %v936_v60, 1 }
 0x220   : > { %v1725_v61 = vadd.f32 %v1724_v47, %v1718_v39  ;;  %v916_v47 = vrot.slane %v915_v10, 1 }
 0x221   : > { %v938_v32 = vadd.f32 %v937_v25, %v936_v60 }
 0x222   : > { %v1726_v37 = vadd.f32 %v1725_v61, %v1719_v38 }
 0x224   : > { %v1728_v15 = vadd.f32 %v1727_v20, %v1726_v37 }
 0x226   : > { %1729 = vadd.xlane.f32.xlu1 %v1728_v15 }
 0x249   : > { %v1101_v14 = vpop.xlane.xlu0 %1100  ;;  %v1249_v62 = vpop.xlane.xlu1 %1248 }
 0x24a   : > { %v1102_v11 = vrot.slane %v1101_v14, 4  ;;  %v1250_v29 = vrot.slane %v1249_v62, 4 }
 0x24c   : > { %v1103_v56 = vadd.f32 %v1102_v11, %v1101_v14  ;;  %v1251_v53 = vadd.f32 %v1250_v29, %v1249_v62  ;;  %v769_v14 = vadd.f32 %v768_v48, %v767_v24 }
 0x24e   : > { %v1104_v18 = vrot.slane %v1103_v56, 2  ;;  %v1252_v61 = vrot.slane %v1251_v53, 2 }
 0x251   : > { %v3624_v13 = vpop.xlane.xlu0 %1565  ;;  %v3626_v36 = vpop.xlane.xlu1 %1586 }
 0x252   : > { %v1588_v45 = vrot.slane %v3626_v36, 4 }
 0x257   : > { %v1228_v59 = vpop.xlane.xlu2 %1227 }
 0x258   : > { %v1229_v41 = vrot.slane %v1228_v59, 4 }
 0x259   : > { %v1054_v34 = vpop.xlane.xlu1 %1053 }
 0x25a   : > { %v1055_v49 = vrot.slane %v1054_v34, 4  ;;  %v1230_v51 = vadd.f32 %v1229_v41, %v1228_v59 }
 0x25c   : > { %v1056_v40 = vadd.f32 %v1055_v49, %v1054_v34  ;;  %v1231_v39 = vrot.slane %v1230_v51, 2  ;;  %v1567_v34 = vrot.slane %v3624_v13, 4 }
 0x25e   : > { %v1057_v27 = vrot.slane %v1056_v40, 2  ;;  %v1568_v41 = vadd.f32 %v1567_v34, %v3624_v13 }
 0x25f   : > { %v1270_v54 = vpop.xlane.xlu2 %1269 }
 0x260   : > { %v1271_v16 = vrot.slane %v1270_v54, 4  ;;  %v1058_v59 = vadd.f32 %v1057_v27, %v1056_v40 }
 0x261   : > { %v657_v46 = vpop.xlane.xlu0 %656 }
 0x262   : > { %v658_v6 = vrot.slane %v657_v46, 4  ;;  %v1272_v0 = vadd.f32 %v1271_v16, %v1270_v54  ;;  %v1059_v30 = vrot.slane %v1058_v59, 1 }
 0x264   : > { %v659_v26 = vadd.f32 %v658_v6, %v657_v46  ;;  %v1273_v15 = vrot.slane %v1272_v0, 2  ;;  %v896_v46 = vadd.f32 %v895_v19, %v894_v55  ;;  %v1105_v6 = vadd.f32 %v1104_v18, %v1103_v56 }
 0x265   : > { %v1060_v43 = vadd.f32 %v1059_v30, %v1058_v59 }
 0x266   : > { %v660_v63 = vrot.slane %v659_v26, 2  ;;  %v1274_v23 = vadd.f32 %v1273_v15, %v1272_v0  ;;  %v1106_v22 = vrot.slane %v1105_v6, 1 }
 0x267   : > { %v3630_v7 = vpop.xlane.xlu2 %1438 }
 0x268   : > { %v661_v3 = vadd.f32 %v660_v63, %v659_v26  ;;  %v917_v26 = vadd.f32 %v916_v47, %v915_v10  ;;  %v1232_v63 = vadd.f32 %v1231_v39, %v1230_v51  ;;  %v1440_v57 = vrot.slane %v3630_v7, 4 }
 0x269   : > { %v1275_v9 = vrot.slane %v1274_v23, 1  ;;  %v1107_v29 = vadd.f32 %v1106_v22, %v1105_v6  ;;  %v1569_v10 = vrot.slane %v1568_v41, 2 }
 0x26a   : > { %v662_v12 = vrot.slane %v661_v3, 1  ;;  %v1233_v44 = vrot.slane %v1232_v63, 1 }
 0x26b   : > { %v1570_v27 = vadd.f32 %v1569_v10, %v1568_v41 }
 0x26c   : > { %v663_v17 = vadd.f32 %v662_v12, %v661_v3  ;;  %v1253_v3 = vadd.f32 %v1252_v61, %v1251_v53  ;;  %v1234_v40 = vadd.f32 %v1233_v44, %v1232_v63 }
 0x26e   : > { %1994 = vpush %v663_v17 }
 0x26f   : > { %v714_v52 = vpop.xlane.xlu2 %713 }
 0x270   : > { %v715_v2 = vrot.slane %v714_v52, 4 }
 0x272   : > { %v716_v50 = vadd.f32 %v715_v2, %v714_v52  ;;  %v1254_v52 = vrot.slane %v1253_v3, 1  ;;  %v1441_v2 = vadd.f32 %v1440_v57, %v3630_v7 }
 0x274   : > { %v717_v4 = vrot.slane %v716_v50, 2  ;;  %v1255_v24 = vadd.f32 %v1254_v52, %v1253_v3  ;;  %v1442_v56 = vrot.slane %v1441_v2, 2 }
 0x276   : > { %v718_v28 = vadd.f32 %v717_v4, %v716_v50  ;;  %v1589_v50 = vadd.f32 %v1588_v45, %v3626_v36  ;;  %v1276_v4 = vadd.f32 %v1275_v9, %v1274_v23 }
 0x277   : > { %v999_v21 = vpop.xlane.xlu2 %998  ;;  %v1337_v33 = vpop.xlane.xlu0 %1336 }
 0x278   : > { %v1000_v5 = vrot.slane %v999_v21, 4  ;;  %v1338_v8 = vrot.slane %v1337_v33, 4  ;;  %v719_v31 = vrot.slane %v718_v28, 1  ;;  %v1590_v60 = vrot.slane %v1589_v50, 2 }
 0x27a   : > { %v1001_v38 = vadd.f32 %v1000_v5, %v999_v21  ;;  %v1339_v37 = vadd.f32 %v1338_v8, %v1337_v33  ;;  %v720_v20 = vadd.f32 %v719_v31, %v718_v28  ;;  %v1443_v28 = vadd.f32 %v1442_v56, %v1441_v2 }
 0x27b   : > { %v1591_v0 = vadd.f32 %v1590_v60, %v1589_v50  ;;  %v1571_v8 = vrot.slane %v1570_v27, 1 }
 0x27c   : > { %v1002_v62 = vrot.slane %v1001_v38, 2  ;;  %v1340_v54 = vrot.slane %v1339_v37, 2  ;;  %1996 = vpush %v720_v20  ;;  %v1444_v19 = vrot.slane %v1443_v28, 1 }
 0x27d   : > { %1998 = vpush %v769_v14  ;;  %v1592_v47 = vrot.slane %v1591_v0, 1  ;;  %v1572_v20 = vadd.f32 %v1571_v8, %v1570_v27 }
 0x27e   : > { %2000 = vpush %v896_v46  ;;  %v1003_v1 = vadd.f32 %v1002_v62, %v1001_v38  ;;  %v1341_v42 = vadd.f32 %v1340_v54, %v1339_v37  ;;  %v1445_v37 = vadd.f32 %v1444_v19, %v1443_v28 }
 0x27f   : > { %2002 = vpush %v917_v26  ;;  %v1608_v12 = vpop.xlane.xlu2 %1607  ;;  %v1593_v59 = vadd.f32 %v1592_v47, %v1591_v0 }
 0x280   : > { %2004 = vpush %v938_v32  ;;  %v1004_v17 = vrot.slane %v1003_v1, 1  ;;  %v1609_v58 = vrot.slane %v1608_v12, 4  ;;  %v1342_v11 = vrot.slane %v1341_v42, 1 }
 0x282   : > { %v1005_v49 = vadd.f32 %v1004_v17, %v1003_v1  ;;  %v1610_v16 = vadd.f32 %v1609_v58, %v1608_v12  ;;  %v1343_v55 = vadd.f32 %v1342_v11, %v1341_v42  ;;  %v1787_v17 = vshrl.u32 %v397_v35, 7 }
 0x284   : > { %2006 = vpush %v1005_v49  ;;  %v1611_v13 = vrot.slane %v1610_v16, 2  ;;  %vm1788_vm10 = vcmp.eq.s32.totalorder %v1787_v17, 0  ;;  %vm1791_vm11 = vcmp.eq.s32.totalorder %v1787_v17, 1  ;;  %vm1795_vm12 = vcmp.eq.s32.totalorder %v1787_v17, 2 }
 0x285   : > { %2008 = vpush %v1060_v43  ;;  %vm1799_vm13 = vcmp.eq.s32.totalorder %v1787_v17, 3 }
 0x286   : > { %2010 = vpush %v1107_v29  ;;  %v1612_v48 = vadd.f32 %v1611_v13, %v1610_v16 }
 0x287   : > { %2012 = vpush %v1234_v40  ;;  %v1392_v51 = vpop.xlane.xlu1 %1391  ;;  %v1777_v21 = vpop.xlane.xlu2 %1776 }
 0x288   : > { %2014 = vpush %v1255_v24  ;;  %v1393_v7 = vrot.slane %v1392_v51, 4  ;;  %v1778_v31 = vrot.slane %v1777_v21, 4  ;;  %v1613_v61 = vrot.slane %v1612_v48, 1 }
 0x289   : > { %2016 = vpush %v1276_v4 }
 0x28a   : > { %2018 = vpush %v1343_v55  ;;  %v1394_v53 = vadd.f32 %v1393_v7, %v1392_v51  ;;  %v1779_v15 = vadd.f32 %v1778_v31, %v1777_v21  ;;  %v1614_v62 = vadd.f32 %v1613_v61, %v1612_v48 }
 0x28c   : > { %v1395_v36 = vrot.slane %v1394_v53, 2  ;;  %v1780_v46 = vrot.slane %v1779_v15, 2 }
 0x28e   : > { %v1396_v33 = vadd.f32 %v1395_v36, %v1394_v53  ;;  %v1781_v3 = vadd.f32 %v1780_v46, %v1779_v15 }
 0x290   : > { %v1675_v18 = vpop.xlane.xlu0 %1674  ;;  %v1397_v5 = vrot.slane %v1396_v33, 1  ;;  %v1782_v12 = vrot.slane %v1781_v3, 1 }
 0x291   : > { %v1676_v39 = vrot.slane %v1675_v18, 4 }
 0x292   : > { %v1398_v25 = vadd.f32 %v1397_v5, %v1396_v33  ;;  %v1783_v34 = vadd.f32 %v1782_v12, %v1781_v3 }
 0x293   : > { %v1677_v38 = vadd.f32 %v1676_v39, %v1675_v18 }
 0x294   : > { %2020 = vpush %v1398_v25 }
 0x295   : > { %v1678_v14 = vrot.slane %v1677_v38, 2  ;;  %2022 = vpush %v1445_v37 }
 0x296   : > { %2024 = vpush %v1572_v20 }
 0x297   : > { %v1679_v54 = vadd.f32 %v1678_v14, %v1677_v38  ;;  %2026 = vpush %v1593_v59 }
 0x298   : > { %2028 = vpush %v1614_v62 }
 0x299   : > { %v1730_v6 = vpop.xlane.xlu1 %1729  ;;  %v1680_v26 = vrot.slane %v1679_v54, 1 }
 0x29a   : > { %v1731_v63 = vrot.slane %v1730_v6, 4 }
 0x29b   : > { %v1681_v32 = vadd.f32 %v1680_v26, %v1679_v54 }
 0x29c   : > { %v1732_v1 = vadd.f32 %v1731_v63, %v1730_v6 }
 0x29d   : > { %2030 = vpush %v1681_v32 }
 0x29e   : > { %v1733_v42 = vrot.slane %v1732_v1, 2 }
 0x29f   : > { %s1995_s0 = spop %1994 }
 0x2a0   : > { %v1734_v57 = vadd.f32 %v1733_v42, %v1732_v1 }
 0x2a2   : > { %v1735_v30 = vrot.slane %v1734_v57, 1 }
 0x2a4   : > { %v1736_v23 = vadd.f32 %v1735_v30, %v1734_v57 }
 0x2a6   : > { %2032 = vpush %v1736_v23 }
 0x2a7   : > { %2034 = vpush %v1783_v34 }
 0x2ad   : > { %s1997_s1 = spop %1996 }
 0x2ae   : > { %s1999_s2 = spop %1998  ;;  %s722_s20 = sadd.f32 %s1997_s1, %s1995_s0 }
 0x2af   : > { %s2001_s30 = spop %2000 }
 0x2b0   : > { %s2003_s9 = spop %2002  ;;  %s771_s22 = sadd.f32 %s1999_s2, %s722_s20 }
 0x2b1   : > { %s3646_s10 = spop %2004  ;;  %s898_s29 = sadd.f32 %s2001_s30, %s1989_s28 }
 0x2b2   : > { %s919_s6 = sadd.f32 %s2003_s9, %s1991_s12 }
 0x2b3   : > { %s940_s20 = sadd.f32 %s3646_s10, %s3644_s8 }
 0x2b5   : > { %s2007_s13 = spop %2006 }
 0x2b6   : > { %s2009_s21 = spop %2008  ;;  %s1007_s23 = sadd.f32 %s2007_s13, %s771_s22 }
 0x2b7   : > { %s2011_s27 = spop %2010 }
 0x2b8   : > { %s2013_s7 = spop %2012  ;;  %s1062_s26 = sadd.f32 %s2009_s21, %s1007_s23 }
 0x2b9   : > { %s2015_s25 = spop %2014  ;;  %s1236_s19 = sadd.f32 %s2013_s7, %s898_s29 }
 0x2ba   : > { %s2017_s11 = spop %2016  ;;  %s1109_s24 = sadd.f32 %s2011_s27, %s1062_s26 }
 0x2bb   : > { %s2019_s14 = spop %2018  ;;  %s1257_s16 = sadd.f32 %s2015_s25, %s919_s6 }
 0x2bc   : > { %s1345_s1 = sadd.f32 %s2019_s14, %s1109_s24 }
 0x2bd   : > { %s1278_s22 = sadd.f32 %s2017_s11, %s940_s20 }
 0x2c5   : > { %s2021_s5 = spop %2020 }
 0x2c6   : > { %s2023_s18 = spop %2022  ;;  %s1400_s13 = sadd.f32 %s2021_s5, %s1345_s1 }
 0x2c7   : > { %s2025_s3 = spop %2024 }
 0x2c8   : > { %s2027_s0 = spop %2026  ;;  %s1574_s17 = sadd.f32 %s2025_s3, %s1236_s19 }
 0x2c9   : > { %s1595_s2 = sadd.f32 %s2027_s0, %s1257_s16  ;;  %s2029_s21 = spop %2028 }
 0x2ca   : > { %v1789_v22 = vstv %s1574_s17  ;;  %s1447_s28 = sadd.f32 %s2023_s18, %s1400_s13  ;;  %s1933_s17 = sshll.u32 %s3902_s15, 3 }
 0x2cb   : > { %v1792_v45 = vstv %s1595_s2  ;;  %s1616_s30 = sadd.f32 %s2029_s21, %s1278_s22  ;;  %v1790_v44 = vsel %vm1788_vm10, %v1789_v22, 0.0  ;;  %s292_s7 = scalar_lea.vmem %s3668_s4, %s1933_s17 }
 0x2cc   : > { %v1793_v58 = vsel %vm1791_vm11, %v1792_v45, 0.0 }
 0x2cd   : > { %v1794_v49 = vadd.f32 %v1793_v58, %v1790_v44  ;;  %v1796_v35 = vstv %s1616_s30 }
 0x2ce   : > { %s2031_s12 = spop %2030  ;;  %v1797_v52 = vsel %vm1795_vm12, %v1796_v35, 0.0 }
 0x2cf   : > { %s1683_s9 = sadd.f32 %s2031_s12, %s1447_s28  ;;  %v1798_v11 = vadd.f32 %v1797_v52, %v1794_v49 }
 0x2d7   : > { %s2033_s27 = spop %2032 }
 0x2d8   : > { %s1738_s3 = sadd.f32 %s2033_s27, %s1683_s9  ;;  %s2035_s16 = spop %2034 }
 0x2da   : > { %s1785_s19 = sadd.f32 %s2035_s16, %s1738_s3 }
 0x2dc   : > { %v1800_v2 = vstv %s1785_s19 }
 0x2dd   : > { %v1801_v43 = vsel %vm1799_vm13, %v1800_v2, 0.0 }
 0x2de   : > { %v1802_v9 = vadd.f32 %v1801_v43, %v1798_v11 }
 0x2e0   : > { %1805 = vst [vmem:[%s292_s7] sm:$0xff] %v1802_v9 }
 0x2e1 PF: > { %s3896_s23 = sld [smem:[#allocation9_spill]] }
 0x2e2   : > { %s3897_s15 = sld [smem:[#allocation8_spill]] }
 0x2e3   : > { %s3898_s16 = sld [smem:[#allocation10_spill]] }
 0x2e7   : > { %s16_s17 = sadd.s32 1, %s3896_s23  }
 0x2e8   : > { %p13_p8 = scmp.ge.s32.totalorder %s16_s17, 4  }
 0x2ea   :  { %15 = sbr.rel (!%p13_p8) target bundleno = 8 (0x8), region = 82 }
 0x2ef   :  { %1825 = vsyncpa [#allocation3], 1 }
 0x2f0   :  { %1827 = vsyncpa [#allocation3 + $0x1], 1 }
 0x2f1   :  { %1828 = vsyncpa [#allocation5], 1 }

</bundles_post_ra>
